<compile_context>
chip_gen: v7x
topology: tpu7x:2x2x1
jax: 0.10.0
libtpu: 0.0.40
codegen_flags: <defaults>
</compile_context>

<pallas_src>
import math
from functools import partial

import jax
import jax.numpy as jnp
from jax import lax
from jax.experimental import pallas as pl
from jax.experimental.pallas import tpu as pltpu


# ----------------------------------------------------------------------------
# Ref ordering for the fused kernel (positional unpacking)
# ----------------------------------------------------------------------------
_DATA_KEYS = ("x", "kv", "occm", "norm_g", "norm_b", "head_w", "head_b")
_CROSS_KEYS = ("lnq_g", "lnq_b", "lnkv_g", "lnkv_b",
               "q_w", "kv_w", "proj_w", "proj_b",
               "ln2_g", "ln2_b", "fc1_w", "fc1_b", "fc2_w", "fc2_b",
               "mask_w", "mask_b")
_PATCH_KEYS = ("ln1_g", "ln1_b", "qkv_w", "proj_w", "proj_b",
               "ln2_g", "ln2_b", "fc1_w", "fc1_b", "fc2_w", "fc2_b")


# ----------------------------------------------------------------------------
# In-kernel helpers (pure jnp on loaded values — everything stays in VMEM/vregs)
# ----------------------------------------------------------------------------
def _ln(x, g, b, eps=1e-5):
    mu = jnp.mean(x, axis=-1, keepdims=True)
    xc = x - mu
    var = jnp.mean(xc * xc, axis=-1, keepdims=True)
    return xc * lax.rsqrt(var + eps) * g + b


def _gelu(x):
    # exact (erf) GELU, matching torch.nn.GELU default
    return 0.5 * x * (1.0 + lax.erf(x * 0.7071067811865476))


def _sigmoid(z):
    return pl.reciprocal(1.0 + jnp.exp(-z), approx=True)


def _attn_proj(q, k, v, proj_w, bias, *, B, Nq, Nk, H, Dh):
    """Per-batch, per-head attention fused with the output projection.

    q: (B*Nq, H*Dh)  (scale already folded into the q weight)
    k,v: (B*Nk, H*Dh); proj_w: (H*Dh, D); bias: (B*Nq, Nk) or None.
    Returns (B*Nq, D) = [softmax(q_bh k_bh^T + bias_b) v_bh] @ proj_w, summed
    over heads (no lane-sparse concat; every MXU op is D-dense on the output).
    """
    outs = []
    for b in range(B):
        qb = q[b * Nq:(b + 1) * Nq, :]
        kb = k[b * Nk:(b + 1) * Nk, :]
        vb = v[b * Nk:(b + 1) * Nk, :]
        bias_b = None if bias is None else bias[b * Nq:(b + 1) * Nq, :]
        acc = None
        for h in range(H):
            sl = slice(h * Dh, (h + 1) * Dh)
            s = lax.dot_general(qb[:, sl], kb[:, sl],
                                (((1,), (1,)), ((), ())),   # contract Dh, no k.T copy
                                preferred_element_type=jnp.float32)
            if bias_b is not None:
                s = s + bias_b
            s = s - jnp.max(s, axis=-1, keepdims=True)
            p = jnp.exp(s)
            p = p * pl.reciprocal(jnp.sum(p, axis=-1, keepdims=True), approx=True)
            oh = jnp.dot(p, vb[:, sl], preferred_element_type=jnp.float32)      # (Nq, Dh)
            contrib = jnp.dot(oh, proj_w[sl, :],
                              preferred_element_type=jnp.float32)               # (Nq, D)
            acc = contrib if acc is None else acc + contrib
        outs.append(acc)
    return jnp.concatenate(outs, axis=0)                                        # (B*Nq, D)


# ----------------------------------------------------------------------------
# Single fused kernel: all layer pairs (grid axis) + final norm + head
# ----------------------------------------------------------------------------
def _decoder_kernel(*refs, B, Nx, Nkv, H, Dh, D, rep):
    nd, nc, npk = len(_DATA_KEYS), len(_CROSS_KEYS), len(_PATCH_KEYS)
    d = dict(zip(_DATA_KEYS, refs[:nd]))
    c = dict(zip(_CROSS_KEYS, refs[nd:nd + nc]))
    p = dict(zip(_PATCH_KEYS, refs[nd + nc:nd + nc + npk]))
    o_ref = refs[nd + nc + npk]
    x_sc = refs[nd + nc + npk + 1]

    f32 = jnp.float32
    l = pl.program_id(0)

    @pl.when(l == 0)
    def _():
        x_sc[...] = d["x"][...].astype(f32)

    x = x_sc[...]                               # (B*Nx, D) residual stream (VMEM-resident)
    kvx = d["kv"][...].astype(f32)              # (B*Nkv, D)
    occm = d["occm"][...].astype(f32)           # (B*Nx, Nkv) additive cross-attn logit bias

    # ---- Block_crossmodal: cross-attn(x -> [obj;col]) + MLP + mask head ----
    hq = _ln(x, c["lnq_g"][0], c["lnq_b"][0])
    hkv = _ln(kvx, c["lnkv_g"][0], c["lnkv_b"][0])
    q = jnp.dot(hq, c["q_w"][0], preferred_element_type=f32)        # scale folded into q_w
    kvp = jnp.dot(hkv, c["kv_w"][0], preferred_element_type=f32)    # (B*Nkv, 2D)
    a = _attn_proj(q, kvp[:, :D], kvp[:, D:], c["proj_w"][0], occm,
                   B=B, Nq=Nx, Nk=Nkv, H=H, Dh=Dh)
    a = a + c["proj_b"][0]
    h1 = x + a
    m = _ln(h1, c["ln2_g"][0], c["ln2_b"][0])
    m = _gelu(jnp.dot(m, c["fc1_w"][0], preferred_element_type=f32) + c["fc1_b"][0])
    m = jnp.dot(m, c["fc2_w"][0], preferred_element_type=f32) + c["fc2_b"][0]
    cout = h1 + m

    # mask head: narrow logits (B*Nx, md_max), sigmoid, lane-tile to D
    # (== mask.repeat(1, 1, D // mask_dim), since mask_dim | md_max | D)
    z = jnp.dot(cout, c["mask_w"][0], preferred_element_type=f32) + c["mask_b"][0]
    msk = _sigmoid(z)
    if rep > 1:
        msk = jnp.concatenate([msk] * rep, axis=-1)
    x = x * (1.0 - msk) + cout * msk

    # ---- Block_patch: standard pre-norm ViT self-attention block ----
    h2 = _ln(x, p["ln1_g"][0], p["ln1_b"][0])
    qkv = jnp.dot(h2, p["qkv_w"][0], preferred_element_type=f32)    # (M, 3D), q-third pre-scaled
    a2 = _attn_proj(qkv[:, :D], qkv[:, D:2 * D], qkv[:, 2 * D:],
                    p["proj_w"][0], None, B=B, Nq=Nx, Nk=Nx, H=H, Dh=Dh)
    a2 = a2 + p["proj_b"][0]
    x = x + a2
    m2 = _ln(x, p["ln2_g"][0], p["ln2_b"][0])
    m2 = _gelu(jnp.dot(m2, p["fc1_w"][0], preferred_element_type=f32) + p["fc1_b"][0])
    m2 = jnp.dot(m2, p["fc2_w"][0], preferred_element_type=f32) + p["fc2_b"][0]
    x = x + m2

    x_sc[...] = x                                # carry to next layer pair

    # ---- final norm + head, fused into the last grid step ----
    @pl.when(l == pl.num_programs(0) - 1)
    def _():
        y = _ln(x, d["norm_g"][...], d["norm_b"][...])
        y = jnp.dot(y, d["head_w"][...], preferred_element_type=f32) + d["head_b"][...]
        o_ref[...] = y.astype(o_ref.dtype)


# ----------------------------------------------------------------------------
# Host-side wrapper: single pallas_call, grid over layer pairs
# ----------------------------------------------------------------------------
def decoder_forward(params, x, obj, col, occm, *, num_heads):
    B, Nx, D = x.shape
    Nkv = obj.shape[1] + col.shape[1]
    H = num_heads
    Dh = D // H
    cross, patch = params["cross"], params["patch"]
    L = cross["q_w"].shape[0]
    md_max = cross["mask_w"].shape[-1]
    rep = D // md_max
    C = params["head_w"].shape[1]

    x_flat = x.reshape(B * Nx, D)
    kv_flat = jnp.concatenate([obj, col], axis=1).reshape(B * Nkv, D)
    occm_flat = occm.reshape(B * Nx, Nkv)

    data = [x_flat, kv_flat, occm_flat,
            params["norm_g"], params["norm_b"], params["head_w"], params["head_b"]]
    layer_args = [cross[k] for k in _CROSS_KEYS] + [patch[k] for k in _PATCH_KEYS]

    def const_spec(a):      # DMA'd once; block index constant across the layer grid
        return pl.BlockSpec(a.shape, lambda l, nd=a.ndim: (0,) * nd)

    def layer_spec(a):      # per-layer weight slab, prefetched for l+1 under l's compute
        return pl.BlockSpec((1,) + a.shape[1:], lambda l: (l, 0, 0))

    out = pl.pallas_call(
        partial(_decoder_kernel, B=B, Nx=Nx, Nkv=Nkv, H=H, Dh=Dh, D=D, rep=rep),
        out_shape=jax.ShapeDtypeStruct((B * Nx, C), x.dtype),
        grid=(L,),
        in_specs=[const_spec(a) for a in data] + [layer_spec(a) for a in layer_args],
        out_specs=pl.BlockSpec((B * Nx, C), lambda l: (0, 0)),
        scratch_shapes=[pltpu.VMEM((B * Nx, D), jnp.float32)],
        compiler_params=pltpu.CompilerParams(
            dimension_semantics=("arbitrary",),          # layer axis is sequential
            vmem_limit_bytes=32 * 1024 * 1024),          # headroom (matters on v5e)
    )(*(data + layer_args))
    return out.reshape(B, Nx, C)


# ----------------------------------------------------------------------------
# Deterministic parameter init (xavier_uniform Linear, ones/zeros LayerNorm,
# matching the module's _init_weights).  qkv_bias=False -> no q/k/v biases.
# Weights are returned already layer-stacked, with 1/sqrt(Dh) folded into the
# q projections and mask_w pre-tiled only to md_max (not to D).
# ----------------------------------------------------------------------------
def _xavier(key, fan_in, fan_out):
    bound = math.sqrt(6.0 / (fan_in + fan_out))
    return jax.random.uniform(key, (fan_in, fan_out), jnp.float32, -bound, bound)


def init_params(key, *, D, depth, num_heads, num_classes, mlp_ratio=4.0,
                mask_dims=(1, 8, 32, 128)):
    L = depth // 2
    assert L <= len(mask_dims)
    md_used = mask_dims[:L]
    md_max = max(md_used)
    assert D % md_max == 0 and all(md_max % m == 0 for m in md_used)
    hid = int(D * mlp_ratio)
    Dh = D // num_heads
    scale = Dh ** -0.5

    keys = iter(jax.random.split(key, 10 * L + 1))
    ones = lambda n: jnp.ones((1, n), jnp.float32)
    zeros = lambda n: jnp.zeros((1, n), jnp.float32)

    cross_layers, patch_layers = [], []
    for i in range(L):
        md = md_used[i]
        mask_w = jnp.tile(_xavier(next(keys), D, md), (1, md_max // md))
        cross_layers.append(dict(
            lnq_g=ones(D), lnq_b=zeros(D), lnkv_g=ones(D), lnkv_b=zeros(D),
            q_w=_xavier(next(keys), D, D) * scale,        # attention scale folded in
            kv_w=_xavier(next(keys), D, 2 * D),
            proj_w=_xavier(next(keys), D, D), proj_b=zeros(D),
            ln2_g=ones(D), ln2_b=zeros(D),
            fc1_w=_xavier(next(keys), D, hid), fc1_b=zeros(hid),
            fc2_w=_xavier(next(keys), hid, D), fc2_b=zeros(D),
            mask_w=mask_w, mask_b=zeros(md_max),
        ))
        qkv_w = _xavier(next(keys), D, 3 * D)
        qkv_w = jnp.concatenate([qkv_w[:, :D] * scale, qkv_w[:, D:]], axis=1)
        patch_layers.append(dict(
            ln1_g=ones(D), ln1_b=zeros(D),
            qkv_w=qkv_w,
            proj_w=_xavier(next(keys), D, D), proj_b=zeros(D),
            ln2_g=ones(D), ln2_b=zeros(D),
            fc1_w=_xavier(next(keys), D, hid), fc1_b=zeros(hid),
            fc2_w=_xavier(next(keys), hid, D), fc2_b=zeros(D),
        ))

    stack = lambda layers, k: jnp.stack([lyr[k] for lyr in layers], axis=0)
    return dict(
        cross={k: stack(cross_layers, k) for k in _CROSS_KEYS},
        patch={k: stack(patch_layers, k) for k in _PATCH_KEYS},
        norm_g=ones(D), norm_b=zeros(D),
        head_w=_xavier(next(keys), D, num_classes), head_b=zeros(num_classes),
    )


# ----------------------------------------------------------------------------
if __name__ == "__main__":
    B, Nx, Nobj, Ncol = 2, 8, 4, 4
    D, num_heads = 32, 4
    depth = 4                                  # depth // 2 = 2 layer pairs
    patch_size = 4
    num_classes = 2 * patch_size ** 2          # module asserts this relation

    root = jax.random.PRNGKey(0)
    kp, kx, ko, kc, km = jax.random.split(root, 5)

    params = init_params(kp, D=D, depth=depth, num_heads=num_heads,
                         num_classes=num_classes)

    x = jax.random.normal(kx, (B, Nx, D), jnp.float32)
    obj = jax.random.normal(ko, (B, Nobj, D), jnp.float32)
    col = jax.random.normal(kc, (B, Ncol, D), jnp.float32)
    occm = 0.1 * jax.random.normal(km, (B, Nx, Nobj + Ncol), jnp.float32)

    fwd = jax.jit(partial(decoder_forward, num_heads=num_heads))
    out = jax.block_until_ready(fwd(params, x, obj, col, occm))

    assert out.shape == (B, Nx, num_classes)
    assert bool(jnp.all(jnp.isfinite(out)))
    print("KERNEL_OK")
</pallas_src>

<mosaic_0001>
module attributes {stable_mosaic.version = 11 : i64} {
  func.func @_decoder_kernel(%arg0: i32, %arg1: memref<16x32xf32, #tpu.memory_space<vmem>>, %arg2: memref<16x32xf32, #tpu.memory_space<vmem>>, %arg3: memref<16x8xf32, #tpu.memory_space<vmem>>, %arg4: memref<1x32xf32, #tpu.memory_space<vmem>>, %arg5: memref<1x32xf32, #tpu.memory_space<vmem>>, %arg6: memref<32x32xf32, #tpu.memory_space<vmem>>, %arg7: memref<1x32xf32, #tpu.memory_space<vmem>>, %arg8: memref<1x1x32xf32, #tpu.memory_space<vmem>>, %arg9: memref<1x1x32xf32, #tpu.memory_space<vmem>>, %arg10: memref<1x1x32xf32, #tpu.memory_space<vmem>>, %arg11: memref<1x1x32xf32, #tpu.memory_space<vmem>>, %arg12: memref<1x32x32xf32, #tpu.memory_space<vmem>>, %arg13: memref<1x32x64xf32, #tpu.memory_space<vmem>>, %arg14: memref<1x32x32xf32, #tpu.memory_space<vmem>>, %arg15: memref<1x1x32xf32, #tpu.memory_space<vmem>>, %arg16: memref<1x1x32xf32, #tpu.memory_space<vmem>>, %arg17: memref<1x1x32xf32, #tpu.memory_space<vmem>>, %arg18: memref<1x32x128xf32, #tpu.memory_space<vmem>>, %arg19: memref<1x1x128xf32, #tpu.memory_space<vmem>>, %arg20: memref<1x128x32xf32, #tpu.memory_space<vmem>>, %arg21: memref<1x1x32xf32, #tpu.memory_space<vmem>>, %arg22: memref<1x32x8xf32, #tpu.memory_space<vmem>>, %arg23: memref<1x1x8xf32, #tpu.memory_space<vmem>>, %arg24: memref<1x1x32xf32, #tpu.memory_space<vmem>>, %arg25: memref<1x1x32xf32, #tpu.memory_space<vmem>>, %arg26: memref<1x32x96xf32, #tpu.memory_space<vmem>>, %arg27: memref<1x32x32xf32, #tpu.memory_space<vmem>>, %arg28: memref<1x1x32xf32, #tpu.memory_space<vmem>>, %arg29: memref<1x1x32xf32, #tpu.memory_space<vmem>>, %arg30: memref<1x1x32xf32, #tpu.memory_space<vmem>>, %arg31: memref<1x32x128xf32, #tpu.memory_space<vmem>>, %arg32: memref<1x1x128xf32, #tpu.memory_space<vmem>>, %arg33: memref<1x128x32xf32, #tpu.memory_space<vmem>>, %arg34: memref<1x1x32xf32, #tpu.memory_space<vmem>>, %arg35: memref<16x32xf32, #tpu.memory_space<vmem>>, %arg36: memref<16x32xf32, #tpu.memory_space<vmem>>) attributes {dimension_semantics = [#tpu.dimension_semantics<arbitrary>], iteration_bounds = array<i64: 2>, scalar_prefetch = 0 : i64, scratch_operands = 1 : i64, tpu.core_type = #tpu.core_type<tc>, window_params = [{pipeline_mode = #tpu.pipeline_mode<synchronous>, transform_indices = @transform_0, window_bounds = array<i64: 16, 32>}, {pipeline_mode = #tpu.pipeline_mode<synchronous>, transform_indices = @transform_1, window_bounds = array<i64: 16, 32>}, {pipeline_mode = #tpu.pipeline_mode<synchronous>, transform_indices = @transform_2, window_bounds = array<i64: 16, 8>}, {pipeline_mode = #tpu.pipeline_mode<synchronous>, transform_indices = @transform_3, window_bounds = array<i64: 1, 32>}, {pipeline_mode = #tpu.pipeline_mode<synchronous>, transform_indices = @transform_4, window_bounds = array<i64: 1, 32>}, {pipeline_mode = #tpu.pipeline_mode<synchronous>, transform_indices = @transform_5, window_bounds = array<i64: 32, 32>}, {pipeline_mode = #tpu.pipeline_mode<synchronous>, transform_indices = @transform_6, window_bounds = array<i64: 1, 32>}, {transform_indices = @transform_7, window_bounds = array<i64: 1, 1, 32>}, {transform_indices = @transform_8, window_bounds = array<i64: 1, 1, 32>}, {transform_indices = @transform_9, window_bounds = array<i64: 1, 1, 32>}, {transform_indices = @transform_10, window_bounds = array<i64: 1, 1, 32>}, {transform_indices = @transform_11, window_bounds = array<i64: 1, 32, 32>}, {transform_indices = @transform_12, window_bounds = array<i64: 1, 32, 64>}, {transform_indices = @transform_13, window_bounds = array<i64: 1, 32, 32>}, {transform_indices = @transform_14, window_bounds = array<i64: 1, 1, 32>}, {transform_indices = @transform_15, window_bounds = array<i64: 1, 1, 32>}, {transform_indices = @transform_16, window_bounds = array<i64: 1, 1, 32>}, {transform_indices = @transform_17, window_bounds = array<i64: 1, 32, 128>}, {transform_indices = @transform_18, window_bounds = array<i64: 1, 1, 128>}, {transform_indices = @transform_19, window_bounds = array<i64: 1, 128, 32>}, {transform_indices = @transform_20, window_bounds = array<i64: 1, 1, 32>}, {transform_indices = @transform_21, window_bounds = array<i64: 1, 32, 8>}, {transform_indices = @transform_22, window_bounds = array<i64: 1, 1, 8>}, {transform_indices = @transform_23, window_bounds = array<i64: 1, 1, 32>}, {transform_indices = @transform_24, window_bounds = array<i64: 1, 1, 32>}, {transform_indices = @transform_25, window_bounds = array<i64: 1, 32, 96>}, {transform_indices = @transform_26, window_bounds = array<i64: 1, 32, 32>}, {transform_indices = @transform_27, window_bounds = array<i64: 1, 1, 32>}, {transform_indices = @transform_28, window_bounds = array<i64: 1, 1, 32>}, {transform_indices = @transform_29, window_bounds = array<i64: 1, 1, 32>}, {transform_indices = @transform_30, window_bounds = array<i64: 1, 32, 128>}, {transform_indices = @transform_31, window_bounds = array<i64: 1, 1, 128>}, {transform_indices = @transform_32, window_bounds = array<i64: 1, 128, 32>}, {transform_indices = @transform_33, window_bounds = array<i64: 1, 1, 32>}, {pipeline_mode = #tpu.pipeline_mode<synchronous>, transform_indices = @transform_34, window_bounds = array<i64: 16, 32>}]} {
    %c0_i32 = arith.constant 0 : i32
    %0 = arith.cmpi eq, %arg0, %c0_i32 : i32
    %1 = arith.extui %0 : i1 to i32
    %c0_i32_0 = arith.constant 0 : i32
    %2 = arith.cmpi ne, %1, %c0_i32_0 : i32
    scf.if %2 {
      %c0_211 = arith.constant 0 : index
      %c0_212 = arith.constant 0 : index
      %531 = vector.load %arg1[%c0_211, %c0_212] : memref<16x32xf32, #tpu.memory_space<vmem>>, vector<16x32xf32>
      %c0_213 = arith.constant 0 : index
      %c0_214 = arith.constant 0 : index
      %532 = vector.load %arg36[%c0_213, %c0_214] : memref<16x32xf32, #tpu.memory_space<vmem>>, vector<16x32xf32>
      tpu.vector_store %arg36[%c0_213, %c0_214], %531 {strides = array<i32>} : memref<16x32xf32, #tpu.memory_space<vmem>>, vector<16x32xf32>,
    } else {
    }
    %c0 = arith.constant 0 : index
    %c0_1 = arith.constant 0 : index
    %3 = vector.load %arg36[%c0, %c0_1] : memref<16x32xf32, #tpu.memory_space<vmem>>, vector<16x32xf32>
    %c0_2 = arith.constant 0 : index
    %c0_3 = arith.constant 0 : index
    %4 = vector.load %arg2[%c0_2, %c0_3] : memref<16x32xf32, #tpu.memory_space<vmem>>, vector<16x32xf32>
    %c0_4 = arith.constant 0 : index
    %c0_5 = arith.constant 0 : index
    %5 = vector.load %arg3[%c0_4, %c0_5] : memref<16x8xf32, #tpu.memory_space<vmem>>, vector<16x8xf32>
    %c0_6 = arith.constant 0 : index
    %c0_7 = arith.constant 0 : index
    %c0_8 = arith.constant 0 : index
    %6 = vector.load %arg8[%c0_6, %c0_7, %c0_8] : memref<1x1x32xf32, #tpu.memory_space<vmem>>, vector<1x1x32xf32>
    %7 = vector.shape_cast %6 : vector<1x1x32xf32> to vector<1x32xf32>
    %c0_9 = arith.constant 0 : index
    %c0_10 = arith.constant 0 : index
    %c0_11 = arith.constant 0 : index
    %8 = vector.load %arg9[%c0_9, %c0_10, %c0_11] : memref<1x1x32xf32, #tpu.memory_space<vmem>>, vector<1x1x32xf32>
    %9 = vector.shape_cast %8 : vector<1x1x32xf32> to vector<1x32xf32>
    %cst = arith.constant dense<0.000000e+00> : vector<16xf32>
    %10 = vector.multi_reduction <add>, %3, %cst [1] : vector<16x32xf32> to vector<16xf32>
    %11 = vector.shape_cast %10 : vector<16xf32> to vector<16x1xf32>
    %cst_12 = arith.constant 3.200000e+01 : f32
    %12 = vector.broadcast %cst_12 : f32 to vector<16x1xf32>
    %13 = arith.divf %11, %12 : vector<16x1xf32>
    %14 = vector.broadcast %13 : vector<16x1xf32> to vector<16x32xf32>
    %15 = arith.subf %3, %14 : vector<16x32xf32>
    %16 = arith.mulf %15, %15 : vector<16x32xf32>
    %cst_13 = arith.constant dense<0.000000e+00> : vector<16xf32>
    %17 = vector.multi_reduction <add>, %16, %cst_13 [1] : vector<16x32xf32> to vector<16xf32>
    %18 = vector.shape_cast %17 : vector<16xf32> to vector<16x1xf32>
    %cst_14 = arith.constant 3.200000e+01 : f32
    %19 = vector.broadcast %cst_14 : f32 to vector<16x1xf32>
    %20 = arith.divf %18, %19 : vector<16x1xf32>
    %cst_15 = arith.constant 9.99999974E-6 : f32
    %21 = vector.broadcast %cst_15 : f32 to vector<16x1xf32>
    %22 = arith.addf %20, %21 : vector<16x1xf32>
    %23 = math.rsqrt %22 : vector<16x1xf32>
    %24 = vector.broadcast %23 : vector<16x1xf32> to vector<16x32xf32>
    %25 = arith.mulf %15, %24 : vector<16x32xf32>
    %26 = vector.broadcast %7 : vector<1x32xf32> to vector<16x32xf32>
    %27 = arith.mulf %25, %26 : vector<16x32xf32>
    %28 = vector.broadcast %9 : vector<1x32xf32> to vector<16x32xf32>
    %29 = arith.addf %27, %28 : vector<16x32xf32>
    %c0_16 = arith.constant 0 : index
    %c0_17 = arith.constant 0 : index
    %c0_18 = arith.constant 0 : index
    %30 = vector.load %arg10[%c0_16, %c0_17, %c0_18] : memref<1x1x32xf32, #tpu.memory_space<vmem>>, vector<1x1x32xf32>
    %31 = vector.shape_cast %30 : vector<1x1x32xf32> to vector<1x32xf32>
    %c0_19 = arith.constant 0 : index
    %c0_20 = arith.constant 0 : index
    %c0_21 = arith.constant 0 : index
    %32 = vector.load %arg11[%c0_19, %c0_20, %c0_21] : memref<1x1x32xf32, #tpu.memory_space<vmem>>, vector<1x1x32xf32>
    %33 = vector.shape_cast %32 : vector<1x1x32xf32> to vector<1x32xf32>
    %cst_22 = arith.constant dense<0.000000e+00> : vector<16xf32>
    %34 = vector.multi_reduction <add>, %4, %cst_22 [1] : vector<16x32xf32> to vector<16xf32>
    %35 = vector.shape_cast %34 : vector<16xf32> to vector<16x1xf32>
    %cst_23 = arith.constant 3.200000e+01 : f32
    %36 = vector.broadcast %cst_23 : f32 to vector<16x1xf32>
    %37 = arith.divf %35, %36 : vector<16x1xf32>
    %38 = vector.broadcast %37 : vector<16x1xf32> to vector<16x32xf32>
    %39 = arith.subf %4, %38 : vector<16x32xf32>
    %40 = arith.mulf %39, %39 : vector<16x32xf32>
    %cst_24 = arith.constant dense<0.000000e+00> : vector<16xf32>
    %41 = vector.multi_reduction <add>, %40, %cst_24 [1] : vector<16x32xf32> to vector<16xf32>
    %42 = vector.shape_cast %41 : vector<16xf32> to vector<16x1xf32>
    %cst_25 = arith.constant 3.200000e+01 : f32
    %43 = vector.broadcast %cst_25 : f32 to vector<16x1xf32>
    %44 = arith.divf %42, %43 : vector<16x1xf32>
    %cst_26 = arith.constant 9.99999974E-6 : f32
    %45 = vector.broadcast %cst_26 : f32 to vector<16x1xf32>
    %46 = arith.addf %44, %45 : vector<16x1xf32>
    %47 = math.rsqrt %46 : vector<16x1xf32>
    %48 = vector.broadcast %47 : vector<16x1xf32> to vector<16x32xf32>
    %49 = arith.mulf %39, %48 : vector<16x32xf32>
    %50 = vector.broadcast %31 : vector<1x32xf32> to vector<16x32xf32>
    %51 = arith.mulf %49, %50 : vector<16x32xf32>
    %52 = vector.broadcast %33 : vector<1x32xf32> to vector<16x32xf32>
    %53 = arith.addf %51, %52 : vector<16x32xf32>
    %c0_27 = arith.constant 0 : index
    %c0_28 = arith.constant 0 : index
    %c0_29 = arith.constant 0 : index
    %54 = vector.load %arg12[%c0_27, %c0_28, %c0_29] : memref<1x32x32xf32, #tpu.memory_space<vmem>>, vector<1x32x32xf32>
    %55 = vector.shape_cast %54 : vector<1x32x32xf32> to vector<32x32xf32>
    %cst_30 = arith.constant dense<0.000000e+00> : vector<16x32xf32>
    %56 = tpu.matmul %29, %55, %cst_30 {dimension_numbers = #tpu.dot_dimension_numbers<[1], [0], [0], [1], [0, 0, 1, 1], [], []>} : vector<16x32xf32>, vector<32x32xf32>, vector<16x32xf32> -> vector<16x32xf32>
    %c0_31 = arith.constant 0 : index
    %c0_32 = arith.constant 0 : index
    %c0_33 = arith.constant 0 : index
    %57 = vector.load %arg13[%c0_31, %c0_32, %c0_33] : memref<1x32x64xf32, #tpu.memory_space<vmem>>, vector<1x32x64xf32>
    %58 = vector.shape_cast %57 : vector<1x32x64xf32> to vector<32x64xf32>
    %cst_34 = arith.constant dense<0.000000e+00> : vector<16x64xf32>
    %59 = tpu.matmul %53, %58, %cst_34 {dimension_numbers = #tpu.dot_dimension_numbers<[1], [0], [0], [1], [0, 0, 1, 1], [], []>} : vector<16x32xf32>, vector<32x64xf32>, vector<16x64xf32> -> vector<16x64xf32>
    %60 = vector.extract_strided_slice %59 {offsets = [0, 0], sizes = [16, 32], strides = [1, 1]} : vector<16x64xf32> to vector<16x32xf32>
    %61 = vector.extract_strided_slice %59 {offsets = [0, 32], sizes = [16, 32], strides = [1, 1]} : vector<16x64xf32> to vector<16x32xf32>
    %c0_35 = arith.constant 0 : index
    %c0_36 = arith.constant 0 : index
    %c0_37 = arith.constant 0 : index
    %62 = vector.load %arg14[%c0_35, %c0_36, %c0_37] : memref<1x32x32xf32, #tpu.memory_space<vmem>>, vector<1x32x32xf32>
    %63 = vector.shape_cast %62 : vector<1x32x32xf32> to vector<32x32xf32>
    %64 = vector.extract_strided_slice %56 {offsets = [0, 0], sizes = [8, 32], strides = [1, 1]} : vector<16x32xf32> to vector<8x32xf32>
    %65 = vector.extract_strided_slice %60 {offsets = [0, 0], sizes = [8, 32], strides = [1, 1]} : vector<16x32xf32> to vector<8x32xf32>
    %66 = vector.extract_strided_slice %61 {offsets = [0, 0], sizes = [8, 32], strides = [1, 1]} : vector<16x32xf32> to vector<8x32xf32>
    %67 = vector.extract_strided_slice %5 {offsets = [0, 0], sizes = [8, 8], strides = [1, 1]} : vector<16x8xf32> to vector<8x8xf32>
    %68 = vector.extract_strided_slice %64 {offsets = [0, 0], sizes = [8, 8], strides = [1, 1]} : vector<8x32xf32> to vector<8x8xf32>
    %69 = vector.extract_strided_slice %65 {offsets = [0, 0], sizes = [8, 8], strides = [1, 1]} : vector<8x32xf32> to vector<8x8xf32>
    %cst_38 = arith.constant dense<0.000000e+00> : vector<8x8xf32>
    %70 = tpu.matmul %68, %69, %cst_38 {dimension_numbers = #tpu.dot_dimension_numbers<[1], [1], [0], [0], [0, 0, 1, 0], [], []>} : vector<8x8xf32>, vector<8x8xf32>, vector<8x8xf32> -> vector<8x8xf32>
    %71 = arith.addf %70, %67 : vector<8x8xf32>
    %cst_39 = arith.constant dense<0xFF800000> : vector<8xf32>
    %72 = vector.multi_reduction <maximumf>, %71, %cst_39 [1] : vector<8x8xf32> to vector<8xf32>
    %73 = vector.shape_cast %72 : vector<8xf32> to vector<8x1xf32>
    %74 = vector.broadcast %73 : vector<8x1xf32> to vector<8x8xf32>
    %75 = arith.subf %71, %74 : vector<8x8xf32>
    %76 = math.exp %75 : vector<8x8xf32>
    %cst_40 = arith.constant dense<0.000000e+00> : vector<8xf32>
    %77 = vector.multi_reduction <add>, %76, %cst_40 [1] : vector<8x8xf32> to vector<8xf32>
    %78 = vector.shape_cast %77 : vector<8xf32> to vector<8x1xf32>
    %79 = tpu.reciprocal %78 {approx = true} : vector<8x1xf32> -> vector<8x1xf32>
    %80 = vector.broadcast %79 : vector<8x1xf32> to vector<8x8xf32>
    %81 = arith.mulf %76, %80 : vector<8x8xf32>
    %82 = vector.extract_strided_slice %66 {offsets = [0, 0], sizes = [8, 8], strides = [1, 1]} : vector<8x32xf32> to vector<8x8xf32>
    %cst_41 = arith.constant dense<0.000000e+00> : vector<8x8xf32>
    %83 = tpu.matmul %81, %82, %cst_41 {dimension_numbers = #tpu.dot_dimension_numbers<[1], [0], [0], [1], [0, 0, 1, 1], [], []>} : vector<8x8xf32>, vector<8x8xf32>, vector<8x8xf32> -> vector<8x8xf32>
    %84 = vector.extract_strided_slice %63 {offsets = [0, 0], sizes = [8, 32], strides = [1, 1]} : vector<32x32xf32> to vector<8x32xf32>
    %cst_42 = arith.constant dense<0.000000e+00> : vector<8x32xf32>
    %85 = tpu.matmul %83, %84, %cst_42 {dimension_numbers = #tpu.dot_dimension_numbers<[1], [0], [0], [1], [0, 0, 1, 1], [], []>} : vector<8x8xf32>, vector<8x32xf32>, vector<8x32xf32> -> vector<8x32xf32>
    %86 = vector.extract_strided_slice %64 {offsets = [0, 8], sizes = [8, 8], strides = [1, 1]} : vector<8x32xf32> to vector<8x8xf32>
    %87 = vector.extract_strided_slice %65 {offsets = [0, 8], sizes = [8, 8], strides = [1, 1]} : vector<8x32xf32> to vector<8x8xf32>
    %cst_43 = arith.constant dense<0.000000e+00> : vector<8x8xf32>
    %88 = tpu.matmul %86, %87, %cst_43 {dimension_numbers = #tpu.dot_dimension_numbers<[1], [1], [0], [0], [0, 0, 1, 0], [], []>} : vector<8x8xf32>, vector<8x8xf32>, vector<8x8xf32> -> vector<8x8xf32>
    %89 = arith.addf %88, %67 : vector<8x8xf32>
    %cst_44 = arith.constant dense<0xFF800000> : vector<8xf32>
    %90 = vector.multi_reduction <maximumf>, %89, %cst_44 [1] : vector<8x8xf32> to vector<8xf32>
    %91 = vector.shape_cast %90 : vector<8xf32> to vector<8x1xf32>
    %92 = vector.broadcast %91 : vector<8x1xf32> to vector<8x8xf32>
    %93 = arith.subf %89, %92 : vector<8x8xf32>
    %94 = math.exp %93 : vector<8x8xf32>
    %cst_45 = arith.constant dense<0.000000e+00> : vector<8xf32>
    %95 = vector.multi_reduction <add>, %94, %cst_45 [1] : vector<8x8xf32> to vector<8xf32>
    %96 = vector.shape_cast %95 : vector<8xf32> to vector<8x1xf32>
    %97 = tpu.reciprocal %96 {approx = true} : vector<8x1xf32> -> vector<8x1xf32>
    %98 = vector.broadcast %97 : vector<8x1xf32> to vector<8x8xf32>
    %99 = arith.mulf %94, %98 : vector<8x8xf32>
    %100 = vector.extract_strided_slice %66 {offsets = [0, 8], sizes = [8, 8], strides = [1, 1]} : vector<8x32xf32> to vector<8x8xf32>
    %cst_46 = arith.constant dense<0.000000e+00> : vector<8x8xf32>
    %101 = tpu.matmul %99, %100, %cst_46 {dimension_numbers = #tpu.dot_dimension_numbers<[1], [0], [0], [1], [0, 0, 1, 1], [], []>} : vector<8x8xf32>, vector<8x8xf32>, vector<8x8xf32> -> vector<8x8xf32>
    %102 = vector.extract_strided_slice %63 {offsets = [8, 0], sizes = [8, 32], strides = [1, 1]} : vector<32x32xf32> to vector<8x32xf32>
    %cst_47 = arith.constant dense<0.000000e+00> : vector<8x32xf32>
    %103 = tpu.matmul %101, %102, %cst_47 {dimension_numbers = #tpu.dot_dimension_numbers<[1], [0], [0], [1], [0, 0, 1, 1], [], []>} : vector<8x8xf32>, vector<8x32xf32>, vector<8x32xf32> -> vector<8x32xf32>
    %104 = arith.addf %85, %103 : vector<8x32xf32>
    %105 = vector.extract_strided_slice %64 {offsets = [0, 16], sizes = [8, 8], strides = [1, 1]} : vector<8x32xf32> to vector<8x8xf32>
    %106 = vector.extract_strided_slice %65 {offsets = [0, 16], sizes = [8, 8], strides = [1, 1]} : vector<8x32xf32> to vector<8x8xf32>
    %cst_48 = arith.constant dense<0.000000e+00> : vector<8x8xf32>
    %107 = tpu.matmul %105, %106, %cst_48 {dimension_numbers = #tpu.dot_dimension_numbers<[1], [1], [0], [0], [0, 0, 1, 0], [], []>} : vector<8x8xf32>, vector<8x8xf32>, vector<8x8xf32> -> vector<8x8xf32>
    %108 = arith.addf %107, %67 : vector<8x8xf32>
    %cst_49 = arith.constant dense<0xFF800000> : vector<8xf32>
    %109 = vector.multi_reduction <maximumf>, %108, %cst_49 [1] : vector<8x8xf32> to vector<8xf32>
    %110 = vector.shape_cast %109 : vector<8xf32> to vector<8x1xf32>
    %111 = vector.broadcast %110 : vector<8x1xf32> to vector<8x8xf32>
    %112 = arith.subf %108, %111 : vector<8x8xf32>
    %113 = math.exp %112 : vector<8x8xf32>
    %cst_50 = arith.constant dense<0.000000e+00> : vector<8xf32>
    %114 = vector.multi_reduction <add>, %113, %cst_50 [1] : vector<8x8xf32> to vector<8xf32>
    %115 = vector.shape_cast %114 : vector<8xf32> to vector<8x1xf32>
    %116 = tpu.reciprocal %115 {approx = true} : vector<8x1xf32> -> vector<8x1xf32>
    %117 = vector.broadcast %116 : vector<8x1xf32> to vector<8x8xf32>
    %118 = arith.mulf %113, %117 : vector<8x8xf32>
    %119 = vector.extract_strided_slice %66 {offsets = [0, 16], sizes = [8, 8], strides = [1, 1]} : vector<8x32xf32> to vector<8x8xf32>
    %cst_51 = arith.constant dense<0.000000e+00> : vector<8x8xf32>
    %120 = tpu.matmul %118, %119, %cst_51 {dimension_numbers = #tpu.dot_dimension_numbers<[1], [0], [0], [1], [0, 0, 1, 1], [], []>} : vector<8x8xf32>, vector<8x8xf32>, vector<8x8xf32> -> vector<8x8xf32>
    %121 = vector.extract_strided_slice %63 {offsets = [16, 0], sizes = [8, 32], strides = [1, 1]} : vector<32x32xf32> to vector<8x32xf32>
    %cst_52 = arith.constant dense<0.000000e+00> : vector<8x32xf32>
    %122 = tpu.matmul %120, %121, %cst_52 {dimension_numbers = #tpu.dot_dimension_numbers<[1], [0], [0], [1], [0, 0, 1, 1], [], []>} : vector<8x8xf32>, vector<8x32xf32>, vector<8x32xf32> -> vector<8x32xf32>
    %123 = arith.addf %104, %122 : vector<8x32xf32>
    %124 = vector.extract_strided_slice %64 {offsets = [0, 24], sizes = [8, 8], strides = [1, 1]} : vector<8x32xf32> to vector<8x8xf32>
    %125 = vector.extract_strided_slice %65 {offsets = [0, 24], sizes = [8, 8], strides = [1, 1]} : vector<8x32xf32> to vector<8x8xf32>
    %cst_53 = arith.constant dense<0.000000e+00> : vector<8x8xf32>
    %126 = tpu.matmul %124, %125, %cst_53 {dimension_numbers = #tpu.dot_dimension_numbers<[1], [1], [0], [0], [0, 0, 1, 0], [], []>} : vector<8x8xf32>, vector<8x8xf32>, vector<8x8xf32> -> vector<8x8xf32>
    %127 = arith.addf %126, %67 : vector<8x8xf32>
    %cst_54 = arith.constant dense<0xFF800000> : vector<8xf32>
    %128 = vector.multi_reduction <maximumf>, %127, %cst_54 [1] : vector<8x8xf32> to vector<8xf32>
    %129 = vector.shape_cast %128 : vector<8xf32> to vector<8x1xf32>
    %130 = vector.broadcast %129 : vector<8x1xf32> to vector<8x8xf32>
    %131 = arith.subf %127, %130 : vector<8x8xf32>
    %132 = math.exp %131 : vector<8x8xf32>
    %cst_55 = arith.constant dense<0.000000e+00> : vector<8xf32>
    %133 = vector.multi_reduction <add>, %132, %cst_55 [1] : vector<8x8xf32> to vector<8xf32>
    %134 = vector.shape_cast %133 : vector<8xf32> to vector<8x1xf32>
    %135 = tpu.reciprocal %134 {approx = true} : vector<8x1xf32> -> vector<8x1xf32>
    %136 = vector.broadcast %135 : vector<8x1xf32> to vector<8x8xf32>
    %137 = arith.mulf %132, %136 : vector<8x8xf32>
    %138 = vector.extract_strided_slice %66 {offsets = [0, 24], sizes = [8, 8], strides = [1, 1]} : vector<8x32xf32> to vector<8x8xf32>
    %cst_56 = arith.constant dense<0.000000e+00> : vector<8x8xf32>
    %139 = tpu.matmul %137, %138, %cst_56 {dimension_numbers = #tpu.dot_dimension_numbers<[1], [0], [0], [1], [0, 0, 1, 1], [], []>} : vector<8x8xf32>, vector<8x8xf32>, vector<8x8xf32> -> vector<8x8xf32>
    %140 = vector.extract_strided_slice %63 {offsets = [24, 0], sizes = [8, 32], strides = [1, 1]} : vector<32x32xf32> to vector<8x32xf32>
    %cst_57 = arith.constant dense<0.000000e+00> : vector<8x32xf32>
    %141 = tpu.matmul %139, %140, %cst_57 {dimension_numbers = #tpu.dot_dimension_numbers<[1], [0], [0], [1], [0, 0, 1, 1], [], []>} : vector<8x8xf32>, vector<8x32xf32>, vector<8x32xf32> -> vector<8x32xf32>
    %142 = arith.addf %123, %141 : vector<8x32xf32>
    %143 = vector.extract_strided_slice %56 {offsets = [8, 0], sizes = [8, 32], strides = [1, 1]} : vector<16x32xf32> to vector<8x32xf32>
    %144 = vector.extract_strided_slice %60 {offsets = [8, 0], sizes = [8, 32], strides = [1, 1]} : vector<16x32xf32> to vector<8x32xf32>
    %145 = vector.extract_strided_slice %61 {offsets = [8, 0], sizes = [8, 32], strides = [1, 1]} : vector<16x32xf32> to vector<8x32xf32>
    %146 = vector.extract_strided_slice %5 {offsets = [8, 0], sizes = [8, 8], strides = [1, 1]} : vector<16x8xf32> to vector<8x8xf32>
    %147 = vector.extract_strided_slice %143 {offsets = [0, 0], sizes = [8, 8], strides = [1, 1]} : vector<8x32xf32> to vector<8x8xf32>
    %148 = vector.extract_strided_slice %144 {offsets = [0, 0], sizes = [8, 8], strides = [1, 1]} : vector<8x32xf32> to vector<8x8xf32>
    %cst_58 = arith.constant dense<0.000000e+00> : vector<8x8xf32>
    %149 = tpu.matmul %147, %148, %cst_58 {dimension_numbers = #tpu.dot_dimension_numbers<[1], [1], [0], [0], [0, 0, 1, 0], [], []>} : vector<8x8xf32>, vector<8x8xf32>, vector<8x8xf32> -> vector<8x8xf32>
    %150 = arith.addf %149, %146 : vector<8x8xf32>
    %cst_59 = arith.constant dense<0xFF800000> : vector<8xf32>
    %151 = vector.multi_reduction <maximumf>, %150, %cst_59 [1] : vector<8x8xf32> to vector<8xf32>
    %152 = vector.shape_cast %151 : vector<8xf32> to vector<8x1xf32>
    %153 = vector.broadcast %152 : vector<8x1xf32> to vector<8x8xf32>
    %154 = arith.subf %150, %153 : vector<8x8xf32>
    %155 = math.exp %154 : vector<8x8xf32>
    %cst_60 = arith.constant dense<0.000000e+00> : vector<8xf32>
    %156 = vector.multi_reduction <add>, %155, %cst_60 [1] : vector<8x8xf32> to vector<8xf32>
    %157 = vector.shape_cast %156 : vector<8xf32> to vector<8x1xf32>
    %158 = tpu.reciprocal %157 {approx = true} : vector<8x1xf32> -> vector<8x1xf32>
    %159 = vector.broadcast %158 : vector<8x1xf32> to vector<8x8xf32>
    %160 = arith.mulf %155, %159 : vector<8x8xf32>
    %161 = vector.extract_strided_slice %145 {offsets = [0, 0], sizes = [8, 8], strides = [1, 1]} : vector<8x32xf32> to vector<8x8xf32>
    %cst_61 = arith.constant dense<0.000000e+00> : vector<8x8xf32>
    %162 = tpu.matmul %160, %161, %cst_61 {dimension_numbers = #tpu.dot_dimension_numbers<[1], [0], [0], [1], [0, 0, 1, 1], [], []>} : vector<8x8xf32>, vector<8x8xf32>, vector<8x8xf32> -> vector<8x8xf32>
    %163 = vector.extract_strided_slice %63 {offsets = [0, 0], sizes = [8, 32], strides = [1, 1]} : vector<32x32xf32> to vector<8x32xf32>
    %cst_62 = arith.constant dense<0.000000e+00> : vector<8x32xf32>
    %164 = tpu.matmul %162, %163, %cst_62 {dimension_numbers = #tpu.dot_dimension_numbers<[1], [0], [0], [1], [0, 0, 1, 1], [], []>} : vector<8x8xf32>, vector<8x32xf32>, vector<8x32xf32> -> vector<8x32xf32>
    %165 = vector.extract_strided_slice %143 {offsets = [0, 8], sizes = [8, 8], strides = [1, 1]} : vector<8x32xf32> to vector<8x8xf32>
    %166 = vector.extract_strided_slice %144 {offsets = [0, 8], sizes = [8, 8], strides = [1, 1]} : vector<8x32xf32> to vector<8x8xf32>
    %cst_63 = arith.constant dense<0.000000e+00> : vector<8x8xf32>
    %167 = tpu.matmul %165, %166, %cst_63 {dimension_numbers = #tpu.dot_dimension_numbers<[1], [1], [0], [0], [0, 0, 1, 0], [], []>} : vector<8x8xf32>, vector<8x8xf32>, vector<8x8xf32> -> vector<8x8xf32>
    %168 = arith.addf %167, %146 : vector<8x8xf32>
    %cst_64 = arith.constant dense<0xFF800000> : vector<8xf32>
    %169 = vector.multi_reduction <maximumf>, %168, %cst_64 [1] : vector<8x8xf32> to vector<8xf32>
    %170 = vector.shape_cast %169 : vector<8xf32> to vector<8x1xf32>
    %171 = vector.broadcast %170 : vector<8x1xf32> to vector<8x8xf32>
    %172 = arith.subf %168, %171 : vector<8x8xf32>
    %173 = math.exp %172 : vector<8x8xf32>
    %cst_65 = arith.constant dense<0.000000e+00> : vector<8xf32>
    %174 = vector.multi_reduction <add>, %173, %cst_65 [1] : vector<8x8xf32> to vector<8xf32>
    %175 = vector.shape_cast %174 : vector<8xf32> to vector<8x1xf32>
    %176 = tpu.reciprocal %175 {approx = true} : vector<8x1xf32> -> vector<8x1xf32>
    %177 = vector.broadcast %176 : vector<8x1xf32> to vector<8x8xf32>
    %178 = arith.mulf %173, %177 : vector<8x8xf32>
    %179 = vector.extract_strided_slice %145 {offsets = [0, 8], sizes = [8, 8], strides = [1, 1]} : vector<8x32xf32> to vector<8x8xf32>
    %cst_66 = arith.constant dense<0.000000e+00> : vector<8x8xf32>
    %180 = tpu.matmul %178, %179, %cst_66 {dimension_numbers = #tpu.dot_dimension_numbers<[1], [0], [0], [1], [0, 0, 1, 1], [], []>} : vector<8x8xf32>, vector<8x8xf32>, vector<8x8xf32> -> vector<8x8xf32>
    %181 = vector.extract_strided_slice %63 {offsets = [8, 0], sizes = [8, 32], strides = [1, 1]} : vector<32x32xf32> to vector<8x32xf32>
    %cst_67 = arith.constant dense<0.000000e+00> : vector<8x32xf32>
    %182 = tpu.matmul %180, %181, %cst_67 {dimension_numbers = #tpu.dot_dimension_numbers<[1], [0], [0], [1], [0, 0, 1, 1], [], []>} : vector<8x8xf32>, vector<8x32xf32>, vector<8x32xf32> -> vector<8x32xf32>
    %183 = arith.addf %164, %182 : vector<8x32xf32>
    %184 = vector.extract_strided_slice %143 {offsets = [0, 16], sizes = [8, 8], strides = [1, 1]} : vector<8x32xf32> to vector<8x8xf32>
    %185 = vector.extract_strided_slice %144 {offsets = [0, 16], sizes = [8, 8], strides = [1, 1]} : vector<8x32xf32> to vector<8x8xf32>
    %cst_68 = arith.constant dense<0.000000e+00> : vector<8x8xf32>
    %186 = tpu.matmul %184, %185, %cst_68 {dimension_numbers = #tpu.dot_dimension_numbers<[1], [1], [0], [0], [0, 0, 1, 0], [], []>} : vector<8x8xf32>, vector<8x8xf32>, vector<8x8xf32> -> vector<8x8xf32>
    %187 = arith.addf %186, %146 : vector<8x8xf32>
    %cst_69 = arith.constant dense<0xFF800000> : vector<8xf32>
    %188 = vector.multi_reduction <maximumf>, %187, %cst_69 [1] : vector<8x8xf32> to vector<8xf32>
    %189 = vector.shape_cast %188 : vector<8xf32> to vector<8x1xf32>
    %190 = vector.broadcast %189 : vector<8x1xf32> to vector<8x8xf32>
    %191 = arith.subf %187, %190 : vector<8x8xf32>
    %192 = math.exp %191 : vector<8x8xf32>
    %cst_70 = arith.constant dense<0.000000e+00> : vector<8xf32>
    %193 = vector.multi_reduction <add>, %192, %cst_70 [1] : vector<8x8xf32> to vector<8xf32>
    %194 = vector.shape_cast %193 : vector<8xf32> to vector<8x1xf32>
    %195 = tpu.reciprocal %194 {approx = true} : vector<8x1xf32> -> vector<8x1xf32>
    %196 = vector.broadcast %195 : vector<8x1xf32> to vector<8x8xf32>
    %197 = arith.mulf %192, %196 : vector<8x8xf32>
    %198 = vector.extract_strided_slice %145 {offsets = [0, 16], sizes = [8, 8], strides = [1, 1]} : vector<8x32xf32> to vector<8x8xf32>
    %cst_71 = arith.constant dense<0.000000e+00> : vector<8x8xf32>
    %199 = tpu.matmul %197, %198, %cst_71 {dimension_numbers = #tpu.dot_dimension_numbers<[1], [0], [0], [1], [0, 0, 1, 1], [], []>} : vector<8x8xf32>, vector<8x8xf32>, vector<8x8xf32> -> vector<8x8xf32>
    %200 = vector.extract_strided_slice %63 {offsets = [16, 0], sizes = [8, 32], strides = [1, 1]} : vector<32x32xf32> to vector<8x32xf32>
    %cst_72 = arith.constant dense<0.000000e+00> : vector<8x32xf32>
    %201 = tpu.matmul %199, %200, %cst_72 {dimension_numbers = #tpu.dot_dimension_numbers<[1], [0], [0], [1], [0, 0, 1, 1], [], []>} : vector<8x8xf32>, vector<8x32xf32>, vector<8x32xf32> -> vector<8x32xf32>
    %202 = arith.addf %183, %201 : vector<8x32xf32>
    %203 = vector.extract_strided_slice %143 {offsets = [0, 24], sizes = [8, 8], strides = [1, 1]} : vector<8x32xf32> to vector<8x8xf32>
    %204 = vector.extract_strided_slice %144 {offsets = [0, 24], sizes = [8, 8], strides = [1, 1]} : vector<8x32xf32> to vector<8x8xf32>
    %cst_73 = arith.constant dense<0.000000e+00> : vector<8x8xf32>
    %205 = tpu.matmul %203, %204, %cst_73 {dimension_numbers = #tpu.dot_dimension_numbers<[1], [1], [0], [0], [0, 0, 1, 0], [], []>} : vector<8x8xf32>, vector<8x8xf32>, vector<8x8xf32> -> vector<8x8xf32>
    %206 = arith.addf %205, %146 : vector<8x8xf32>
    %cst_74 = arith.constant dense<0xFF800000> : vector<8xf32>
    %207 = vector.multi_reduction <maximumf>, %206, %cst_74 [1] : vector<8x8xf32> to vector<8xf32>
    %208 = vector.shape_cast %207 : vector<8xf32> to vector<8x1xf32>
    %209 = vector.broadcast %208 : vector<8x1xf32> to vector<8x8xf32>
    %210 = arith.subf %206, %209 : vector<8x8xf32>
    %211 = math.exp %210 : vector<8x8xf32>
    %cst_75 = arith.constant dense<0.000000e+00> : vector<8xf32>
    %212 = vector.multi_reduction <add>, %211, %cst_75 [1] : vector<8x8xf32> to vector<8xf32>
    %213 = vector.shape_cast %212 : vector<8xf32> to vector<8x1xf32>
    %214 = tpu.reciprocal %213 {approx = true} : vector<8x1xf32> -> vector<8x1xf32>
    %215 = vector.broadcast %214 : vector<8x1xf32> to vector<8x8xf32>
    %216 = arith.mulf %211, %215 : vector<8x8xf32>
    %217 = vector.extract_strided_slice %145 {offsets = [0, 24], sizes = [8, 8], strides = [1, 1]} : vector<8x32xf32> to vector<8x8xf32>
    %cst_76 = arith.constant dense<0.000000e+00> : vector<8x8xf32>
    %218 = tpu.matmul %216, %217, %cst_76 {dimension_numbers = #tpu.dot_dimension_numbers<[1], [0], [0], [1], [0, 0, 1, 1], [], []>} : vector<8x8xf32>, vector<8x8xf32>, vector<8x8xf32> -> vector<8x8xf32>
    %219 = vector.extract_strided_slice %63 {offsets = [24, 0], sizes = [8, 32], strides = [1, 1]} : vector<32x32xf32> to vector<8x32xf32>
    %cst_77 = arith.constant dense<0.000000e+00> : vector<8x32xf32>
    %220 = tpu.matmul %218, %219, %cst_77 {dimension_numbers = #tpu.dot_dimension_numbers<[1], [0], [0], [1], [0, 0, 1, 1], [], []>} : vector<8x8xf32>, vector<8x32xf32>, vector<8x32xf32> -> vector<8x32xf32>
    %221 = arith.addf %202, %220 : vector<8x32xf32>
    %222 = tpu.concatenate %142, %221 in 0 : vector<8x32xf32>, vector<8x32xf32> -> vector<16x32xf32>
    %c0_78 = arith.constant 0 : index
    %c0_79 = arith.constant 0 : index
    %c0_80 = arith.constant 0 : index
    %223 = vector.load %arg15[%c0_78, %c0_79, %c0_80] : memref<1x1x32xf32, #tpu.memory_space<vmem>>, vector<1x1x32xf32>
    %224 = vector.shape_cast %223 : vector<1x1x32xf32> to vector<1x32xf32>
    %225 = vector.broadcast %224 : vector<1x32xf32> to vector<16x32xf32>
    %226 = arith.addf %222, %225 : vector<16x32xf32>
    %227 = arith.addf %3, %226 : vector<16x32xf32>
    %c0_81 = arith.constant 0 : index
    %c0_82 = arith.constant 0 : index
    %c0_83 = arith.constant 0 : index
    %228 = vector.load %arg16[%c0_81, %c0_82, %c0_83] : memref<1x1x32xf32, #tpu.memory_space<vmem>>, vector<1x1x32xf32>
    %229 = vector.shape_cast %228 : vector<1x1x32xf32> to vector<1x32xf32>
    %c0_84 = arith.constant 0 : index
    %c0_85 = arith.constant 0 : index
    %c0_86 = arith.constant 0 : index
    %230 = vector.load %arg17[%c0_84, %c0_85, %c0_86] : memref<1x1x32xf32, #tpu.memory_space<vmem>>, vector<1x1x32xf32>
    %231 = vector.shape_cast %230 : vector<1x1x32xf32> to vector<1x32xf32>
    %cst_87 = arith.constant dense<0.000000e+00> : vector<16xf32>
    %232 = vector.multi_reduction <add>, %227, %cst_87 [1] : vector<16x32xf32> to vector<16xf32>
    %233 = vector.shape_cast %232 : vector<16xf32> to vector<16x1xf32>
    %cst_88 = arith.constant 3.200000e+01 : f32
    %234 = vector.broadcast %cst_88 : f32 to vector<16x1xf32>
    %235 = arith.divf %233, %234 : vector<16x1xf32>
    %236 = vector.broadcast %235 : vector<16x1xf32> to vector<16x32xf32>
    %237 = arith.subf %227, %236 : vector<16x32xf32>
    %238 = arith.mulf %237, %237 : vector<16x32xf32>
    %cst_89 = arith.constant dense<0.000000e+00> : vector<16xf32>
    %239 = vector.multi_reduction <add>, %238, %cst_89 [1] : vector<16x32xf32> to vector<16xf32>
    %240 = vector.shape_cast %239 : vector<16xf32> to vector<16x1xf32>
    %cst_90 = arith.constant 3.200000e+01 : f32
    %241 = vector.broadcast %cst_90 : f32 to vector<16x1xf32>
    %242 = arith.divf %240, %241 : vector<16x1xf32>
    %cst_91 = arith.constant 9.99999974E-6 : f32
    %243 = vector.broadcast %cst_91 : f32 to vector<16x1xf32>
    %244 = arith.addf %242, %243 : vector<16x1xf32>
    %245 = math.rsqrt %244 : vector<16x1xf32>
    %246 = vector.broadcast %245 : vector<16x1xf32> to vector<16x32xf32>
    %247 = arith.mulf %237, %246 : vector<16x32xf32>
    %248 = vector.broadcast %229 : vector<1x32xf32> to vector<16x32xf32>
    %249 = arith.mulf %247, %248 : vector<16x32xf32>
    %250 = vector.broadcast %231 : vector<1x32xf32> to vector<16x32xf32>
    %251 = arith.addf %249, %250 : vector<16x32xf32>
    %c0_92 = arith.constant 0 : index
    %c0_93 = arith.constant 0 : index
    %c0_94 = arith.constant 0 : index
    %252 = vector.load %arg18[%c0_92, %c0_93, %c0_94] : memref<1x32x128xf32, #tpu.memory_space<vmem>>, vector<1x32x128xf32>
    %253 = vector.shape_cast %252 : vector<1x32x128xf32> to vector<32x128xf32>
    %cst_95 = arith.constant dense<0.000000e+00> : vector<16x128xf32>
    %254 = tpu.matmul %251, %253, %cst_95 {dimension_numbers = #tpu.dot_dimension_numbers<[1], [0], [0], [1], [0, 0, 1, 1], [], []>} : vector<16x32xf32>, vector<32x128xf32>, vector<16x128xf32> -> vector<16x128xf32>
    %c0_96 = arith.constant 0 : index
    %c0_97 = arith.constant 0 : index
    %c0_98 = arith.constant 0 : index
    %255 = vector.load %arg19[%c0_96, %c0_97, %c0_98] : memref<1x1x128xf32, #tpu.memory_space<vmem>>, vector<1x1x128xf32>
    %256 = vector.shape_cast %255 : vector<1x1x128xf32> to vector<1x128xf32>
    %257 = vector.broadcast %256 : vector<1x128xf32> to vector<16x128xf32>
    %258 = arith.addf %254, %257 : vector<16x128xf32>
    %cst_99 = arith.constant 5.000000e-01 : f32
    %259 = vector.broadcast %cst_99 : f32 to vector<16x128xf32>
    %260 = arith.mulf %259, %258 : vector<16x128xf32>
    %cst_100 = arith.constant 0.707106769 : f32
    %261 = vector.broadcast %cst_100 : f32 to vector<16x128xf32>
    %262 = arith.mulf %258, %261 : vector<16x128xf32>
    %263 = math.erf %262 : vector<16x128xf32>
    %cst_101 = arith.constant 1.000000e+00 : f32
    %264 = vector.broadcast %cst_101 : f32 to vector<16x128xf32>
    %265 = arith.addf %264, %263 : vector<16x128xf32>
    %266 = arith.mulf %260, %265 : vector<16x128xf32>
    %c0_102 = arith.constant 0 : index
    %c0_103 = arith.constant 0 : index
    %c0_104 = arith.constant 0 : index
    %267 = vector.load %arg20[%c0_102, %c0_103, %c0_104] : memref<1x128x32xf32, #tpu.memory_space<vmem>>, vector<1x128x32xf32>
    %268 = vector.shape_cast %267 : vector<1x128x32xf32> to vector<128x32xf32>
    %cst_105 = arith.constant dense<0.000000e+00> : vector<16x32xf32>
    %269 = tpu.matmul %266, %268, %cst_105 {dimension_numbers = #tpu.dot_dimension_numbers<[1], [0], [0], [1], [0, 0, 1, 1], [], []>} : vector<16x128xf32>, vector<128x32xf32>, vector<16x32xf32> -> vector<16x32xf32>
    %c0_106 = arith.constant 0 : index
    %c0_107 = arith.constant 0 : index
    %c0_108 = arith.constant 0 : index
    %270 = vector.load %arg21[%c0_106, %c0_107, %c0_108] : memref<1x1x32xf32, #tpu.memory_space<vmem>>, vector<1x1x32xf32>
    %271 = vector.shape_cast %270 : vector<1x1x32xf32> to vector<1x32xf32>
    %272 = vector.broadcast %271 : vector<1x32xf32> to vector<16x32xf32>
    %273 = arith.addf %269, %272 : vector<16x32xf32>
    %274 = arith.addf %227, %273 : vector<16x32xf32>
    %c0_109 = arith.constant 0 : index
    %c0_110 = arith.constant 0 : index
    %c0_111 = arith.constant 0 : index
    %275 = vector.load %arg22[%c0_109, %c0_110, %c0_111] : memref<1x32x8xf32, #tpu.memory_space<vmem>>, vector<1x32x8xf32>
    %276 = vector.shape_cast %275 : vector<1x32x8xf32> to vector<32x8xf32>
    %cst_112 = arith.constant dense<0.000000e+00> : vector<16x8xf32>
    %277 = tpu.matmul %274, %276, %cst_112 {dimension_numbers = #tpu.dot_dimension_numbers<[1], [0], [0], [1], [0, 0, 1, 1], [], []>} : vector<16x32xf32>, vector<32x8xf32>, vector<16x8xf32> -> vector<16x8xf32>
    %c0_113 = arith.constant 0 : index
    %c0_114 = arith.constant 0 : index
    %c0_115 = arith.constant 0 : index
    %278 = vector.load %arg23[%c0_113, %c0_114, %c0_115] : memref<1x1x8xf32, #tpu.memory_space<vmem>>, vector<1x1x8xf32>
    %279 = vector.shape_cast %278 : vector<1x1x8xf32> to vector<1x8xf32>
    %280 = vector.broadcast %279 : vector<1x8xf32> to vector<16x8xf32>
    %281 = arith.addf %277, %280 : vector<16x8xf32>
    %cst_116 = arith.constant 0.000000e+00 : f32
    %282 = vector.broadcast %cst_116 : f32 to vector<16x8xf32>
    %283 = arith.subf %282, %281 : vector<16x8xf32>
    %284 = math.exp %283 : vector<16x8xf32>
    %cst_117 = arith.constant 1.000000e+00 : f32
    %285 = vector.broadcast %cst_117 : f32 to vector<16x8xf32>
    %286 = arith.addf %285, %284 : vector<16x8xf32>
    %287 = tpu.reciprocal %286 {approx = true} : vector<16x8xf32> -> vector<16x8xf32>
    %288 = tpu.concatenate %287, %287, %287, %287 in 1 : vector<16x8xf32>, vector<16x8xf32>, vector<16x8xf32>, vector<16x8xf32> -> vector<16x32xf32>
    %cst_118 = arith.constant 1.000000e+00 : f32
    %289 = vector.broadcast %cst_118 : f32 to vector<16x32xf32>
    %290 = arith.subf %289, %288 : vector<16x32xf32>
    %291 = arith.mulf %3, %290 : vector<16x32xf32>
    %292 = arith.mulf %274, %288 : vector<16x32xf32>
    %293 = arith.addf %291, %292 : vector<16x32xf32>
    %c0_119 = arith.constant 0 : index
    %c0_120 = arith.constant 0 : index
    %c0_121 = arith.constant 0 : index
    %294 = vector.load %arg24[%c0_119, %c0_120, %c0_121] : memref<1x1x32xf32, #tpu.memory_space<vmem>>, vector<1x1x32xf32>
    %295 = vector.shape_cast %294 : vector<1x1x32xf32> to vector<1x32xf32>
    %c0_122 = arith.constant 0 : index
    %c0_123 = arith.constant 0 : index
    %c0_124 = arith.constant 0 : index
    %296 = vector.load %arg25[%c0_122, %c0_123, %c0_124] : memref<1x1x32xf32, #tpu.memory_space<vmem>>, vector<1x1x32xf32>
    %297 = vector.shape_cast %296 : vector<1x1x32xf32> to vector<1x32xf32>
    %cst_125 = arith.constant dense<0.000000e+00> : vector<16xf32>
    %298 = vector.multi_reduction <add>, %293, %cst_125 [1] : vector<16x32xf32> to vector<16xf32>
    %299 = vector.shape_cast %298 : vector<16xf32> to vector<16x1xf32>
    %cst_126 = arith.constant 3.200000e+01 : f32
    %300 = vector.broadcast %cst_126 : f32 to vector<16x1xf32>
    %301 = arith.divf %299, %300 : vector<16x1xf32>
    %302 = vector.broadcast %301 : vector<16x1xf32> to vector<16x32xf32>
    %303 = arith.subf %293, %302 : vector<16x32xf32>
    %304 = arith.mulf %303, %303 : vector<16x32xf32>
    %cst_127 = arith.constant dense<0.000000e+00> : vector<16xf32>
    %305 = vector.multi_reduction <add>, %304, %cst_127 [1] : vector<16x32xf32> to vector<16xf32>
    %306 = vector.shape_cast %305 : vector<16xf32> to vector<16x1xf32>
    %cst_128 = arith.constant 3.200000e+01 : f32
    %307 = vector.broadcast %cst_128 : f32 to vector<16x1xf32>
    %308 = arith.divf %306, %307 : vector<16x1xf32>
    %cst_129 = arith.constant 9.99999974E-6 : f32
    %309 = vector.broadcast %cst_129 : f32 to vector<16x1xf32>
    %310 = arith.addf %308, %309 : vector<16x1xf32>
    %311 = math.rsqrt %310 : vector<16x1xf32>
    %312 = vector.broadcast %311 : vector<16x1xf32> to vector<16x32xf32>
    %313 = arith.mulf %303, %312 : vector<16x32xf32>
    %314 = vector.broadcast %295 : vector<1x32xf32> to vector<16x32xf32>
    %315 = arith.mulf %313, %314 : vector<16x32xf32>
    %316 = vector.broadcast %297 : vector<1x32xf32> to vector<16x32xf32>
    %317 = arith.addf %315, %316 : vector<16x32xf32>
    %c0_130 = arith.constant 0 : index
    %c0_131 = arith.constant 0 : index
    %c0_132 = arith.constant 0 : index
    %318 = vector.load %arg26[%c0_130, %c0_131, %c0_132] : memref<1x32x96xf32, #tpu.memory_space<vmem>>, vector<1x32x96xf32>
    %319 = vector.shape_cast %318 : vector<1x32x96xf32> to vector<32x96xf32>
    %cst_133 = arith.constant dense<0.000000e+00> : vector<16x96xf32>
    %320 = tpu.matmul %317, %319, %cst_133 {dimension_numbers = #tpu.dot_dimension_numbers<[1], [0], [0], [1], [0, 0, 1, 1], [], []>} : vector<16x32xf32>, vector<32x96xf32>, vector<16x96xf32> -> vector<16x96xf32>
    %321 = vector.extract_strided_slice %320 {offsets = [0, 0], sizes = [16, 32], strides = [1, 1]} : vector<16x96xf32> to vector<16x32xf32>
    %322 = vector.extract_strided_slice %320 {offsets = [0, 32], sizes = [16, 32], strides = [1, 1]} : vector<16x96xf32> to vector<16x32xf32>
    %323 = vector.extract_strided_slice %320 {offsets = [0, 64], sizes = [16, 32], strides = [1, 1]} : vector<16x96xf32> to vector<16x32xf32>
    %c0_134 = arith.constant 0 : index
    %c0_135 = arith.constant 0 : index
    %c0_136 = arith.constant 0 : index
    %324 = vector.load %arg27[%c0_134, %c0_135, %c0_136] : memref<1x32x32xf32, #tpu.memory_space<vmem>>, vector<1x32x32xf32>
    %325 = vector.shape_cast %324 : vector<1x32x32xf32> to vector<32x32xf32>
    %326 = vector.extract_strided_slice %321 {offsets = [0, 0], sizes = [8, 32], strides = [1, 1]} : vector<16x32xf32> to vector<8x32xf32>
    %327 = vector.extract_strided_slice %322 {offsets = [0, 0], sizes = [8, 32], strides = [1, 1]} : vector<16x32xf32> to vector<8x32xf32>
    %328 = vector.extract_strided_slice %323 {offsets = [0, 0], sizes = [8, 32], strides = [1, 1]} : vector<16x32xf32> to vector<8x32xf32>
    %329 = vector.extract_strided_slice %326 {offsets = [0, 0], sizes = [8, 8], strides = [1, 1]} : vector<8x32xf32> to vector<8x8xf32>
    %330 = vector.extract_strided_slice %327 {offsets = [0, 0], sizes = [8, 8], strides = [1, 1]} : vector<8x32xf32> to vector<8x8xf32>
    %cst_137 = arith.constant dense<0.000000e+00> : vector<8x8xf32>
    %331 = tpu.matmul %329, %330, %cst_137 {dimension_numbers = #tpu.dot_dimension_numbers<[1], [1], [0], [0], [0, 0, 1, 0], [], []>} : vector<8x8xf32>, vector<8x8xf32>, vector<8x8xf32> -> vector<8x8xf32>
    %cst_138 = arith.constant dense<0xFF800000> : vector<8xf32>
    %332 = vector.multi_reduction <maximumf>, %331, %cst_138 [1] : vector<8x8xf32> to vector<8xf32>
    %333 = vector.shape_cast %332 : vector<8xf32> to vector<8x1xf32>
    %334 = vector.broadcast %333 : vector<8x1xf32> to vector<8x8xf32>
    %335 = arith.subf %331, %334 : vector<8x8xf32>
    %336 = math.exp %335 : vector<8x8xf32>
    %cst_139 = arith.constant dense<0.000000e+00> : vector<8xf32>
    %337 = vector.multi_reduction <add>, %336, %cst_139 [1] : vector<8x8xf32> to vector<8xf32>
    %338 = vector.shape_cast %337 : vector<8xf32> to vector<8x1xf32>
    %339 = tpu.reciprocal %338 {approx = true} : vector<8x1xf32> -> vector<8x1xf32>
    %340 = vector.broadcast %339 : vector<8x1xf32> to vector<8x8xf32>
    %341 = arith.mulf %336, %340 : vector<8x8xf32>
    %342 = vector.extract_strided_slice %328 {offsets = [0, 0], sizes = [8, 8], strides = [1, 1]} : vector<8x32xf32> to vector<8x8xf32>
    %cst_140 = arith.constant dense<0.000000e+00> : vector<8x8xf32>
    %343 = tpu.matmul %341, %342, %cst_140 {dimension_numbers = #tpu.dot_dimension_numbers<[1], [0], [0], [1], [0, 0, 1, 1], [], []>} : vector<8x8xf32>, vector<8x8xf32>, vector<8x8xf32> -> vector<8x8xf32>
    %344 = vector.extract_strided_slice %325 {offsets = [0, 0], sizes = [8, 32], strides = [1, 1]} : vector<32x32xf32> to vector<8x32xf32>
    %cst_141 = arith.constant dense<0.000000e+00> : vector<8x32xf32>
    %345 = tpu.matmul %343, %344, %cst_141 {dimension_numbers = #tpu.dot_dimension_numbers<[1], [0], [0], [1], [0, 0, 1, 1], [], []>} : vector<8x8xf32>, vector<8x32xf32>, vector<8x32xf32> -> vector<8x32xf32>
    %346 = vector.extract_strided_slice %326 {offsets = [0, 8], sizes = [8, 8], strides = [1, 1]} : vector<8x32xf32> to vector<8x8xf32>
    %347 = vector.extract_strided_slice %327 {offsets = [0, 8], sizes = [8, 8], strides = [1, 1]} : vector<8x32xf32> to vector<8x8xf32>
    %cst_142 = arith.constant dense<0.000000e+00> : vector<8x8xf32>
    %348 = tpu.matmul %346, %347, %cst_142 {dimension_numbers = #tpu.dot_dimension_numbers<[1], [1], [0], [0], [0, 0, 1, 0], [], []>} : vector<8x8xf32>, vector<8x8xf32>, vector<8x8xf32> -> vector<8x8xf32>
    %cst_143 = arith.constant dense<0xFF800000> : vector<8xf32>
    %349 = vector.multi_reduction <maximumf>, %348, %cst_143 [1] : vector<8x8xf32> to vector<8xf32>
    %350 = vector.shape_cast %349 : vector<8xf32> to vector<8x1xf32>
    %351 = vector.broadcast %350 : vector<8x1xf32> to vector<8x8xf32>
    %352 = arith.subf %348, %351 : vector<8x8xf32>
    %353 = math.exp %352 : vector<8x8xf32>
    %cst_144 = arith.constant dense<0.000000e+00> : vector<8xf32>
    %354 = vector.multi_reduction <add>, %353, %cst_144 [1] : vector<8x8xf32> to vector<8xf32>
    %355 = vector.shape_cast %354 : vector<8xf32> to vector<8x1xf32>
    %356 = tpu.reciprocal %355 {approx = true} : vector<8x1xf32> -> vector<8x1xf32>
    %357 = vector.broadcast %356 : vector<8x1xf32> to vector<8x8xf32>
    %358 = arith.mulf %353, %357 : vector<8x8xf32>
    %359 = vector.extract_strided_slice %328 {offsets = [0, 8], sizes = [8, 8], strides = [1, 1]} : vector<8x32xf32> to vector<8x8xf32>
    %cst_145 = arith.constant dense<0.000000e+00> : vector<8x8xf32>
    %360 = tpu.matmul %358, %359, %cst_145 {dimension_numbers = #tpu.dot_dimension_numbers<[1], [0], [0], [1], [0, 0, 1, 1], [], []>} : vector<8x8xf32>, vector<8x8xf32>, vector<8x8xf32> -> vector<8x8xf32>
    %361 = vector.extract_strided_slice %325 {offsets = [8, 0], sizes = [8, 32], strides = [1, 1]} : vector<32x32xf32> to vector<8x32xf32>
    %cst_146 = arith.constant dense<0.000000e+00> : vector<8x32xf32>
    %362 = tpu.matmul %360, %361, %cst_146 {dimension_numbers = #tpu.dot_dimension_numbers<[1], [0], [0], [1], [0, 0, 1, 1], [], []>} : vector<8x8xf32>, vector<8x32xf32>, vector<8x32xf32> -> vector<8x32xf32>
    %363 = arith.addf %345, %362 : vector<8x32xf32>
    %364 = vector.extract_strided_slice %326 {offsets = [0, 16], sizes = [8, 8], strides = [1, 1]} : vector<8x32xf32> to vector<8x8xf32>
    %365 = vector.extract_strided_slice %327 {offsets = [0, 16], sizes = [8, 8], strides = [1, 1]} : vector<8x32xf32> to vector<8x8xf32>
    %cst_147 = arith.constant dense<0.000000e+00> : vector<8x8xf32>
    %366 = tpu.matmul %364, %365, %cst_147 {dimension_numbers = #tpu.dot_dimension_numbers<[1], [1], [0], [0], [0, 0, 1, 0], [], []>} : vector<8x8xf32>, vector<8x8xf32>, vector<8x8xf32> -> vector<8x8xf32>
    %cst_148 = arith.constant dense<0xFF800000> : vector<8xf32>
    %367 = vector.multi_reduction <maximumf>, %366, %cst_148 [1] : vector<8x8xf32> to vector<8xf32>
    %368 = vector.shape_cast %367 : vector<8xf32> to vector<8x1xf32>
    %369 = vector.broadcast %368 : vector<8x1xf32> to vector<8x8xf32>
    %370 = arith.subf %366, %369 : vector<8x8xf32>
    %371 = math.exp %370 : vector<8x8xf32>
    %cst_149 = arith.constant dense<0.000000e+00> : vector<8xf32>
    %372 = vector.multi_reduction <add>, %371, %cst_149 [1] : vector<8x8xf32> to vector<8xf32>
    %373 = vector.shape_cast %372 : vector<8xf32> to vector<8x1xf32>
    %374 = tpu.reciprocal %373 {approx = true} : vector<8x1xf32> -> vector<8x1xf32>
    %375 = vector.broadcast %374 : vector<8x1xf32> to vector<8x8xf32>
    %376 = arith.mulf %371, %375 : vector<8x8xf32>
    %377 = vector.extract_strided_slice %328 {offsets = [0, 16], sizes = [8, 8], strides = [1, 1]} : vector<8x32xf32> to vector<8x8xf32>
    %cst_150 = arith.constant dense<0.000000e+00> : vector<8x8xf32>
    %378 = tpu.matmul %376, %377, %cst_150 {dimension_numbers = #tpu.dot_dimension_numbers<[1], [0], [0], [1], [0, 0, 1, 1], [], []>} : vector<8x8xf32>, vector<8x8xf32>, vector<8x8xf32> -> vector<8x8xf32>
    %379 = vector.extract_strided_slice %325 {offsets = [16, 0], sizes = [8, 32], strides = [1, 1]} : vector<32x32xf32> to vector<8x32xf32>
    %cst_151 = arith.constant dense<0.000000e+00> : vector<8x32xf32>
    %380 = tpu.matmul %378, %379, %cst_151 {dimension_numbers = #tpu.dot_dimension_numbers<[1], [0], [0], [1], [0, 0, 1, 1], [], []>} : vector<8x8xf32>, vector<8x32xf32>, vector<8x32xf32> -> vector<8x32xf32>
    %381 = arith.addf %363, %380 : vector<8x32xf32>
    %382 = vector.extract_strided_slice %326 {offsets = [0, 24], sizes = [8, 8], strides = [1, 1]} : vector<8x32xf32> to vector<8x8xf32>
    %383 = vector.extract_strided_slice %327 {offsets = [0, 24], sizes = [8, 8], strides = [1, 1]} : vector<8x32xf32> to vector<8x8xf32>
    %cst_152 = arith.constant dense<0.000000e+00> : vector<8x8xf32>
    %384 = tpu.matmul %382, %383, %cst_152 {dimension_numbers = #tpu.dot_dimension_numbers<[1], [1], [0], [0], [0, 0, 1, 0], [], []>} : vector<8x8xf32>, vector<8x8xf32>, vector<8x8xf32> -> vector<8x8xf32>
    %cst_153 = arith.constant dense<0xFF800000> : vector<8xf32>
    %385 = vector.multi_reduction <maximumf>, %384, %cst_153 [1] : vector<8x8xf32> to vector<8xf32>
    %386 = vector.shape_cast %385 : vector<8xf32> to vector<8x1xf32>
    %387 = vector.broadcast %386 : vector<8x1xf32> to vector<8x8xf32>
    %388 = arith.subf %384, %387 : vector<8x8xf32>
    %389 = math.exp %388 : vector<8x8xf32>
    %cst_154 = arith.constant dense<0.000000e+00> : vector<8xf32>
    %390 = vector.multi_reduction <add>, %389, %cst_154 [1] : vector<8x8xf32> to vector<8xf32>
    %391 = vector.shape_cast %390 : vector<8xf32> to vector<8x1xf32>
    %392 = tpu.reciprocal %391 {approx = true} : vector<8x1xf32> -> vector<8x1xf32>
    %393 = vector.broadcast %392 : vector<8x1xf32> to vector<8x8xf32>
    %394 = arith.mulf %389, %393 : vector<8x8xf32>
    %395 = vector.extract_strided_slice %328 {offsets = [0, 24], sizes = [8, 8], strides = [1, 1]} : vector<8x32xf32> to vector<8x8xf32>
    %cst_155 = arith.constant dense<0.000000e+00> : vector<8x8xf32>
    %396 = tpu.matmul %394, %395, %cst_155 {dimension_numbers = #tpu.dot_dimension_numbers<[1], [0], [0], [1], [0, 0, 1, 1], [], []>} : vector<8x8xf32>, vector<8x8xf32>, vector<8x8xf32> -> vector<8x8xf32>
    %397 = vector.extract_strided_slice %325 {offsets = [24, 0], sizes = [8, 32], strides = [1, 1]} : vector<32x32xf32> to vector<8x32xf32>
    %cst_156 = arith.constant dense<0.000000e+00> : vector<8x32xf32>
    %398 = tpu.matmul %396, %397, %cst_156 {dimension_numbers = #tpu.dot_dimension_numbers<[1], [0], [0], [1], [0, 0, 1, 1], [], []>} : vector<8x8xf32>, vector<8x32xf32>, vector<8x32xf32> -> vector<8x32xf32>
    %399 = arith.addf %381, %398 : vector<8x32xf32>
    %400 = vector.extract_strided_slice %321 {offsets = [8, 0], sizes = [8, 32], strides = [1, 1]} : vector<16x32xf32> to vector<8x32xf32>
    %401 = vector.extract_strided_slice %322 {offsets = [8, 0], sizes = [8, 32], strides = [1, 1]} : vector<16x32xf32> to vector<8x32xf32>
    %402 = vector.extract_strided_slice %323 {offsets = [8, 0], sizes = [8, 32], strides = [1, 1]} : vector<16x32xf32> to vector<8x32xf32>
    %403 = vector.extract_strided_slice %400 {offsets = [0, 0], sizes = [8, 8], strides = [1, 1]} : vector<8x32xf32> to vector<8x8xf32>
    %404 = vector.extract_strided_slice %401 {offsets = [0, 0], sizes = [8, 8], strides = [1, 1]} : vector<8x32xf32> to vector<8x8xf32>
    %cst_157 = arith.constant dense<0.000000e+00> : vector<8x8xf32>
    %405 = tpu.matmul %403, %404, %cst_157 {dimension_numbers = #tpu.dot_dimension_numbers<[1], [1], [0], [0], [0, 0, 1, 0], [], []>} : vector<8x8xf32>, vector<8x8xf32>, vector<8x8xf32> -> vector<8x8xf32>
    %cst_158 = arith.constant dense<0xFF800000> : vector<8xf32>
    %406 = vector.multi_reduction <maximumf>, %405, %cst_158 [1] : vector<8x8xf32> to vector<8xf32>
    %407 = vector.shape_cast %406 : vector<8xf32> to vector<8x1xf32>
    %408 = vector.broadcast %407 : vector<8x1xf32> to vector<8x8xf32>
    %409 = arith.subf %405, %408 : vector<8x8xf32>
    %410 = math.exp %409 : vector<8x8xf32>
    %cst_159 = arith.constant dense<0.000000e+00> : vector<8xf32>
    %411 = vector.multi_reduction <add>, %410, %cst_159 [1] : vector<8x8xf32> to vector<8xf32>
    %412 = vector.shape_cast %411 : vector<8xf32> to vector<8x1xf32>
    %413 = tpu.reciprocal %412 {approx = true} : vector<8x1xf32> -> vector<8x1xf32>
    %414 = vector.broadcast %413 : vector<8x1xf32> to vector<8x8xf32>
    %415 = arith.mulf %410, %414 : vector<8x8xf32>
    %416 = vector.extract_strided_slice %402 {offsets = [0, 0], sizes = [8, 8], strides = [1, 1]} : vector<8x32xf32> to vector<8x8xf32>
    %cst_160 = arith.constant dense<0.000000e+00> : vector<8x8xf32>
    %417 = tpu.matmul %415, %416, %cst_160 {dimension_numbers = #tpu.dot_dimension_numbers<[1], [0], [0], [1], [0, 0, 1, 1], [], []>} : vector<8x8xf32>, vector<8x8xf32>, vector<8x8xf32> -> vector<8x8xf32>
    %418 = vector.extract_strided_slice %325 {offsets = [0, 0], sizes = [8, 32], strides = [1, 1]} : vector<32x32xf32> to vector<8x32xf32>
    %cst_161 = arith.constant dense<0.000000e+00> : vector<8x32xf32>
    %419 = tpu.matmul %417, %418, %cst_161 {dimension_numbers = #tpu.dot_dimension_numbers<[1], [0], [0], [1], [0, 0, 1, 1], [], []>} : vector<8x8xf32>, vector<8x32xf32>, vector<8x32xf32> -> vector<8x32xf32>
    %420 = vector.extract_strided_slice %400 {offsets = [0, 8], sizes = [8, 8], strides = [1, 1]} : vector<8x32xf32> to vector<8x8xf32>
    %421 = vector.extract_strided_slice %401 {offsets = [0, 8], sizes = [8, 8], strides = [1, 1]} : vector<8x32xf32> to vector<8x8xf32>
    %cst_162 = arith.constant dense<0.000000e+00> : vector<8x8xf32>
    %422 = tpu.matmul %420, %421, %cst_162 {dimension_numbers = #tpu.dot_dimension_numbers<[1], [1], [0], [0], [0, 0, 1, 0], [], []>} : vector<8x8xf32>, vector<8x8xf32>, vector<8x8xf32> -> vector<8x8xf32>
    %cst_163 = arith.constant dense<0xFF800000> : vector<8xf32>
    %423 = vector.multi_reduction <maximumf>, %422, %cst_163 [1] : vector<8x8xf32> to vector<8xf32>
    %424 = vector.shape_cast %423 : vector<8xf32> to vector<8x1xf32>
    %425 = vector.broadcast %424 : vector<8x1xf32> to vector<8x8xf32>
    %426 = arith.subf %422, %425 : vector<8x8xf32>
    %427 = math.exp %426 : vector<8x8xf32>
    %cst_164 = arith.constant dense<0.000000e+00> : vector<8xf32>
    %428 = vector.multi_reduction <add>, %427, %cst_164 [1] : vector<8x8xf32> to vector<8xf32>
    %429 = vector.shape_cast %428 : vector<8xf32> to vector<8x1xf32>
    %430 = tpu.reciprocal %429 {approx = true} : vector<8x1xf32> -> vector<8x1xf32>
    %431 = vector.broadcast %430 : vector<8x1xf32> to vector<8x8xf32>
    %432 = arith.mulf %427, %431 : vector<8x8xf32>
    %433 = vector.extract_strided_slice %402 {offsets = [0, 8], sizes = [8, 8], strides = [1, 1]} : vector<8x32xf32> to vector<8x8xf32>
    %cst_165 = arith.constant dense<0.000000e+00> : vector<8x8xf32>
    %434 = tpu.matmul %432, %433, %cst_165 {dimension_numbers = #tpu.dot_dimension_numbers<[1], [0], [0], [1], [0, 0, 1, 1], [], []>} : vector<8x8xf32>, vector<8x8xf32>, vector<8x8xf32> -> vector<8x8xf32>
    %435 = vector.extract_strided_slice %325 {offsets = [8, 0], sizes = [8, 32], strides = [1, 1]} : vector<32x32xf32> to vector<8x32xf32>
    %cst_166 = arith.constant dense<0.000000e+00> : vector<8x32xf32>
    %436 = tpu.matmul %434, %435, %cst_166 {dimension_numbers = #tpu.dot_dimension_numbers<[1], [0], [0], [1], [0, 0, 1, 1], [], []>} : vector<8x8xf32>, vector<8x32xf32>, vector<8x32xf32> -> vector<8x32xf32>
    %437 = arith.addf %419, %436 : vector<8x32xf32>
    %438 = vector.extract_strided_slice %400 {offsets = [0, 16], sizes = [8, 8], strides = [1, 1]} : vector<8x32xf32> to vector<8x8xf32>
    %439 = vector.extract_strided_slice %401 {offsets = [0, 16], sizes = [8, 8], strides = [1, 1]} : vector<8x32xf32> to vector<8x8xf32>
    %cst_167 = arith.constant dense<0.000000e+00> : vector<8x8xf32>
    %440 = tpu.matmul %438, %439, %cst_167 {dimension_numbers = #tpu.dot_dimension_numbers<[1], [1], [0], [0], [0, 0, 1, 0], [], []>} : vector<8x8xf32>, vector<8x8xf32>, vector<8x8xf32> -> vector<8x8xf32>
    %cst_168 = arith.constant dense<0xFF800000> : vector<8xf32>
    %441 = vector.multi_reduction <maximumf>, %440, %cst_168 [1] : vector<8x8xf32> to vector<8xf32>
    %442 = vector.shape_cast %441 : vector<8xf32> to vector<8x1xf32>
    %443 = vector.broadcast %442 : vector<8x1xf32> to vector<8x8xf32>
    %444 = arith.subf %440, %443 : vector<8x8xf32>
    %445 = math.exp %444 : vector<8x8xf32>
    %cst_169 = arith.constant dense<0.000000e+00> : vector<8xf32>
    %446 = vector.multi_reduction <add>, %445, %cst_169 [1] : vector<8x8xf32> to vector<8xf32>
    %447 = vector.shape_cast %446 : vector<8xf32> to vector<8x1xf32>
    %448 = tpu.reciprocal %447 {approx = true} : vector<8x1xf32> -> vector<8x1xf32>
    %449 = vector.broadcast %448 : vector<8x1xf32> to vector<8x8xf32>
    %450 = arith.mulf %445, %449 : vector<8x8xf32>
    %451 = vector.extract_strided_slice %402 {offsets = [0, 16], sizes = [8, 8], strides = [1, 1]} : vector<8x32xf32> to vector<8x8xf32>
    %cst_170 = arith.constant dense<0.000000e+00> : vector<8x8xf32>
    %452 = tpu.matmul %450, %451, %cst_170 {dimension_numbers = #tpu.dot_dimension_numbers<[1], [0], [0], [1], [0, 0, 1, 1], [], []>} : vector<8x8xf32>, vector<8x8xf32>, vector<8x8xf32> -> vector<8x8xf32>
    %453 = vector.extract_strided_slice %325 {offsets = [16, 0], sizes = [8, 32], strides = [1, 1]} : vector<32x32xf32> to vector<8x32xf32>
    %cst_171 = arith.constant dense<0.000000e+00> : vector<8x32xf32>
    %454 = tpu.matmul %452, %453, %cst_171 {dimension_numbers = #tpu.dot_dimension_numbers<[1], [0], [0], [1], [0, 0, 1, 1], [], []>} : vector<8x8xf32>, vector<8x32xf32>, vector<8x32xf32> -> vector<8x32xf32>
    %455 = arith.addf %437, %454 : vector<8x32xf32>
    %456 = vector.extract_strided_slice %400 {offsets = [0, 24], sizes = [8, 8], strides = [1, 1]} : vector<8x32xf32> to vector<8x8xf32>
    %457 = vector.extract_strided_slice %401 {offsets = [0, 24], sizes = [8, 8], strides = [1, 1]} : vector<8x32xf32> to vector<8x8xf32>
    %cst_172 = arith.constant dense<0.000000e+00> : vector<8x8xf32>
    %458 = tpu.matmul %456, %457, %cst_172 {dimension_numbers = #tpu.dot_dimension_numbers<[1], [1], [0], [0], [0, 0, 1, 0], [], []>} : vector<8x8xf32>, vector<8x8xf32>, vector<8x8xf32> -> vector<8x8xf32>
    %cst_173 = arith.constant dense<0xFF800000> : vector<8xf32>
    %459 = vector.multi_reduction <maximumf>, %458, %cst_173 [1] : vector<8x8xf32> to vector<8xf32>
    %460 = vector.shape_cast %459 : vector<8xf32> to vector<8x1xf32>
    %461 = vector.broadcast %460 : vector<8x1xf32> to vector<8x8xf32>
    %462 = arith.subf %458, %461 : vector<8x8xf32>
    %463 = math.exp %462 : vector<8x8xf32>
    %cst_174 = arith.constant dense<0.000000e+00> : vector<8xf32>
    %464 = vector.multi_reduction <add>, %463, %cst_174 [1] : vector<8x8xf32> to vector<8xf32>
    %465 = vector.shape_cast %464 : vector<8xf32> to vector<8x1xf32>
    %466 = tpu.reciprocal %465 {approx = true} : vector<8x1xf32> -> vector<8x1xf32>
    %467 = vector.broadcast %466 : vector<8x1xf32> to vector<8x8xf32>
    %468 = arith.mulf %463, %467 : vector<8x8xf32>
    %469 = vector.extract_strided_slice %402 {offsets = [0, 24], sizes = [8, 8], strides = [1, 1]} : vector<8x32xf32> to vector<8x8xf32>
    %cst_175 = arith.constant dense<0.000000e+00> : vector<8x8xf32>
    %470 = tpu.matmul %468, %469, %cst_175 {dimension_numbers = #tpu.dot_dimension_numbers<[1], [0], [0], [1], [0, 0, 1, 1], [], []>} : vector<8x8xf32>, vector<8x8xf32>, vector<8x8xf32> -> vector<8x8xf32>
    %471 = vector.extract_strided_slice %325 {offsets = [24, 0], sizes = [8, 32], strides = [1, 1]} : vector<32x32xf32> to vector<8x32xf32>
    %cst_176 = arith.constant dense<0.000000e+00> : vector<8x32xf32>
    %472 = tpu.matmul %470, %471, %cst_176 {dimension_numbers = #tpu.dot_dimension_numbers<[1], [0], [0], [1], [0, 0, 1, 1], [], []>} : vector<8x8xf32>, vector<8x32xf32>, vector<8x32xf32> -> vector<8x32xf32>
    %473 = arith.addf %455, %472 : vector<8x32xf32>
    %474 = tpu.concatenate %399, %473 in 0 : vector<8x32xf32>, vector<8x32xf32> -> vector<16x32xf32>
    %c0_177 = arith.constant 0 : index
    %c0_178 = arith.constant 0 : index
    %c0_179 = arith.constant 0 : index
    %475 = vector.load %arg28[%c0_177, %c0_178, %c0_179] : memref<1x1x32xf32, #tpu.memory_space<vmem>>, vector<1x1x32xf32>
    %476 = vector.shape_cast %475 : vector<1x1x32xf32> to vector<1x32xf32>
    %477 = vector.broadcast %476 : vector<1x32xf32> to vector<16x32xf32>
    %478 = arith.addf %474, %477 : vector<16x32xf32>
    %479 = arith.addf %293, %478 : vector<16x32xf32>
    %c0_180 = arith.constant 0 : index
    %c0_181 = arith.constant 0 : index
    %c0_182 = arith.constant 0 : index
    %480 = vector.load %arg29[%c0_180, %c0_181, %c0_182] : memref<1x1x32xf32, #tpu.memory_space<vmem>>, vector<1x1x32xf32>
    %481 = vector.shape_cast %480 : vector<1x1x32xf32> to vector<1x32xf32>
    %c0_183 = arith.constant 0 : index
    %c0_184 = arith.constant 0 : index
    %c0_185 = arith.constant 0 : index
    %482 = vector.load %arg30[%c0_183, %c0_184, %c0_185] : memref<1x1x32xf32, #tpu.memory_space<vmem>>, vector<1x1x32xf32>
    %483 = vector.shape_cast %482 : vector<1x1x32xf32> to vector<1x32xf32>
    %cst_186 = arith.constant dense<0.000000e+00> : vector<16xf32>
    %484 = vector.multi_reduction <add>, %479, %cst_186 [1] : vector<16x32xf32> to vector<16xf32>
    %485 = vector.shape_cast %484 : vector<16xf32> to vector<16x1xf32>
    %cst_187 = arith.constant 3.200000e+01 : f32
    %486 = vector.broadcast %cst_187 : f32 to vector<16x1xf32>
    %487 = arith.divf %485, %486 : vector<16x1xf32>
    %488 = vector.broadcast %487 : vector<16x1xf32> to vector<16x32xf32>
    %489 = arith.subf %479, %488 : vector<16x32xf32>
    %490 = arith.mulf %489, %489 : vector<16x32xf32>
    %cst_188 = arith.constant dense<0.000000e+00> : vector<16xf32>
    %491 = vector.multi_reduction <add>, %490, %cst_188 [1] : vector<16x32xf32> to vector<16xf32>
    %492 = vector.shape_cast %491 : vector<16xf32> to vector<16x1xf32>
    %cst_189 = arith.constant 3.200000e+01 : f32
    %493 = vector.broadcast %cst_189 : f32 to vector<16x1xf32>
    %494 = arith.divf %492, %493 : vector<16x1xf32>
    %cst_190 = arith.constant 9.99999974E-6 : f32
    %495 = vector.broadcast %cst_190 : f32 to vector<16x1xf32>
    %496 = arith.addf %494, %495 : vector<16x1xf32>
    %497 = math.rsqrt %496 : vector<16x1xf32>
    %498 = vector.broadcast %497 : vector<16x1xf32> to vector<16x32xf32>
    %499 = arith.mulf %489, %498 : vector<16x32xf32>
    %500 = vector.broadcast %481 : vector<1x32xf32> to vector<16x32xf32>
    %501 = arith.mulf %499, %500 : vector<16x32xf32>
    %502 = vector.broadcast %483 : vector<1x32xf32> to vector<16x32xf32>
    %503 = arith.addf %501, %502 : vector<16x32xf32>
    %c0_191 = arith.constant 0 : index
    %c0_192 = arith.constant 0 : index
    %c0_193 = arith.constant 0 : index
    %504 = vector.load %arg31[%c0_191, %c0_192, %c0_193] : memref<1x32x128xf32, #tpu.memory_space<vmem>>, vector<1x32x128xf32>
    %505 = vector.shape_cast %504 : vector<1x32x128xf32> to vector<32x128xf32>
    %cst_194 = arith.constant dense<0.000000e+00> : vector<16x128xf32>
    %506 = tpu.matmul %503, %505, %cst_194 {dimension_numbers = #tpu.dot_dimension_numbers<[1], [0], [0], [1], [0, 0, 1, 1], [], []>} : vector<16x32xf32>, vector<32x128xf32>, vector<16x128xf32> -> vector<16x128xf32>
    %c0_195 = arith.constant 0 : index
    %c0_196 = arith.constant 0 : index
    %c0_197 = arith.constant 0 : index
    %507 = vector.load %arg32[%c0_195, %c0_196, %c0_197] : memref<1x1x128xf32, #tpu.memory_space<vmem>>, vector<1x1x128xf32>
    %508 = vector.shape_cast %507 : vector<1x1x128xf32> to vector<1x128xf32>
    %509 = vector.broadcast %508 : vector<1x128xf32> to vector<16x128xf32>
    %510 = arith.addf %506, %509 : vector<16x128xf32>
    %cst_198 = arith.constant 5.000000e-01 : f32
    %511 = vector.broadcast %cst_198 : f32 to vector<16x128xf32>
    %512 = arith.mulf %511, %510 : vector<16x128xf32>
    %cst_199 = arith.constant 0.707106769 : f32
    %513 = vector.broadcast %cst_199 : f32 to vector<16x128xf32>
    %514 = arith.mulf %510, %513 : vector<16x128xf32>
    %515 = math.erf %514 : vector<16x128xf32>
    %cst_200 = arith.constant 1.000000e+00 : f32
    %516 = vector.broadcast %cst_200 : f32 to vector<16x128xf32>
    %517 = arith.addf %516, %515 : vector<16x128xf32>
    %518 = arith.mulf %512, %517 : vector<16x128xf32>
    %c0_201 = arith.constant 0 : index
    %c0_202 = arith.constant 0 : index
    %c0_203 = arith.constant 0 : index
    %519 = vector.load %arg33[%c0_201, %c0_202, %c0_203] : memref<1x128x32xf32, #tpu.memory_space<vmem>>, vector<1x128x32xf32>
    %520 = vector.shape_cast %519 : vector<1x128x32xf32> to vector<128x32xf32>
    %cst_204 = arith.constant dense<0.000000e+00> : vector<16x32xf32>
    %521 = tpu.matmul %518, %520, %cst_204 {dimension_numbers = #tpu.dot_dimension_numbers<[1], [0], [0], [1], [0, 0, 1, 1], [], []>} : vector<16x128xf32>, vector<128x32xf32>, vector<16x32xf32> -> vector<16x32xf32>
    %c0_205 = arith.constant 0 : index
    %c0_206 = arith.constant 0 : index
    %c0_207 = arith.constant 0 : index
    %522 = vector.load %arg34[%c0_205, %c0_206, %c0_207] : memref<1x1x32xf32, #tpu.memory_space<vmem>>, vector<1x1x32xf32>
    %523 = vector.shape_cast %522 : vector<1x1x32xf32> to vector<1x32xf32>
    %524 = vector.broadcast %523 : vector<1x32xf32> to vector<16x32xf32>
    %525 = arith.addf %521, %524 : vector<16x32xf32>
    %526 = arith.addf %479, %525 : vector<16x32xf32>
    %c0_208 = arith.constant 0 : index
    %c0_209 = arith.constant 0 : index
    %527 = vector.load %arg36[%c0_208, %c0_209] : memref<16x32xf32, #tpu.memory_space<vmem>>, vector<16x32xf32>
    tpu.vector_store %arg36[%c0_208, %c0_209], %526 {strides = array<i32>} : memref<16x32xf32, #tpu.memory_space<vmem>>, vector<16x32xf32>,
    %c1_i32 = arith.constant 1 : i32
    %528 = arith.cmpi eq, %arg0, %c1_i32 : i32
    %529 = arith.extui %528 : i1 to i32
    %c0_i32_210 = arith.constant 0 : i32
    %530 = arith.cmpi ne, %529, %c0_i32_210 : i32
    scf.if %530 {
      %c0_211 = arith.constant 0 : index
      %c0_212 = arith.constant 0 : index
      %531 = vector.load %arg4[%c0_211, %c0_212] : memref<1x32xf32, #tpu.memory_space<vmem>>, vector<1x32xf32>
      %c0_213 = arith.constant 0 : index
      %c0_214 = arith.constant 0 : index
      %532 = vector.load %arg5[%c0_213, %c0_214] : memref<1x32xf32, #tpu.memory_space<vmem>>, vector<1x32xf32>
      %cst_215 = arith.constant dense<0.000000e+00> : vector<16xf32>
      %533 = vector.multi_reduction <add>, %526, %cst_215 [1] : vector<16x32xf32> to vector<16xf32>
      %534 = vector.shape_cast %533 : vector<16xf32> to vector<16x1xf32>
      %cst_216 = arith.constant 3.200000e+01 : f32
      %535 = vector.broadcast %cst_216 : f32 to vector<16x1xf32>
      %536 = arith.divf %534, %535 : vector<16x1xf32>
      %537 = vector.broadcast %536 : vector<16x1xf32> to vector<16x32xf32>
      %538 = arith.subf %526, %537 : vector<16x32xf32>
      %539 = arith.mulf %538, %538 : vector<16x32xf32>
      %cst_217 = arith.constant dense<0.000000e+00> : vector<16xf32>
      %540 = vector.multi_reduction <add>, %539, %cst_217 [1] : vector<16x32xf32> to vector<16xf32>
      %541 = vector.shape_cast %540 : vector<16xf32> to vector<16x1xf32>
      %cst_218 = arith.constant 3.200000e+01 : f32
      %542 = vector.broadcast %cst_218 : f32 to vector<16x1xf32>
      %543 = arith.divf %541, %542 : vector<16x1xf32>
      %cst_219 = arith.constant 9.99999974E-6 : f32
      %544 = vector.broadcast %cst_219 : f32 to vector<16x1xf32>
      %545 = arith.addf %543, %544 : vector<16x1xf32>
      %546 = math.rsqrt %545 : vector<16x1xf32>
      %547 = vector.broadcast %546 : vector<16x1xf32> to vector<16x32xf32>
      %548 = arith.mulf %538, %547 : vector<16x32xf32>
      %549 = vector.broadcast %531 : vector<1x32xf32> to vector<16x32xf32>
      %550 = arith.mulf %548, %549 : vector<16x32xf32>
      %551 = vector.broadcast %532 : vector<1x32xf32> to vector<16x32xf32>
      %552 = arith.addf %550, %551 : vector<16x32xf32>
      %c0_220 = arith.constant 0 : index
      %c0_221 = arith.constant 0 : index
      %553 = vector.load %arg6[%c0_220, %c0_221] : memref<32x32xf32, #tpu.memory_space<vmem>>, vector<32x32xf32>
      %cst_222 = arith.constant dense<0.000000e+00> : vector<16x32xf32>
      %554 = tpu.matmul %552, %553, %cst_222 {dimension_numbers = #tpu.dot_dimension_numbers<[1], [0], [0], [1], [0, 0, 1, 1], [], []>} : vector<16x32xf32>, vector<32x32xf32>, vector<16x32xf32> -> vector<16x32xf32>
      %c0_223 = arith.constant 0 : index
      %c0_224 = arith.constant 0 : index
      %555 = vector.load %arg7[%c0_223, %c0_224] : memref<1x32xf32, #tpu.memory_space<vmem>>, vector<1x32xf32>
      %556 = vector.broadcast %555 : vector<1x32xf32> to vector<16x32xf32>
      %557 = arith.addf %554, %556 : vector<16x32xf32>
      %c0_225 = arith.constant 0 : index
      %c0_226 = arith.constant 0 : index
      %558 = vector.load %arg35[%c0_225, %c0_226] : memref<16x32xf32, #tpu.memory_space<vmem>>, vector<16x32xf32>
      tpu.vector_store %arg35[%c0_225, %c0_226], %557 {strides = array<i32>} : memref<16x32xf32, #tpu.memory_space<vmem>>, vector<16x32xf32>,
    } else {
    }
    return
  }
  func.func @transform_0(%arg0: i32) -> (i32, i32) {
    %c0_i32 = arith.constant 0 : i32
    %c0_i32_0 = arith.constant 0 : i32
    %c0_i32_1 = arith.constant 0 : i32
    return %c0_i32, %c0_i32_0 : i32, i32
  }
  func.func @transform_1(%arg0: i32) -> (i32, i32) {
    %c0_i32 = arith.constant 0 : i32
    %c0_i32_0 = arith.constant 0 : i32
    %c0_i32_1 = arith.constant 0 : i32
    return %c0_i32, %c0_i32_0 : i32, i32
  }
  func.func @transform_2(%arg0: i32) -> (i32, i32) {
    %c0_i32 = arith.constant 0 : i32
    %c0_i32_0 = arith.constant 0 : i32
    %c0_i32_1 = arith.constant 0 : i32
    return %c0_i32, %c0_i32_0 : i32, i32
  }
  func.func @transform_3(%arg0: i32) -> (i32, i32) {
    %c0_i32 = arith.constant 0 : i32
    %c0_i32_0 = arith.constant 0 : i32
    %c0_i32_1 = arith.constant 0 : i32
    return %c0_i32, %c0_i32_0 : i32, i32
  }
  func.func @transform_4(%arg0: i32) -> (i32, i32) {
    %c0_i32 = arith.constant 0 : i32
    %c0_i32_0 = arith.constant 0 : i32
    %c0_i32_1 = arith.constant 0 : i32
    return %c0_i32, %c0_i32_0 : i32, i32
  }
  func.func @transform_5(%arg0: i32) -> (i32, i32) {
    %c0_i32 = arith.constant 0 : i32
    %c0_i32_0 = arith.constant 0 : i32
    %c0_i32_1 = arith.constant 0 : i32
    return %c0_i32, %c0_i32_0 : i32, i32
  }
  func.func @transform_6(%arg0: i32) -> (i32, i32) {
    %c0_i32 = arith.constant 0 : i32
    %c0_i32_0 = arith.constant 0 : i32
    %c0_i32_1 = arith.constant 0 : i32
    return %c0_i32, %c0_i32_0 : i32, i32
  }
  func.func @transform_7(%arg0: i32) -> (i32, i32, i32) {
    %c0_i32 = arith.constant 0 : i32
    %c0_i32_0 = arith.constant 0 : i32
    %c0_i32_1 = arith.constant 0 : i32
    return %arg0, %c0_i32, %c0_i32_0 : i32, i32, i32
  }
  func.func @transform_8(%arg0: i32) -> (i32, i32, i32) {
    %c0_i32 = arith.constant 0 : i32
    %c0_i32_0 = arith.constant 0 : i32
    %c0_i32_1 = arith.constant 0 : i32
    return %arg0, %c0_i32, %c0_i32_0 : i32, i32, i32
  }
  func.func @transform_9(%arg0: i32) -> (i32, i32, i32) {
    %c0_i32 = arith.constant 0 : i32
    %c0_i32_0 = arith.constant 0 : i32
    %c0_i32_1 = arith.constant 0 : i32
    return %arg0, %c0_i32, %c0_i32_0 : i32, i32, i32
  }
  func.func @transform_10(%arg0: i32) -> (i32, i32, i32) {
    %c0_i32 = arith.constant 0 : i32
    %c0_i32_0 = arith.constant 0 : i32
    %c0_i32_1 = arith.constant 0 : i32
    return %arg0, %c0_i32, %c0_i32_0 : i32, i32, i32
  }
  func.func @transform_11(%arg0: i32) -> (i32, i32, i32) {
    %c0_i32 = arith.constant 0 : i32
    %c0_i32_0 = arith.constant 0 : i32
    %c0_i32_1 = arith.constant 0 : i32
    return %arg0, %c0_i32, %c0_i32_0 : i32, i32, i32
  }
  func.func @transform_12(%arg0: i32) -> (i32, i32, i32) {
    %c0_i32 = arith.constant 0 : i32
    %c0_i32_0 = arith.constant 0 : i32
    %c0_i32_1 = arith.constant 0 : i32
    return %arg0, %c0_i32, %c0_i32_0 : i32, i32, i32
  }
  func.func @transform_13(%arg0: i32) -> (i32, i32, i32) {
    %c0_i32 = arith.constant 0 : i32
    %c0_i32_0 = arith.constant 0 : i32
    %c0_i32_1 = arith.constant 0 : i32
    return %arg0, %c0_i32, %c0_i32_0 : i32, i32, i32
  }
  func.func @transform_14(%arg0: i32) -> (i32, i32, i32) {
    %c0_i32 = arith.constant 0 : i32
    %c0_i32_0 = arith.constant 0 : i32
    %c0_i32_1 = arith.constant 0 : i32
    return %arg0, %c0_i32, %c0_i32_0 : i32, i32, i32
  }
  func.func @transform_15(%arg0: i32) -> (i32, i32, i32) {
    %c0_i32 = arith.constant 0 : i32
    %c0_i32_0 = arith.constant 0 : i32
    %c0_i32_1 = arith.constant 0 : i32
    return %arg0, %c0_i32, %c0_i32_0 : i32, i32, i32
  }
  func.func @transform_16(%arg0: i32) -> (i32, i32, i32) {
    %c0_i32 = arith.constant 0 : i32
    %c0_i32_0 = arith.constant 0 : i32
    %c0_i32_1 = arith.constant 0 : i32
    return %arg0, %c0_i32, %c0_i32_0 : i32, i32, i32
  }
  func.func @transform_17(%arg0: i32) -> (i32, i32, i32) {
    %c0_i32 = arith.constant 0 : i32
    %c0_i32_0 = arith.constant 0 : i32
    %c0_i32_1 = arith.constant 0 : i32
    return %arg0, %c0_i32, %c0_i32_0 : i32, i32, i32
  }
  func.func @transform_18(%arg0: i32) -> (i32, i32, i32) {
    %c0_i32 = arith.constant 0 : i32
    %c0_i32_0 = arith.constant 0 : i32
    %c0_i32_1 = arith.constant 0 : i32
    return %arg0, %c0_i32, %c0_i32_0 : i32, i32, i32
  }
  func.func @transform_19(%arg0: i32) -> (i32, i32, i32) {
    %c0_i32 = arith.constant 0 : i32
    %c0_i32_0 = arith.constant 0 : i32
    %c0_i32_1 = arith.constant 0 : i32
    return %arg0, %c0_i32, %c0_i32_0 : i32, i32, i32
  }
  func.func @transform_20(%arg0: i32) -> (i32, i32, i32) {
    %c0_i32 = arith.constant 0 : i32
    %c0_i32_0 = arith.constant 0 : i32
    %c0_i32_1 = arith.constant 0 : i32
    return %arg0, %c0_i32, %c0_i32_0 : i32, i32, i32
  }
  func.func @transform_21(%arg0: i32) -> (i32, i32, i32) {
    %c0_i32 = arith.constant 0 : i32
    %c0_i32_0 = arith.constant 0 : i32
    %c0_i32_1 = arith.constant 0 : i32
    return %arg0, %c0_i32, %c0_i32_0 : i32, i32, i32
  }
  func.func @transform_22(%arg0: i32) -> (i32, i32, i32) {
    %c0_i32 = arith.constant 0 : i32
    %c0_i32_0 = arith.constant 0 : i32
    %c0_i32_1 = arith.constant 0 : i32
    return %arg0, %c0_i32, %c0_i32_0 : i32, i32, i32
  }
  func.func @transform_23(%arg0: i32) -> (i32, i32, i32) {
    %c0_i32 = arith.constant 0 : i32
    %c0_i32_0 = arith.constant 0 : i32
    %c0_i32_1 = arith.constant 0 : i32
    return %arg0, %c0_i32, %c0_i32_0 : i32, i32, i32
  }
  func.func @transform_24(%arg0: i32) -> (i32, i32, i32) {
    %c0_i32 = arith.constant 0 : i32
    %c0_i32_0 = arith.constant 0 : i32
    %c0_i32_1 = arith.constant 0 : i32
    return %arg0, %c0_i32, %c0_i32_0 : i32, i32, i32
  }
  func.func @transform_25(%arg0: i32) -> (i32, i32, i32) {
    %c0_i32 = arith.constant 0 : i32
    %c0_i32_0 = arith.constant 0 : i32
    %c0_i32_1 = arith.constant 0 : i32
    return %arg0, %c0_i32, %c0_i32_0 : i32, i32, i32
  }
  func.func @transform_26(%arg0: i32) -> (i32, i32, i32) {
    %c0_i32 = arith.constant 0 : i32
    %c0_i32_0 = arith.constant 0 : i32
    %c0_i32_1 = arith.constant 0 : i32
    return %arg0, %c0_i32, %c0_i32_0 : i32, i32, i32
  }
  func.func @transform_27(%arg0: i32) -> (i32, i32, i32) {
    %c0_i32 = arith.constant 0 : i32
    %c0_i32_0 = arith.constant 0 : i32
    %c0_i32_1 = arith.constant 0 : i32
    return %arg0, %c0_i32, %c0_i32_0 : i32, i32, i32
  }
  func.func @transform_28(%arg0: i32) -> (i32, i32, i32) {
    %c0_i32 = arith.constant 0 : i32
    %c0_i32_0 = arith.constant 0 : i32
    %c0_i32_1 = arith.constant 0 : i32
    return %arg0, %c0_i32, %c0_i32_0 : i32, i32, i32
  }
  func.func @transform_29(%arg0: i32) -> (i32, i32, i32) {
    %c0_i32 = arith.constant 0 : i32
    %c0_i32_0 = arith.constant 0 : i32
    %c0_i32_1 = arith.constant 0 : i32
    return %arg0, %c0_i32, %c0_i32_0 : i32, i32, i32
  }
  func.func @transform_30(%arg0: i32) -> (i32, i32, i32) {
    %c0_i32 = arith.constant 0 : i32
    %c0_i32_0 = arith.constant 0 : i32
    %c0_i32_1 = arith.constant 0 : i32
    return %arg0, %c0_i32, %c0_i32_0 : i32, i32, i32
  }
  func.func @transform_31(%arg0: i32) -> (i32, i32, i32) {
    %c0_i32 = arith.constant 0 : i32
    %c0_i32_0 = arith.constant 0 : i32
    %c0_i32_1 = arith.constant 0 : i32
    return %arg0, %c0_i32, %c0_i32_0 : i32, i32, i32
  }
  func.func @transform_32(%arg0: i32) -> (i32, i32, i32) {
    %c0_i32 = arith.constant 0 : i32
    %c0_i32_0 = arith.constant 0 : i32
    %c0_i32_1 = arith.constant 0 : i32
    return %arg0, %c0_i32, %c0_i32_0 : i32, i32, i32
  }
  func.func @transform_33(%arg0: i32) -> (i32, i32, i32) {
    %c0_i32 = arith.constant 0 : i32
    %c0_i32_0 = arith.constant 0 : i32
    %c0_i32_1 = arith.constant 0 : i32
    return %arg0, %c0_i32, %c0_i32_0 : i32, i32, i32
  }
  func.func @transform_34(%arg0: i32) -> (i32, i32) {
    %c0_i32 = arith.constant 0 : i32
    %c0_i32_0 = arith.constant 0 : i32
    %c0_i32_1 = arith.constant 0 : i32
    return %c0_i32, %c0_i32_0 : i32, i32
  }
}

</mosaic_0001>

<bundles_post_ra>
// kernel: decoder_forward.1
= control target key start
LH: loop header
LB: loop body
LE: loop exit
PB: predicated region body
PF: predicated region fallthrough
CT: control target
= control target key end

     0   :  { %s7838_s6 = smov 1   ;;  %s7839_s10 = smov 2   ;;  %s8777_s0 = inlined_call_operand.smem [shape: u32[35], index: -1, kind: input, shape index: {}] }
   0x1   :  { %s7898_s5 = sld [smem:[%s8777_s0]]   ;;  %s7840_s14 = smov 3  }
   0x2   :  { %s7903_s9 = sld [smem:[%s8777_s0 + %s7838_s6]]   ;;  %s7841_s18 = smov 4  }
   0x3   :  { %s7908_s13 = sld [smem:[%s8777_s0 + %s7839_s10]]   ;;  %s7842_s22 = smov 5  }
   0x4   :  { %s7913_s17 = sld [smem:[%s8777_s0 + %s7840_s14]]   ;;  %s7843_s26 = smov 6  }
   0x5   :  { %s7918_s21 = sld [smem:[%s8777_s0 + %s7841_s18]]   ;;  %s7844_s30 = smov 7  }
   0x6   :  { %s7923_s25 = sld [smem:[%s8777_s0 + %s7842_s22]]   ;;  %s7845_s4 = smov 8  }
   0x7   :  { %8791 = sst [smem:[#allocation6_spill]] %s7898_s5  ;;  %s7846_s10 = smov 9  }
   0x8   :  { %8792 = sst [smem:[#allocation7_spill]] %s7903_s9  ;;  %s7847_s15 = smov 10  }
   0x9   :  { %8793 = sst [smem:[#allocation8_spill]] %s7908_s13  ;;  %s7848_s20 = smov 11  }
   0xa   :  { %8794 = sst [smem:[#allocation9_spill]] %s7913_s17  ;;  %s7850_s1 = smov 13  }
   0xb   :  { %8795 = sst [smem:[#allocation10_spill]] %s7918_s21  ;;  %s7851_s7 = smov 14  }
   0xc   :  { %8796 = sst [smem:[#allocation11_spill]] %s7923_s25  ;;  %s7853_s22 = smov 16  }
   0xd   :  { %s7928_s29 = sld [smem:[%s8777_s0 + %s7843_s26]]   ;;  %s7849_s26 = smov 12  }
   0xe   :  { %s7933_s3 = sld [smem:[%s8777_s0 + %s7844_s30]]   ;;  %s7854_s28 = smov 17  }
   0xf   :  { %s7938_s8 = sld [smem:[%s8777_s0 + %s7845_s4]]  }
  0x10   :  { %s7943_s14 = sld [smem:[%s8777_s0 + %s7846_s10]]  }
  0x11   :  { %s7948_s19 = sld [smem:[%s8777_s0 + %s7847_s15]]   ;;  %s7852_s15 = smov 15  }
  0x12   :  { %s7953_s24 = sld [smem:[%s8777_s0 + %s7848_s20]]  }
  0x13   :  { %8797 = sst [smem:[#allocation12_spill]] %s7928_s29 }
  0x14   :  { %8798 = sst [smem:[#allocation13_spill]] %s7933_s3 }
  0x15   :  { %8799 = sst [smem:[#allocation14_spill]] %s7938_s8 }
  0x16   :  { %8800 = sst [smem:[#allocation15_spill]] %s7943_s14 }
  0x17   :  { %8801 = sst [smem:[#allocation16_spill]] %s7948_s19 }
  0x18   :  { %8802 = sst [smem:[#allocation17_spill]] %s7953_s24 }
  0x19   :  { %s7958_s30 = sld [smem:[%s8777_s0 + %s7849_s26]]  }
  0x1a   :  { %s7963_s6 = sld [smem:[%s8777_s0 + %s7850_s1]]  }
  0x1b   :  { %s7968_s12 = sld [smem:[%s8777_s0 + %s7851_s7]]   ;;  %s7855_s7 = smov 18  }
  0x1c   :  { %s7973_s20 = sld [smem:[%s8777_s0 + %s7852_s15]]   ;;  %s7856_s15 = smov 19  }
  0x1d   :  { %s7978_s27 = sld [smem:[%s8777_s0 + %s7853_s22]]   ;;  %s7857_s22 = smov 20  }
  0x1e   :  { %s7983_s4 = sld [smem:[%s8777_s0 + %s7854_s28]]   ;;  %s7858_s28 = smov 21  }
  0x1f   :  { %8803 = sst [smem:[#allocation18_spill]] %s7958_s30 }
  0x20   :  { %8804 = sst [smem:[#allocation19_spill]] %s7963_s6 }
  0x21   :  { %8805 = sst [smem:[#allocation20_spill]] %s7968_s12 }
  0x22   :  { %8806 = sst [smem:[#allocation21_spill]] %s7973_s20 }
  0x23   :  { %8807 = sst [smem:[#allocation22_spill]] %s7978_s27 }
  0x24   :  { %8808 = sst [smem:[#allocation23_spill]] %s7983_s4 }
  0x25   :  { %s7988_s29 = sld [smem:[%s8777_s0 + %s7855_s7]]   ;;  %s7859_s7 = smov 22  }
  0x26   :  { %s7993_s21 = sld [smem:[%s8777_s0 + %s7856_s15]]   ;;  %s7860_s15 = smov 23  }
  0x27   :  { %s7998_s17 = sld [smem:[%s8777_s0 + %s7857_s22]]   ;;  %s7861_s22 = smov 24  }
  0x28   :  { %s8003_s25 = sld [smem:[%s8777_s0 + %s7858_s28]]   ;;  %s7862_s28 = smov 25  }
  0x29   :  { %s8008_s13 = sld [smem:[%s8777_s0 + %s7859_s7]]   ;;  %s7863_s7 = smov 26  }
  0x2a   :  { %s8013_s9 = sld [smem:[%s8777_s0 + %s7860_s15]]   ;;  %s7864_s15 = smov 27  }
  0x2b   :  { %8809 = sst [smem:[#allocation24_spill]] %s7988_s29 }
  0x2c   :  { %8810 = sst [smem:[#allocation25_spill]] %s7993_s21 }
  0x2d   :  { %s8018_s5 = sld [smem:[%s8777_s0 + %s7861_s22]]   ;;  %s7865_s22 = smov 28  }
  0x2e   :  { %8811 = sst [smem:[#allocation26_spill]] %s8003_s25 }
  0x2f   :  { %8812 = sst [smem:[#allocation27_spill]] %s8008_s13 }
  0x30   :  { %8813 = sst [smem:[#allocation28_spill]] %s8013_s9 }
  0x31   :  { %s8023_s25 = sld [smem:[%s8777_s0 + %s7862_s28]]   ;;  %s7866_s28 = smov 29  }
  0x32   :  { %s8028_s13 = sld [smem:[%s8777_s0 + %s7863_s7]]   ;;  %s7867_s7 = smov 30  }
  0x33   :  { %8814 = sst [smem:[#allocation29_spill]] %s8018_s5 }
  0x34   :  { %s8033_s9 = sld [smem:[%s8777_s0 + %s7864_s15]]   ;;  %s7868_s15 = smov 31  }
  0x35   :  { %s8038_s5 = sld [smem:[%s8777_s0 + %s7865_s22]]   ;;  %s7869_s22 = smov 32  }
  0x37   :  { %8815 = sst [smem:[#allocation30_spill]] %s8023_s25 }
  0x38   :  { %8816 = sst [smem:[#allocation31_spill]] %s8028_s13 }
  0x39   :  { %s8043_s25 = sld [smem:[%s8777_s0 + %s7866_s28]]   ;;  %s7870_s28 = smov 33  }
  0x3a   :  { %8817 = sst [smem:[#allocation32_spill]] %s8033_s9 }
  0x3b   :  { %8818 = sst [smem:[#allocation33_spill]] %s8038_s5 }
  0x3c   :  { %s8048_s13 = sld [smem:[%s8777_s0 + %s7867_s7]]   ;;  %s7871_s7 = smov 34  }
  0x3d   :  { %s8053_s9 = sld [smem:[%s8777_s0 + %s7868_s15]]  }
  0x3e   :  { %s8058_s5 = sld [smem:[%s8777_s0 + %s7869_s22]]  }
  0x3f   :  { %8819 = sst [smem:[#allocation34_spill]] %s8043_s25 }
  0x40   :  { %s8063_s25 = sld [smem:[%s8777_s0 + %s7870_s28]]  }
  0x42   :  { %8820 = sst [smem:[#allocation35_spill]] %s8048_s13 }
  0x43   :  { %s8068_s13 = sld [smem:[%s8777_s0 + %s7871_s7]]  }
  0x44   :  { %8821 = sst [smem:[#allocation36_spill]] %s8058_s5 }
  0x46   :  { %8822 = sst [smem:[#allocation37_spill]] %s8063_s25 }
  0x49   :  { %8823 = sst [smem:[#allocation38_spill]] %s8068_s13 }
  0x4a   :  { %74 = vsyncpa [#allocation4], 0  ;;  %s8070_s15 = smov 0  }
  0x4b LB: > { %8824 = sst [smem:[#allocation39_spill]] %s7836_s15  ;;  %s8076_s16 = sadd.s32 4294967295, %s7836_s15   ;;  %s7836_s15 = sphi %s8070_s15, %s80_s15  }
  0x4c   : > { %8825 = sst [smem:[#allocation40_spill]] %s8076_s16  ;;  %p6812_p0 = scmp.ge.s32.totalorder %s7836_s15, 1 }
  0x4d   : > { %p1169_p1 = scmp.lt.s32.totalorder %s7836_s15, 3 }
  0x4f   : > { %p1170_p2 = pnand %p6812_p0, %p1169_p1 }
  0x51   : > { %1173 = sbr.rel (%p1170_p2) target bundleno = 12933 (0x3285), region = 156 }
  0x58   : > { %s8831_s24 = sld [smem:[#allocation17_spill]]  ;;  %s8832_s30 = sld [smem:[#allocation18_spill]] }
  0x59   : > { %s8833_s6 = sld [smem:[#allocation19_spill]]  ;;  %s8836_s4 = sld [smem:[#allocation23_spill]] }
  0x5a   : > { %p1346_p3 = scmp.lt.s32.totalorder %s8076_s16, 1  ;;  %s8838_s21 = sld [smem:[#allocation25_spill]] }
  0x5b   : > { %s8839_s22 = sld [smem:[#allocation26_spill]]  ;;  %s8840_s26 = sld [smem:[#allocation27_spill]] }
  0x5c   : > { %s8082_s0 = scalar_select %p1346_p3, %s8076_s16, 1 }
  0x5d   : > { %s8841_s1 = sld [smem:[#allocation28_spill]]  ;;  %s8842_s7 = sld [smem:[#allocation29_spill]] }
  0x5e   : > { %s6937_s10 = sshll.u32 %s8082_s0, 5  ;;  %s8843_s11 = sld [smem:[#allocation30_spill]] }
  0x5f   : > { %s8844_s13 = sld [smem:[#allocation31_spill]]  ;;  %s8096_s16 = scalar_lea.vmem %s8831_s24, %s6937_s10 }
  0x60   : > { %8845 = sst [smem:[#allocation41_spill]] %s8096_s16  ;;  %s8846_s25 = sld [smem:[#allocation32_spill]] }
  0x61   : > { %s8099_s5 = scalar_lea.vmem %s8832_s30, %s6937_s10  ;;  %s8848_s23 = sld [smem:[#allocation33_spill]] }
  0x62   : > { %8847 = sst [smem:[#allocation42_spill]] %s8099_s5  ;;  %s8102_s18 = scalar_lea.vmem %s8833_s6, %s6937_s10 }
  0x63   : > { %8849 = sst [smem:[#allocation43_spill]] %s8102_s18  ;;  %s8850_s28 = sld [smem:[#allocation34_spill]] }
  0x64   : > { %s8851_s2 = sld [smem:[#allocation35_spill]]  ;;  %s8109_s8 = scalar_lea.vmem %s8836_s4, %s6937_s10 }
  0x65   : > { %8852 = sst [smem:[#allocation44_spill]] %s8109_s8  ;;  %s6941_s3 = sshll.u32 %s8082_s0, 7 }
  0x66   : > { %s8853_s15 = sld [smem:[#allocation36_spill]]  ;;  %s8115_s30 = scalar_lea.vmem %s8838_s21, %s6941_s3 }
  0x67   : > { %8855 = sst [smem:[#allocation45_spill]] %s8115_s30  ;;  %s8120_s16 = scalar_lea.vmem %s8839_s22, %s6937_s10 }
  0x68   : > { %s1405_s6 = scalar_lea.vmem %s8840_s26, %s8082_s0  ;;  %s1408_s18 = scalar_lea.vmem %s8841_s1, %s8082_s0 }
  0x69   : > { %s1411_s14 = scalar_lea.vmem %s8842_s7, %s8082_s0  ;;  %s8129_s20 = scalar_lea.vmem %s8843_s11, %s6937_s10 }
  0x6a   : > { %s8132_s19 = scalar_lea.vmem %s8844_s13, %s6937_s10  ;;  %s1424_s27 = scalar_lea.vmem %s8846_s25, %s8082_s0 }
  0x6b   : > { %s1427_s4 = scalar_lea.vmem %s8848_s23, %s8082_s0  ;;  %s1430_s8 = scalar_lea.vmem %s8850_s28, %s8082_s0 }
  0x6c   : > { %s8141_s24 = scalar_lea.vmem %s8851_s2, %s6937_s10  ;;  %s1438_s29 = scalar_lea.vmem %s8053_s9, %s8082_s0 }
  0x6d   : > { %s8146_s21 = scalar_lea.vmem %s8853_s15, %s6941_s3  ;;  %s8856_s5 = sld [smem:[#allocation40_spill]] }
  0x73   : > { %p6833_p4 = scmp.ne.s32.totalorder %s8856_s5, 0 }
  0x74   : > { %s8857_s22 = sld [smem:[#allocation6_spill]] (!%p6833_p4)  ;;  %vm1453_vm0 = vcmask (!%p6833_p4), 261120  }
  0x75   : > { %1450 = sbr.rel (%p6833_p4) target bundleno = 124 (0x7c), region = 160 }
  0x7a   : > { %v1451_v0 = vld [vmem:[%s8857_s22] sm:$0xff] (!%p6833_p4)  ;;  %v1452_v1 = vld [vmem:[%s8857_s22 + $0x8] sm:$0xff] (!%p6833_p4) }
  0x7b   : > { %1454 = vst.msk [vmem:[#allocation2] sm:$0xff] (!%p6833_p4), %vm1453_vm0, %v1451_v0  ;;  %1455 = vst.msk [vmem:[#allocation2 + $0x8] sm:$0xff] (!%p6833_p4), %vm1453_vm0, %v1452_v1 }
  0x7c PF: > { %s8858_s13 = sld [smem:[#allocation7_spill]]  ;;  %vm1464_vm1 = vcmask 261120   ;;  %s8859_s5 = sld [smem:[#allocation41_spill]]  ;;  %vm7873_vm2 = vmmov 0   ;;  %vm1726_vm3 = vcmask 64512   ;;  %vm4012_vm4 = vcmask 130048  }
  0x7d   : > { %s8860_s25 = sld [smem:[#allocation42_spill]]  ;;  %s8861_s3 = sld [smem:[#allocation13_spill]]  ;;  %vm4015_vm5 = vcmask 195584  }
  0x7e   : > { %s8862_s12 = sld [smem:[#allocation14_spill]]  ;;  %s8863_s15 = sld [smem:[#allocation15_spill]] }
  0x7f   : > { %s8864_s23 = sld [smem:[#allocation16_spill]]  ;;  %s7874_s10 = smov 120  }
  0x80   : > { %s8869_s7 = sld [smem:[#allocation8_spill]]  ;;  %s7875_s11 = smov 96  }
  0x82   : > { %v8153_v2 = vld [vmem:[#allocation2] sm:$0xff]  ;;  %v8156_v4 = vld [vmem:[#allocation2 + $0x8] sm:$0xff]  ;;  %v1554_v33 = vld [vmem:[%s8859_s5 + $0x10] sm:$0xff] }
  0x83   : > { %v1458_v3 = vld [vmem:[%s8858_s13] sm:$0xff]  ;;  %v1465_v5 = vsel %vm1464_vm1, %v8153_v2, 0.0  ;;  %v1459_v7 = vld [vmem:[%s8858_s13 + $0x8] sm:$0xff]  ;;  %v1468_v8 = vsel %vm1464_vm1, %v8156_v4, 0.0  ;;  %v1555_v34 = vld [vmem:[%s8859_s5 + $0x18] sm:$0xff]  ;;  %s8865_s26 = scalar_lea.vmem %s8861_s3, %s8082_s0  ;;  %s7877_s3 = smov 88  }
  0x84   : > { %v1510_v6 = vsel %vm1464_vm1, %v1458_v3, 0.0  ;;  %1466 = vadd.xlane.f32.xlu0 %v1465_v5  ;;  %v1513_v9 = vsel %vm1464_vm1, %v1459_v7, 0.0  ;;  %v1552_v30 = vld [vmem:[%s8859_s5] sm:$0xff]  ;;  %v1553_v31 = vld [vmem:[%s8859_s5 + $0x8] sm:$0xff]  ;;  %v7512_v35 = vpack.c.bf16 %v1555_v34, %v1554_v33  ;;  %s8866_s28 = scalar_lea.vmem %s8862_s12, %s8082_s0  ;;  %s8867_s1 = scalar_lea.vmem %s8863_s15, %s8082_s0  ;;  %v1639_v62 = vld [vmem:[%s8860_s25 + $0x10] sm:$0xff] }
  0x85   : > { %1511 = vadd.xlane.f32.xlu1 %v1510_v6  ;;  %v7508_v32 = vpack.c.bf16 %v1553_v31, %v1552_v30  ;;  %v1637_v36 = vld [vmem:[%s8860_s25] sm:$0xff]  ;;  %v1638_v37 = vld [vmem:[%s8860_s25 + $0x8] sm:$0xff]  ;;  %v1640_v63 = vld [vmem:[%s8860_s25 + $0x18] sm:$0xff]  ;;  %s8868_s2 = scalar_lea.vmem %s8864_s23, %s8082_s0  ;;  %s8870_s5 = sld [smem:[#allocation43_spill]] }
  0x86   : > { %v7516_v38 = vpack.c.bf16 %v1638_v37, %v1637_v36  ;;  %v6834_v52 = vld [vmem:[%s8865_s26] ss:$0 sm:$0xff]  ;;  %s7876_s25 = smov 112   ;;  %s7878_s12 = smov 80  }
  0x87   : > { %7509 = vmatprep.subr.bf16.mxu0 %v7508_v32  ;;  %v6835_v54 = vld [vmem:[%s8866_s28] ss:$0 sm:$0xff]  ;;  %s7879_s15 = smov 104   ;;  %s7880_s23 = smov 72  }
  0x88   : > { %1469 = vadd.xlane.f32.xlu0 %v1468_v8  ;;  %7511 = vmatpush3.bf16.msra.mxu0 %v7508_v32  ;;  %v6836_v60 = vld [vmem:[%s8867_s1] ss:$0 sm:$0xff]  ;;  %v7520_v8 = vpack.c.bf16 %v1640_v63, %v1639_v62  ;;  %s8871_s26 = sld [smem:[#allocation20_spill]]  ;;  %s8873_s1 = sld [smem:[#allocation21_spill]] }
  0x89   : > { %1514 = vadd.xlane.f32.xlu1 %v1513_v9  ;;  %7513 = vmatprep.subr.bf16.mxu0 %v7512_v35  ;;  %v6837_v1 = vld [vmem:[%s8868_s2] ss:$0 sm:$0xff]  ;;  %s8874_s2 = sld [smem:[#allocation22_spill]] }
  0x8c   : > { %7515 = vmatpush3.bf16.msra.mxu0 %v7512_v35 }
  0x8d   : > { %7517 = vmatprep.subr.bf16.mxu0 %v7516_v38 }
  0x8e   : > { %s8872_s28 = scalar_lea.vmem %s8871_s26, %s8082_s0  ;;  %s8876_s26 = scalar_lea.vmem %s8873_s1, %s8082_s0 }
  0x8f   : > { %s8878_s30 = scalar_lea.vmem %s8874_s2, %s8082_s0 }
 0x111   : > { %v1467_v10 = vpop.xlane.xlu0 %1466 }
 0x112   : > { %v1512_v11 = vpop.xlane.xlu1 %1511  ;;  %v1472_v12 = vmul.f32 0.03125, %v1467_v10 }
 0x113   : > { %v1516_v13 = vmul.f32 0.03125, %v1512_v11 }
 0x114   : > { %v1474_v14 = vsub.f32 %v8153_v2, %v1472_v12  ;;  %v7872_v12 = vmov 0.0  }
 0x115   : > { %v1518_v15 = vsub.f32 %v1458_v3, %v1516_v13  ;;  %v1470_v16 = vpop.xlane.xlu0 %1469  ;;  %7158 = vmatprep.subr.mxu1 %v7872_v12  ;;  %7160 = vmatprep.mubr.msk.f32.mxu1 %vm7873_vm2, %v7872_v12 }
 0x116   : > { %v1515_v17 = vpop.xlane.xlu1 %1514  ;;  %v1473_v18 = vmul.f32 0.03125, %v1470_v16  ;;  %v1476_v20 = vmul.f32 %v1474_v14, %v1474_v14 }
 0x117   : > { %v1517_v19 = vmul.f32 0.03125, %v1515_v17  ;;  %v1520_v21 = vmul.f32 %v1518_v15, %v1518_v15  ;;  %v8219_v17 = vld [vmem:[%s8869_s7] sm:$0xff] }
 0x118   : > { %v1475_v22 = vsub.f32 %v8156_v4, %v1473_v18  ;;  %v1478_v24 = vsel %vm1464_vm1, %v1476_v20, 0.0 }
 0x119   : > { %v1519_v23 = vsub.f32 %v1459_v7, %v1517_v19  ;;  %1479 = vadd.xlane.f32.xlu0 %v1478_v24  ;;  %v1522_v25 = vsel %vm1464_vm1, %v1520_v21, 0.0 }
 0x11a   : > { %v1477_v26 = vmul.f32 %v1475_v22, %v1475_v22 }
 0x11b   : > { %v1521_v27 = vmul.f32 %v1519_v23, %v1519_v23 }
 0x11c   : > { %v1481_v28 = vsel %vm1464_vm1, %v1477_v26, 0.0 }
 0x11d   : > { %1523 = vadd.xlane.f32.xlu0 %v1522_v25  ;;  %1482 = vadd.xlane.f32.xlu1 %v1481_v28  ;;  %v1525_v29 = vsel %vm1464_vm1, %v1521_v27, 0.0 }
 0x121   : > { %1526 = vadd.xlane.f32.xlu1 %v1525_v29 }
 0x1a6   : > { %v1480_v39 = vpop.xlane.xlu0 %1479 }
 0x1a7   : > { %v1484_v40 = vmul.f32 0.03125, %v1480_v39 }
 0x1a9   : > { %v1486_v41 = vadd.f32 1e-05, %v1484_v40 }
 0x1aa   : > { %v1483_v42 = vpop.xlane.xlu1 %1482  ;;  %v1524_v43 = vpop.xlane.xlu0 %1523 }
 0x1ab   : > { %7694 = vrsqrt.f32 %v1486_v41  ;;  %v1485_v44 = vmul.f32 0.03125, %v1483_v42  ;;  %v1528_v45 = vmul.f32 0.03125, %v1524_v43 }
 0x1ad   : > { %v1487_v46 = vadd.f32 1e-05, %v1485_v44  ;;  %v1530_v47 = vadd.f32 1e-05, %v1528_v45  ;;  %v8247_v44 = vld [vmem:[%s8870_s5 + $0x8] sm:$0xff] }
 0x1ae   : > { %v1527_v48 = vpop.xlane.xlu1 %1526 }
 0x1af   : > { %7696 = vrsqrt.f32 %v1487_v46  ;;  %v1529_v49 = vmul.f32 0.03125, %v1527_v48 }
 0x1b0   : > { %7698 = vrsqrt.f32 %v1530_v47 }
 0x1b1   : > { %v1531_v50 = vadd.f32 1e-05, %v1529_v49  ;;  %v8253_v49 = vld [vmem:[%s8870_s5] sm:$0xff] }
 0x1b3   : > { %7700 = vrsqrt.f32 %v1531_v50 }
 0x1b5   : > { %v7695_v51 = vpop.eup %7694 }
 0x1b6   : > { %v1490_v53 = vmul.f32 %v7695_v51, %v1474_v14 }
 0x1b8   : > { %v1498_v55 = vmul.f32 %v6834_v52, %v1490_v53 }
 0x1b9   : > { %v7697_v56 = vpop.eup %7696 }
 0x1ba   : > { %v7699_v57 = vpop.eup %7698  ;;  %v1491_v58 = vmul.f32 %v7697_v56, %v1475_v22  ;;  %v1506_v59 = vadd.f32 %v6835_v54, %v1498_v55 }
 0x1bb   : > { %v1534_v61 = vmul.f32 %v7699_v57, %v1518_v15 }
 0x1bc   : > { %v1499_v0 = vmul.f32 %v6834_v52, %v1491_v58  ;;  %7129 = vmatprep.mubr.msk.f32.mxu0 %vm1464_vm1, %v1506_v59 }
 0x1bd   : > { %v7701_v3 = vpop.eup %7700  ;;  %v1542_v5 = vmul.f32 %v6836_v60, %v1534_v61 }
 0x1be   : > { %v1535_v6 = vmul.f32 %v7701_v3, %v1519_v23  ;;  %v1507_v7 = vadd.f32 %v6835_v54, %v1499_v0 }
 0x1bf   : > { %v1550_v9 = vadd.f32 %v6837_v1, %v1542_v5 }
 0x1c0   : > { %7130 = vmatmul.mubr.msk.f32.vlgmr.msra.gmra.mrb[0].mxu0 %vm1464_vm1, %v1507_v7  ;;  %v1543_v10 = vmul.f32 %v6836_v60, %v1535_v6 }
 0x1c1   : > { %7519 = vmatpush3.bf16.msra.mxu0 %v7516_v38  ;;  %7140 = vmatprep.mubr.msk.f32.mxu0 %vm1464_vm1, %v1550_v9 }
 0x1c2   : > { %7521 = vmatprep.subr.bf16.mxu0 %v7520_v8  ;;  %v1551_v11 = vadd.f32 %v6837_v1, %v1543_v10 }
 0x1c5   : > { %7523 = vmatpush3.bf16.msra.mxu0 %v7520_v8 }
 0x1c6   : > { %7143 = vmatprep.subr.mxu0 %v7872_v12 }
 0x1c8   : > { %7141 = vmatmul.mubr.msk.f32.vlgmr.msra.gmra.mrb[2].mxu0 %vm1464_vm1, %v1551_v11 }
 0x1c9   : > { %7145 = vmatprep.mubr.msk.f32.mxu0 %vm7873_vm2, %v7872_v12 }
 0x293   : > { %v8201_v13 = vpop.f32.mrb[0].mxu0 }
 0x294   : > { %v8203_v14 = vpop.f32.mrb[1].mxu0 }
 0x29b   : > { %v8205_v15 = vpop.f32.mrb[2].mxu0 }
 0x29c   : > { %v8207_v16 = vpop.f32.mrb[3].mxu0 }
 0x29d   : > { %1892 = vrot.lane.b32.xlu1 %v8207_v16, %s7874_s10  ;;  %7144 = vmatpush3.xpose.msk.msra.mxu0 %vm1726_vm3, %v8207_v16 }
 0x29e   : > { %7148 = vmatprep.subr.mxu0 %v7872_v12 }
 0x2a0   : > { %7146 = vmatmul.mubr.msk.f32.vlgmr.msra.gmra.mrb[4].mxu0 %vm1726_vm3, %v8203_v14 }
 0x2a1   : > { %7150 = vmatprep.mubr.msk.f32.mxu0 %vm7873_vm2, %v7872_v12 }
 0x30f   : > { %v1893_v28 = vpop.permute.xlu1 %1892 }
 0x373   : > { %v1799_v18 = vpop.f32.mrb[4].mxu0 }
 0x374   : > { %v1800_v19 = vadd.f32 %v1799_v18, %v8219_v17  ;;  %v7147_v20 = vpop.f32.mrb[5].mxu0 }
 0x376   : > { %v1803_v21 = vsel %vm1726_vm3, %v1800_v19, -inf }
 0x377   : > { %1804 = vmax.xlane.f32.xlu0 %v1803_v21 }
 0x38d   : > { %1814 = vrot.lane.b32.xlu0 %v8207_v16, %s7875_s11 }
 0x404   : > { %v1805_v22 = vpop.xlane.xlu0 %1804 }
 0x405   : > { %v1806_v23 = vsub.f32 %v1800_v19, %v1805_v22 }
 0x407   : > { %v1807_v24 = vmul.f32 1.442695, %v1806_v23 }
 0x408   : > { %v1815_v25 = vpop.permute.xlu0 %1814 }
 0x409   : > { %7702 = vpow2.f32 %v1807_v24  ;;  %7149 = vmatpush3.msra.mxu0 %v1815_v25 }
 0x40a   : > { %7153 = vmatprep.subr.mxu0 %v7872_v12 }
 0x413   : > { %v7703_v26 = vpop.eup %7702 }
 0x414   : > { %v1809_v27 = vsel %vm1726_vm3, %v7703_v26, 0.0 }
 0x415   : > { %1810 = vadd.xlane.f32.xlu1 %v1809_v27 }
 0x426   : > { %1890 = vrot.lane.b32.xlu1 %v8203_v14, %s7874_s10 }
 0x4a2   : > { %v1811_v29 = vpop.xlane.xlu1 %1810 }
 0x4a3   : > { %7704 = vrcp.f32 %v1811_v29 }
 0x4a6   : > { %v1891_v32 = vpop.permute.xlu1 %1890 }
 0x4ad   : > { %v7705_v30 = vpop.eup %7704 }
 0x4ae   : > { %v1813_v31 = vmul.f32 %v7705_v30, %v7703_v26 }
 0x4b0   : > { %7151 = vmatmul.mubr.msk.f32.vlgmr.msra.gmra.mrb[6].mxu0 %vm1726_vm3, %v1813_v31 }
 0x4b1   : > { %7154 = vmatpush3.xpose.msk.msra.mxu0 %vm1726_vm3, %v1893_v28  ;;  %7155 = vmatprep.mubr.msk.f32.mxu0 %vm7873_vm2, %v7872_v12 }
 0x4b2   : > { %7163 = vmatprep.subr.mxu0 %v7872_v12 }
 0x4b4   : > { %7156 = vmatmul.mubr.msk.f32.vlgmr.msra.gmra.mrb[8].mxu0 %vm1726_vm3, %v1891_v32 }
 0x4b5   : > { %7165 = vmatprep.mubr.msk.f32.mxu0 %vm7873_vm2, %v7872_v12  ;;  %7164 = vmatpush3.msra.mxu0 %v8247_v44 }
 0x4b6   : > { %7173 = vmatprep.subr.mxu0 %v7872_v12 }
 0x583   : > { %v1886_v33 = vpop.f32.mrb[6].mxu0 }
 0x584   : > { %v7152_v34 = vpop.f32.mrb[7].mxu0 }
 0x587   : > { %v1964_v35 = vpop.f32.mrb[8].mxu0 }
 0x588   : > { %v1965_v36 = vadd.f32 %v1964_v35, %v8219_v17  ;;  %v7157_v37 = vpop.f32.mrb[9].mxu0 }
 0x58a   : > { %v1968_v38 = vsel %vm1726_vm3, %v1965_v36, -inf }
 0x58b   : > { %1969 = vmax.xlane.f32.xlu1 %v1968_v38 }
 0x59c   : > { %2203 = vrot.lane.b32.xlu1 %v8207_v16, %s7876_s25 }
 0x5a0   : > { %2201 = vrot.lane.b32.xlu1 %v8203_v14, %s7876_s25 }
 0x618   : > { %v1970_v39 = vpop.xlane.xlu1 %1969 }
 0x619   : > { %v1971_v40 = vsub.f32 %v1965_v36, %v1970_v39  ;;  %v8325_v36 = vld [vmem:[%s8870_s5 + $0x18] sm:$0xff]  ;;  %v8331_v39 = vld [vmem:[%s8869_s7 + $0x8] sm:$0xff] }
 0x61b   : > { %v1972_v41 = vmul.f32 1.442695, %v1971_v40 }
 0x61c   : > { %v2204_v50 = vpop.permute.xlu1 %2203 }
 0x61d   : > { %7706 = vpow2.f32 %v1972_v41 }
 0x620   : > { %v2202_v53 = vpop.permute.xlu1 %2201 }
 0x627   : > { %v7707_v42 = vpop.eup %7706 }
 0x628   : > { %v1974_v43 = vsel %vm1726_vm3, %v7707_v42, 0.0 }
 0x629   : > { %1975 = vadd.xlane.f32.xlu0 %v1974_v43 }
 0x63f   : > { %1979 = vrot.lane.b32.xlu0 %v8207_v16, %s7877_s3 }
 0x6b6   : > { %v1976_v45 = vpop.xlane.xlu0 %1975 }
 0x6b7   : > { %7708 = vrcp.f32 %v1976_v45 }
 0x6ba   : > { %v1980_v46 = vpop.permute.xlu0 %1979 }
 0x6bb   : > { %7159 = vmatpush3.msra.mxu1 %v1980_v46 }
 0x6bc   : > { %7168 = vmatprep.subr.mxu1 %v7872_v12 }
 0x6c1   : > { %v7709_v47 = vpop.eup %7708 }
 0x6c2   : > { %v1978_v48 = vmul.f32 %v7709_v47, %v7707_v42 }
 0x6c4   : > { %7161 = vmatmul.mubr.msk.f32.vlgmr.msra.gmra.mrb[0].mxu1 %vm1726_vm3, %v1978_v48 }
 0x6c5   : > { %7169 = vmatpush3.msra.mxu1 %v8253_v49  ;;  %7170 = vmatprep.mubr.msk.f32.mxu1 %vm7873_vm2, %v7872_v12 }
 0x6c6   : > { %7178 = vmatprep.subr.mxu1 %v7872_v12 }
 0x6c8   : > { %7171 = vmatmul.mubr.msk.f32.vlgmr.msra.gmra.mrb[2].mxu1 %vm1726_vm3, %v1886_v33 }
 0x6c9   : > { %7180 = vmatprep.mubr.msk.f32.mxu1 %vm7873_vm2, %v7872_v12 }
 0x797   : > { %v2051_v51 = vpop.f32.mrb[0].mxu1 }
 0x798   : > { %v7162_v52 = vpop.f32.mrb[1].mxu1  ;;  %7166 = vmatmul.mubr.msk.f32.vlgmr.msra.gmra.mrb[10].mxu0 %vm1726_vm3, %v2051_v51 }
 0x799   : > { %7174 = vmatpush3.xpose.msk.msra.mxu0 %vm1726_vm3, %v2204_v50  ;;  %7175 = vmatprep.mubr.msk.f32.mxu0 %vm7873_vm2, %v7872_v12 }
 0x79a   : > { %7183 = vmatprep.subr.mxu0 %v7872_v12 }
 0x79b   : > { %v2197_v54 = vpop.f32.mrb[2].mxu1 }
 0x79c   : > { %v7172_v55 = vpop.f32.mrb[3].mxu1  ;;  %7176 = vmatmul.mubr.msk.f32.vlgmr.msra.gmra.mrb[12].mxu0 %vm1726_vm3, %v2202_v53 }
 0x79d   : > { %7185 = vmatprep.mubr.msk.f32.mxu0 %vm7873_vm2, %v7872_v12 }
 0x86b   : > { %v2124_v56 = vpop.f32.mrb[10].mxu0 }
 0x86c   : > { %v2198_v57 = vadd.f32 %v2197_v54, %v2124_v56  ;;  %v7167_v58 = vpop.f32.mrb[11].mxu0 }
 0x86f   : > { %v2275_v59 = vpop.f32.mrb[12].mxu0 }
 0x870   : > { %v2276_v60 = vadd.f32 %v2275_v59, %v8219_v17  ;;  %v7177_v61 = vpop.f32.mrb[13].mxu0 }
 0x872   : > { %v2279_v62 = vsel %vm1726_vm3, %v2276_v60, -inf }
 0x873   : > { %2280 = vmax.xlane.f32.xlu0 %v2279_v62 }
 0x889   : > { %2290 = vrot.lane.b32.xlu0 %v8207_v16, %s7878_s12 }
 0x88d   : > { %2440 = vrot.lane.b32.xlu0 %v8203_v14, %s7879_s15  ;;  %v8290_v14 = vld [vmem:[%s8870_s5 + $0x10] sm:$0xff]  ;;  %s8875_s5 = sld [smem:[#allocation44_spill]] }
 0x88e   : > { %7184 = vmatpush3.msra.mxu0 %v8290_v14 }
 0x88f   : > { %7193 = vmatprep.subr.mxu0 %v7872_v12 }
 0x900   : > { %v2281_v63 = vpop.xlane.xlu0 %2280 }
 0x901   : > { %v2282_v0 = vsub.f32 %v2276_v60, %v2281_v63 }
 0x903   : > { %v2283_v1 = vmul.f32 1.442695, %v2282_v0 }
 0x904   : > { %v2291_v3 = vpop.permute.xlu0 %2290 }
 0x905   : > { %7710 = vpow2.f32 %v2283_v1  ;;  %7179 = vmatpush3.msra.mxu1 %v2291_v3 }
 0x906   : > { %7188 = vmatprep.subr.mxu1 %v7872_v12 }
 0x908   : > { %v2441_v11 = vpop.permute.xlu0 %2440 }
 0x90f   : > { %v7711_v5 = vpop.eup %7710 }
 0x910   : > { %v2285_v6 = vsel %vm1726_vm3, %v7711_v5, 0.0 }
 0x911   : > { %2286 = vadd.xlane.f32.xlu1 %v2285_v6 }
 0x922   : > { %2442 = vrot.lane.b32.xlu1 %v8207_v16, %s7879_s15 }
 0x99e   : > { %v2287_v7 = vpop.xlane.xlu1 %2286 }
 0x99f   : > { %7712 = vrcp.f32 %v2287_v7 }
 0x9a2   : > { %v2443_v10 = vpop.permute.xlu1 %2442 }
 0x9a9   : > { %v7713_v8 = vpop.eup %7712 }
 0x9aa   : > { %v2289_v9 = vmul.f32 %v7713_v8, %v7711_v5 }
 0x9ac   : > { %7181 = vmatmul.mubr.msk.f32.vlgmr.msra.gmra.mrb[4].mxu1 %vm1726_vm3, %v2289_v9 }
 0x9ad   : > { %7189 = vmatpush3.xpose.msk.msra.mxu1 %vm1726_vm3, %v2443_v10  ;;  %7190 = vmatprep.mubr.msk.f32.mxu1 %vm7873_vm2, %v7872_v12 }
 0x9ae   : > { %7198 = vmatprep.subr.mxu1 %v7872_v12 }
 0x9b0   : > { %7191 = vmatmul.mubr.msk.f32.vlgmr.msra.gmra.mrb[6].mxu1 %vm1726_vm3, %v2441_v11 }
 0x9b1   : > { %7200 = vmatprep.mubr.msk.f32.mxu1 %vm7873_vm2, %v7872_v12  ;;  %7199 = vmatpush3.msra.mxu1 %v8325_v36 }
 0x9b2   : > { %7208 = vmatprep.subr.mxu1 %v7872_v12 }
 0xa7f   : > { %v2362_v18 = vpop.f32.mrb[4].mxu1 }
 0xa80   : > { %v7182_v19 = vpop.f32.mrb[5].mxu1  ;;  %7186 = vmatmul.mubr.msk.f32.vlgmr.msra.gmra.mrb[14].mxu0 %vm1726_vm3, %v2362_v18 }
 0xa81   : > { %7195 = vmatprep.mubr.msk.f32.mxu0 %vm7873_vm2, %v7872_v12 }
 0xa83   : > { %v2514_v20 = vpop.f32.mrb[6].mxu1 }
 0xa84   : > { %v2515_v21 = vadd.f32 %v2514_v20, %v8219_v17  ;;  %v7192_v22 = vpop.f32.mrb[7].mxu1 }
 0xa86   : > { %v2518_v23 = vsel %vm1726_vm3, %v2515_v21, -inf }
 0xa87   : > { %2519 = vmax.xlane.f32.xlu1 %v2518_v23 }
 0xa98   : > { %2844 = vrot.lane.b32.xlu1 %v8205_v15, %s7874_s10 }
 0xa9c   : > { %2842 = vrot.lane.b32.xlu1 %v8201_v13, %s7874_s10 }
 0xb14   : > { %v2520_v24 = vpop.xlane.xlu1 %2519 }
 0xb15   : > { %v2521_v25 = vsub.f32 %v2515_v21, %v2520_v24 }
 0xb17   : > { %v2522_v26 = vmul.f32 1.442695, %v2521_v25 }
 0xb18   : > { %v2845_v35 = vpop.permute.xlu1 %2844 }
 0xb19   : > { %7714 = vpow2.f32 %v2522_v26 }
 0xb23   : > { %v7715_v27 = vpop.eup %7714 }
 0xb24   : > { %v2524_v28 = vsel %vm1726_vm3, %v7715_v27, 0.0 }
 0xb25   : > { %2525 = vadd.xlane.f32.xlu0 %v2524_v28 }
 0xb3b   : > { %2529 = vrot.lane.b32.xlu0 %v8207_v16, %s7880_s23  ;;  %v2843_v16 = vpop.permute.xlu1 %2842 }
 0xb53   : > { %v2435_v17 = vpop.f32.mrb[14].mxu0 }
 0xb54   : > { %v2439_v29 = vadd.f32 %v2435_v17, %v2198_v57  ;;  %v7187_v30 = vpop.f32.mrb[15].mxu0 }
 0xbb2   : > { %v2526_v31 = vpop.xlane.xlu0 %2525 }
 0xbb3   : > { %7716 = vrcp.f32 %v2526_v31 }
 0xbb6   : > { %v2530_v32 = vpop.permute.xlu0 %2529 }
 0xbb7   : > { %7194 = vmatpush3.msra.mxu0 %v2530_v32 }
 0xbb8   : > { %7203 = vmatprep.subr.mxu0 %v7872_v12 }
 0xbbd   : > { %v7717_v33 = vpop.eup %7716 }
 0xbbe   : > { %v2528_v34 = vmul.f32 %v7717_v33, %v7715_v27 }
 0xbc0   : > { %7196 = vmatmul.mubr.msk.f32.vlgmr.msra.gmra.mrb[16].mxu0 %vm1726_vm3, %v2528_v34 }
 0xbc1   : > { %7204 = vmatpush3.xpose.msk.msra.mxu0 %vm1726_vm3, %v8205_v15  ;;  %7205 = vmatprep.mubr.msk.f32.mxu0 %vm7873_vm2, %v7872_v12 }
 0xbc2   : > { %7213 = vmatprep.subr.mxu0 %v7872_v12 }
 0xbc4   : > { %7206 = vmatmul.mubr.msk.f32.vlgmr.msra.gmra.mrb[18].mxu0 %vm1726_vm3, %v8201_v13 }
 0xbc5   : > { %7214 = vmatpush3.xpose.msk.msra.mxu0 %vm1726_vm3, %v2845_v35  ;;  %7215 = vmatprep.mubr.msk.f32.mxu0 %vm7873_vm2, %v7872_v12 }
 0xbc6   : > { %7223 = vmatprep.subr.mxu0 %v7872_v12 }
 0xbc8   : > { %7216 = vmatmul.mubr.msk.f32.vlgmr.msra.gmra.mrb[20].mxu0 %vm1726_vm3, %v2843_v16  ;;  %v6874_v16 = vld [vmem:[%s8872_s28] ss:$0 sm:$0xff]  ;;  %s8877_s28 = sld [smem:[#allocation45_spill]] }
 0xbc9   : > { %7224 = vmatpush3.msra.mxu0 %v8247_v44  ;;  %7225 = vmatprep.mubr.msk.f32.mxu0 %vm7873_vm2, %v7872_v12 }
 0xbca   : > { %7233 = vmatprep.subr.mxu0 %v7872_v12 }
 0xc93   : > { %v2601_v37 = vpop.f32.mrb[16].mxu0 }
 0xc94   : > { %v7197_v38 = vpop.f32.mrb[17].mxu0  ;;  %7201 = vmatmul.mubr.msk.f32.vlgmr.msra.gmra.mrb[8].mxu1 %vm1726_vm3, %v2601_v37 }
 0xc95   : > { %7210 = vmatprep.mubr.msk.f32.mxu1 %vm7873_vm2, %v7872_v12 }
 0xc97   : > { %v2751_v40 = vpop.f32.mrb[18].mxu0 }
 0xc98   : > { %v2752_v41 = vadd.f32 %v2751_v40, %v8331_v39  ;;  %v7207_v42 = vpop.f32.mrb[19].mxu0 }
 0xc9a   : > { %v2755_v43 = vsel %vm1726_vm3, %v2752_v41, -inf }
 0xc9b   : > { %2756 = vmax.xlane.f32.xlu0 %v2755_v43  ;;  %v2916_v44 = vpop.f32.mrb[20].mxu0 }
 0xc9c   : > { %v2917_v45 = vadd.f32 %v2916_v44, %v8331_v39  ;;  %v7217_v46 = vpop.f32.mrb[21].mxu0 }
 0xc9e   : > { %v2920_v47 = vsel %vm1726_vm3, %v2917_v45, -inf }
 0xc9f   : > { %2921 = vmax.xlane.f32.xlu1 %v2920_v47 }
 0xcb0   : > { %2931 = vrot.lane.b32.xlu1 %v8205_v15, %s7877_s3 }
 0xcb4   : > { %3155 = vrot.lane.b32.xlu1 %v8205_v15, %s7876_s25 }
 0xcb8   : > { %3153 = vrot.lane.b32.xlu1 %v8201_v13, %s7876_s25 }
 0xd28   : > { %v2757_v48 = vpop.xlane.xlu0 %2756 }
 0xd29   : > { %v2758_v50 = vsub.f32 %v2752_v41, %v2757_v48 }
 0xd2b   : > { %v2759_v51 = vmul.f32 1.442695, %v2758_v50 }
 0xd2c   : > { %v2922_v52 = vpop.xlane.xlu1 %2921 }
 0xd2d   : > { %7718 = vpow2.f32 %v2759_v51  ;;  %v2923_v53 = vsub.f32 %v2917_v45, %v2922_v52 }
 0xd2f   : > { %v2924_v54 = vmul.f32 1.442695, %v2923_v53 }
 0xd30   : > { %v2932_v5 = vpop.permute.xlu1 %2931 }
 0xd31   : > { %7720 = vpow2.f32 %v2924_v54 }
 0xd34   : > { %v3156_v10 = vpop.permute.xlu1 %3155 }
 0xd37   : > { %v7719_v55 = vpop.eup %7718 }
 0xd38   : > { %v2761_v56 = vsel %vm1726_vm3, %v7719_v55, 0.0 }
 0xd39   : > { %2762 = vadd.xlane.f32.xlu0 %v2761_v56 }
 0xd3b   : > { %v7721_v57 = vpop.eup %7720 }
 0xd3c   : > { %v2926_v58 = vsel %vm1726_vm3, %v7721_v57, 0.0 }
 0xd3d   : > { %2927 = vadd.xlane.f32.xlu0 %v2926_v58 }
 0xd53   : > { %2766 = vrot.lane.b32.xlu0 %v8205_v15, %s7875_s11 }
 0xd67   : > { %v2674_v59 = vpop.f32.mrb[8].mxu1 }
 0xd68   : > { %v8349_v60 = vadd.f32 %v2674_v59, %v2439_v29  ;;  %v7202_v61 = vpop.f32.mrb[9].mxu1 }
 0xd6a   : > { %v3638_v40 = vadd.f32 %v6874_v16, %v8349_v60 }
 0xdc6   : > { %v2763_v62 = vpop.xlane.xlu0 %2762 }
 0xdc7   : > { %7722 = vrcp.f32 %v2763_v62 }
 0xdca   : > { %v2928_v63 = vpop.xlane.xlu0 %2927 }
 0xdcb   : > { %7724 = vrcp.f32 %v2928_v63 }
 0xdce   : > { %v2767_v0 = vpop.permute.xlu0 %2766 }
 0xdcf   : > { %7209 = vmatpush3.msra.mxu1 %v2767_v0 }
 0xdd0   : > { %7218 = vmatprep.subr.mxu1 %v7872_v12 }
 0xdd1   : > { %v7723_v1 = vpop.eup %7722 }
 0xdd2   : > { %v2765_v3 = vmul.f32 %v7723_v1, %v7719_v55 }
 0xdd4   : > { %7211 = vmatmul.mubr.msk.f32.vlgmr.msra.gmra.mrb[10].mxu1 %vm1726_vm3, %v2765_v3 }
 0xdd5   : > { %v7725_v6 = vpop.eup %7724  ;;  %7219 = vmatpush3.msra.mxu1 %v2932_v5  ;;  %7220 = vmatprep.mubr.msk.f32.mxu1 %vm7873_vm2, %v7872_v12 }
 0xdd6   : > { %v2930_v7 = vmul.f32 %v7725_v6, %v7721_v57  ;;  %7228 = vmatprep.subr.mxu1 %v7872_v12 }
 0xdd8   : > { %7221 = vmatmul.mubr.msk.f32.vlgmr.msra.gmra.mrb[12].mxu1 %vm1726_vm3, %v2930_v7 }
 0xdd9   : > { %7229 = vmatpush3.msra.mxu1 %v8253_v49  ;;  %7230 = vmatprep.mubr.msk.f32.mxu1 %vm7873_vm2, %v7872_v12  ;;  %v3154_v49 = vpop.permute.xlu1 %3153 }
 0xdda   : > { %7238 = vmatprep.subr.mxu1 %v7872_v12 }
 0xea7   : > { %v2838_v8 = vpop.f32.mrb[10].mxu1 }
 0xea8   : > { %v7212_v9 = vpop.f32.mrb[11].mxu1  ;;  %7231 = vmatmul.mubr.msk.f32.vlgmr.msra.gmra.mrb[14].mxu1 %vm1726_vm3, %v2838_v8 }
 0xea9   : > { %7240 = vmatprep.mubr.msk.f32.mxu1 %vm7873_vm2, %v7872_v12 }
 0xeab   : > { %v3003_v11 = vpop.f32.mrb[12].mxu1 }
 0xeac   : > { %v7222_v18 = vpop.f32.mrb[13].mxu1  ;;  %7226 = vmatmul.mubr.msk.f32.vlgmr.msra.gmra.mrb[22].mxu0 %vm1726_vm3, %v3003_v11 }
 0xead   : > { %7234 = vmatpush3.xpose.msk.msra.mxu0 %vm1726_vm3, %v3156_v10  ;;  %7235 = vmatprep.mubr.msk.f32.mxu0 %vm7873_vm2, %v7872_v12 }
 0xeae   : > { %7243 = vmatprep.subr.mxu0 %v7872_v12 }
 0xeb0   : > { %7236 = vmatmul.mubr.msk.f32.vlgmr.msra.gmra.mrb[24].mxu0 %vm1726_vm3, %v3154_v49 }
 0xeb1   : > { %7244 = vmatpush3.msra.mxu0 %v8290_v14  ;;  %7245 = vmatprep.mubr.msk.f32.mxu0 %vm7873_vm2, %v7872_v12 }
 0xeb2   : > { %7253 = vmatprep.subr.mxu0 %v7872_v12 }
 0xf7b   : > { %v3149_v19 = vpop.f32.mrb[14].mxu1 }
 0xf7c   : > { %v7232_v20 = vpop.f32.mrb[15].mxu1 }
 0xf7d   : > { %v6875_v20 = vld [vmem:[%s8876_s26] ss:$0 sm:$0xff]  ;;  %s7883_s26 = smov 24  }
 0xf7f   : > { %v3076_v21 = vpop.f32.mrb[22].mxu0 }
 0xf80   : > { %v3150_v22 = vadd.f32 %v3149_v19, %v3076_v21  ;;  %v7227_v23 = vpop.f32.mrb[23].mxu0 }
 0xf83   : > { %v3227_v24 = vpop.f32.mrb[24].mxu0 }
 0xf84   : > { %v3228_v25 = vadd.f32 %v3227_v24, %v8331_v39  ;;  %v7237_v26 = vpop.f32.mrb[25].mxu0 }
 0xf85   : > { %v3687_v26 = vld [vmem:[%s8875_s5 + $0x8] sm:$0xff] }
 0xf86   : > { %v3231_v27 = vsel %vm1726_vm3, %v3228_v25, -inf }
 0xf87   : > { %3232 = vmax.xlane.f32.xlu0 %v3231_v27 }
 0xf9d   : > { %3242 = vrot.lane.b32.xlu0 %v8205_v15, %s7878_s12 }
 0xfa1   : > { %3392 = vrot.lane.b32.xlu0 %v8201_v13, %s7879_s15 }
0x1014   : > { %v3233_v14 = vpop.xlane.xlu0 %3232 }
0x1015   : > { %v3234_v28 = vsub.f32 %v3228_v25, %v3233_v14  ;;  %v3686_v25 = vld [vmem:[%s8875_s5] sm:$0xff]  ;;  %v3688_v14 = vld [vmem:[%s8875_s5 + $0x10] sm:$0xff] }
0x1016   : > { %v7524_v27 = vpack.c.bf16 %v3687_v26, %v3686_v25 }
0x1017   : > { %v3235_v17 = vmul.f32 1.442695, %v3234_v28  ;;  %v3689_v28 = vld [vmem:[%s8875_s5 + $0x18] sm:$0xff]  ;;  %s8882_s5 = scalar_lea.vmem %s7998_s17, %s8082_s0 }
0x1018   : > { %v3243_v29 = vpop.permute.xlu0 %3242 }
0x1019   : > { %7726 = vpow2.f32 %v3235_v17  ;;  %7239 = vmatpush3.msra.mxu1 %v3243_v29  ;;  %v7528_v17 = vpack.c.bf16 %v3689_v28, %v3688_v14  ;;  %v3788_v29 = vld [vmem:[%s8877_s28] sm:$0xff] }
0x101a   : > { %7248 = vmatprep.subr.mxu1 %v7872_v12  ;;  %v6881_v28 = vld [vmem:[%s1405_s6] ss:$0 sm:$0xff]  ;;  %s7882_s6 = smov 16  }
0x101c   : > { %v3393_v35 = vpop.permute.xlu0 %3392 }
0x1023   : > { %v7727_v30 = vpop.eup %7726 }
0x1024   : > { %v3237_v31 = vsel %vm1726_vm3, %v7727_v30, 0.0 }
0x1025   : > { %3238 = vadd.xlane.f32.xlu1 %v3237_v31  ;;  %v3790_v31 = vld [vmem:[%s8877_s28 + $0x10] sm:$0xff] }
0x1036   : > { %3394 = vrot.lane.b32.xlu1 %v8205_v15, %s7879_s15 }
0x10b2   : > { %v3239_v32 = vpop.xlane.xlu1 %3238 }
0x10b3   : > { %7728 = vrcp.f32 %v3239_v32 }
0x10b6   : > { %v3395_v34 = vpop.permute.xlu1 %3394 }
0x10bd   : > { %v7729_v13 = vpop.eup %7728 }
0x10be   : > { %v3241_v33 = vmul.f32 %v7729_v13, %v7727_v30  ;;  %v3789_v30 = vld [vmem:[%s8877_s28 + $0x8] sm:$0xff]  ;;  %v3791_v13 = vld [vmem:[%s8877_s28 + $0x18] sm:$0xff] }
0x10bf   : > { %v7532_v32 = vpack.c.bf16 %v3789_v30, %v3788_v29 }
0x10c0   : > { %7241 = vmatmul.mubr.msk.f32.vlgmr.msra.gmra.mrb[16].mxu1 %vm1726_vm3, %v3241_v33  ;;  %v7536_v33 = vpack.c.bf16 %v3791_v13, %v3790_v31 }
0x10c1   : > { %7249 = vmatpush3.xpose.msk.msra.mxu1 %vm1726_vm3, %v3395_v34  ;;  %7250 = vmatprep.mubr.msk.f32.mxu1 %vm7873_vm2, %v7872_v12  ;;  %v3792_v34 = vld [vmem:[%s8877_s28 + $0x20] sm:$0xff] }
0x10c2   : > { %7258 = vmatprep.subr.mxu1 %v7872_v12 }
0x10c4   : > { %7251 = vmatmul.mubr.msk.f32.vlgmr.msra.gmra.mrb[18].mxu1 %vm1726_vm3, %v3393_v35  ;;  %v3793_v35 = vld [vmem:[%s8877_s28 + $0x28] sm:$0xff] }
0x10c5   : > { %7259 = vmatpush3.msra.mxu1 %v8325_v36  ;;  %7260 = vmatprep.mubr.msk.f32.mxu1 %vm7873_vm2, %v7872_v12  ;;  %v8402_v36 = vadd.f32 %v3638_v40, %v8153_v2 }
0x10c6   : > { %7533 = vmatprep.subr.bf16.mxu1 %v7532_v32 }
0x10c7   : > { %v3644_v45 = vsel %vm1464_vm1, %v8402_v36, 0.0 }
0x1193   : > { %v3314_v37 = vpop.f32.mrb[16].mxu1 }
0x1194   : > { %v7242_v38 = vpop.f32.mrb[17].mxu1  ;;  %7246 = vmatmul.mubr.msk.f32.vlgmr.msra.gmra.mrb[26].mxu0 %vm1726_vm3, %v3314_v37 }
0x1195   : > { %7255 = vmatprep.mubr.msk.f32.mxu0 %vm7873_vm2, %v7872_v12 }
0x1197   : > { %v3466_v41 = vpop.f32.mrb[18].mxu1 }
0x1198   : > { %v3467_v42 = vadd.f32 %v3466_v41, %v8331_v39  ;;  %v7252_v43 = vpop.f32.mrb[19].mxu1 }
0x119a   : > { %v3470_v44 = vsel %vm1726_vm3, %v3467_v42, -inf }
0x119b   : > { %3471 = vmax.xlane.f32.xlu1 %v3470_v44 }
0x119f   : > { %3645 = vadd.xlane.f32.xlu1 %v3644_v45  ;;  %v3794_v45 = vld [vmem:[%s8877_s28 + $0x30] sm:$0xff] }
0x1228   : > { %v3472_v46 = vpop.xlane.xlu1 %3471 }
0x1229   : > { %v3473_v47 = vsub.f32 %v3467_v42, %v3472_v46  ;;  %v3795_v46 = vld [vmem:[%s8877_s28 + $0x38] sm:$0xff] }
0x122b   : > { %v3474_v48 = vmul.f32 1.442695, %v3473_v47  ;;  %v7544_v47 = vpack.c.bf16 %v3795_v46, %v3794_v45 }
0x122c   : > { %v3646_v59 = vpop.xlane.xlu1 %3645 }
0x122d   : > { %7730 = vpow2.f32 %v3474_v48  ;;  %v3650_v60 = vmul.f32 0.03125, %v3646_v59  ;;  %v3796_v48 = vld [vmem:[%s8877_s28 + $0x40] sm:$0xff] }
0x122e   : > { %v3888_v59 = vld [vmem:[%s8120_s16] sm:$0xff] }
0x122f   : > { %v3652_v63 = vsub.f32 %v8402_v36, %v3650_v60  ;;  %v3889_v60 = vld [vmem:[%s8120_s16 + $0x8] sm:$0xff] }
0x1231   : > { %v3654_v5 = vmul.f32 %v3652_v63, %v3652_v63 }
0x1233   : > { %v3656_v6 = vsel %vm1464_vm1, %v3654_v5, 0.0 }
0x1237   : > { %v7731_v50 = vpop.eup %7730 }
0x1238   : > { %v3476_v51 = vsel %vm1726_vm3, %v7731_v50, 0.0 }
0x1239   : > { %3477 = vadd.xlane.f32.xlu0 %v3476_v51 }
0x124f   : > { %3481 = vrot.lane.b32.xlu0 %v8205_v15, %s7880_s23 }
0x1267   : > { %v3387_v2 = vpop.f32.mrb[26].mxu0 }
0x1268   : > { %v3391_v39 = vadd.f32 %v3387_v2, %v3150_v22  ;;  %v7247_v52 = vpop.f32.mrb[27].mxu0  ;;  %v6876_v22 = vld [vmem:[%s8878_s30] ss:$0 sm:$0xff]  ;;  %v3798_v2 = vld [vmem:[%s8877_s28 + $0x50] sm:$0xff]  ;;  %s8879_s30 = sld [smem:[#allocation24_spill]] }
0x126e   : > { %s8880_s1 = scalar_lea.vmem %s8879_s30, %s8082_s0 }
0x12c6   : > { %v3478_v53 = vpop.xlane.xlu0 %3477 }
0x12c7   : > { %7732 = vrcp.f32 %v3478_v53  ;;  %v3800_v53 = vld [vmem:[%s8877_s28 + $0x60] sm:$0xff] }
0x12ca   : > { %v3482_v54 = vpop.permute.xlu0 %3481 }
0x12cb   : > { %7254 = vmatpush3.msra.mxu0 %v3482_v54  ;;  %v3801_v54 = vld [vmem:[%s8877_s28 + $0x68] sm:$0xff] }
0x12cc   : > { %7525 = vmatprep.subr.bf16.mxu0 %v7524_v27 }
0x12d1   : > { %v7733_v55 = vpop.eup %7732 }
0x12d2   : > { %v3480_v56 = vmul.f32 %v7733_v55, %v7731_v50  ;;  %v3797_v50 = vld [vmem:[%s8877_s28 + $0x48] sm:$0xff]  ;;  %v7556_v55 = vpack.c.bf16 %v3801_v54, %v3800_v53 }
0x12d3   : > { %v7548_v51 = vpack.c.bf16 %v3797_v50, %v3796_v48  ;;  %v7794_v50 = vld [vmem:[#allocation2 + $0x8] sm:$0xff] }
0x12d4   : > { %7256 = vmatmul.mubr.msk.f32.vlgmr.msra.gmra.mrb[28].mxu0 %vm1726_vm3, %v3480_v56  ;;  %v3802_v56 = vld [vmem:[%s8877_s28 + $0x70] sm:$0xff] }
0x12d5   : > { %7527 = vmatpush3.bf16.msra.mxu0 %v7524_v27 }
0x12d6   : > { %7529 = vmatprep.subr.bf16.mxu0 %v7528_v17 }
0x12d9   : > { %7531 = vmatpush3.bf16.msra.mxu0 %v7528_v17 }
0x13a7   : > { %v3553_v57 = vpop.f32.mrb[28].mxu0 }
0x13a8   : > { %v7257_v58 = vpop.f32.mrb[29].mxu0  ;;  %7261 = vmatmul.mubr.msk.f32.vlgmr.msra.gmra.mrb[20].mxu1 %vm1726_vm3, %v3553_v57  ;;  %v3803_v57 = vld [vmem:[%s8877_s28 + $0x78] sm:$0xff] }
0x13a9   : > { %7535 = vmatpush3.bf16.msra.mxu1 %v7532_v32  ;;  %v7560_v58 = vpack.c.bf16 %v3803_v57, %v3802_v56 }
0x13aa   : > { %7537 = vmatprep.subr.bf16.mxu1 %v7536_v33 }
0x13ad   : > { %7539 = vmatpush3.bf16.msra.mxu1 %v7536_v33 }
0x147b   : > { %v3626_v61 = vpop.f32.mrb[20].mxu1 }
0x147c   : > { %v3630_v62 = vadd.f32 %v3626_v61, %v3391_v39  ;;  %v7262_v15 = vpop.f32.mrb[21].mxu1  ;;  %v3799_v39 = vld [vmem:[%s8877_s28 + $0x58] sm:$0xff]  ;;  %v7564_v61 = vpack.c.bf16 %v3889_v60, %v3888_v59 }
0x147d   : > { %v7552_v52 = vpack.c.bf16 %v3799_v39, %v3798_v2 }
0x147e   : > { %v3639_v0 = vadd.f32 %v6874_v16, %v3630_v62  ;;  %v7540_v16 = vpack.c.bf16 %v3793_v35, %v3792_v34  ;;  %7565 = vmatprep.subr.bf16.mxu0 %v7564_v61  ;;  %v6877_v62 = vld [vmem:[%s8880_s1] ss:$0 sm:$0xff] }
0x1480   : > { %v8414_v1 = vadd.f32 %v3639_v0, %v8156_v4  ;;  %7541 = vmatprep.subr.bf16.mxu1 %v7540_v16 }
0x1481   : > { %7543 = vmatpush3.bf16.msra.mxu1 %v7540_v16 }
0x1482   : > { %v3647_v3 = vsel %vm1464_vm1, %v8414_v1, 0.0  ;;  %7545 = vmatprep.subr.bf16.mxu1 %v7544_v47 }
0x1483   : > { %3648 = vadd.xlane.f32.xlu1 %v3647_v3 }
0x1485   : > { %7547 = vmatpush3.bf16.msra.mxu1 %v7544_v47 }
0x1486   : > { %7549 = vmatprep.subr.bf16.mxu1 %v7548_v51 }
0x1487   : > { %3657 = vadd.xlane.f32.xlu1 %v3656_v6 }
0x1489   : > { %7551 = vmatpush3.bf16.msra.mxu1 %v7548_v51 }
0x148a   : > { %7553 = vmatprep.subr.bf16.mxu1 %v7552_v52 }
0x148d   : > { %7555 = vmatpush3.bf16.msra.mxu1 %v7552_v52 }
0x148e   : > { %7557 = vmatprep.subr.bf16.mxu1 %v7556_v55 }
0x1491   : > { %7559 = vmatpush3.bf16.msra.mxu1 %v7556_v55 }
0x1492   : > { %7561 = vmatprep.subr.bf16.mxu1 %v7560_v58 }
0x1495   : > { %7563 = vmatpush3.bf16.msra.mxu1 %v7560_v58  ;;  %v7795_v58 = vld [vmem:[#allocation2] sm:$0xff] }
0x1496   : > { %7346 = vmatprep.subr.mxu1 %v7872_v12 }
0x1510   : > { %v3649_v7 = vpop.xlane.xlu1 %3648 }
0x1511   : > { %v3651_v8 = vmul.f32 0.03125, %v3649_v7 }
0x1513   : > { %v3653_v9 = vsub.f32 %v8414_v1, %v3651_v8 }
0x1514   : > { %v3658_v4 = vpop.xlane.xlu1 %3657 }
0x1515   : > { %v3662_v10 = vmul.f32 0.03125, %v3658_v4  ;;  %v3655_v11 = vmul.f32 %v3653_v9, %v3653_v9 }
0x1517   : > { %v3664_v18 = vadd.f32 1e-05, %v3662_v10  ;;  %v3659_v49 = vsel %vm1464_vm1, %v3655_v11, 0.0 }
0x1518   : > { %3660 = vadd.xlane.f32.xlu1 %v3659_v49 }
0x1519   : > { %7734 = vrsqrt.f32 %v3664_v18 }
0x1523   : > { %v7735_v19 = vpop.eup %7734 }
0x1524   : > { %v3668_v21 = vmul.f32 %v7735_v19, %v3652_v63  ;;  %v3890_v19 = vld [vmem:[%s8120_s16 + $0x10] sm:$0xff] }
0x1526   : > { %v3676_v23 = vmul.f32 %v6875_v20, %v3668_v21 }
0x1528   : > { %v3684_v24 = vadd.f32 %v6876_v22, %v3676_v23 }
0x152a   : > { %7271 = vmatprep.mubr.msk.f32.mxu0 %vm1464_vm1, %v3684_v24 }
0x15a5   : > { %v3661_v37 = vpop.xlane.xlu1 %3660 }
0x15a6   : > { %v3663_v38 = vmul.f32 0.03125, %v3661_v37 }
0x15a8   : > { %v3665_v40 = vadd.f32 1e-05, %v3663_v38 }
0x15aa   : > { %7736 = vrsqrt.f32 %v3665_v40 }
0x15b4   : > { %v7737_v41 = vpop.eup %7736 }
0x15b5   : > { %v3669_v42 = vmul.f32 %v7737_v41, %v3653_v9 }
0x15b7   : > { %v3677_v43 = vmul.f32 %v6875_v20, %v3669_v42  ;;  %v3891_v20 = vld [vmem:[%s8120_s16 + $0x18] sm:$0xff]  ;;  %s7881_s16 = smov 8  }
0x15b8   : > { %v7568_v21 = vpack.c.bf16 %v3891_v20, %v3890_v19  ;;  %v4073_v19 = vld [vmem:[%s8129_s20 + $0x18] sm:$0xff] }
0x15b9   : > { %v3685_v44 = vadd.f32 %v6876_v22, %v3677_v43  ;;  %v6880_v22 = vld [vmem:[%s8882_s5] ss:$0 sm:$0xff] }
0x15bb   : > { %7272 = vmatmul.mubr.msk.f32.vlgmr.msra.gmra.mrb[30].mxu0 %vm1464_vm1, %v3685_v44 }
0x15bc   : > { %7567 = vmatpush3.bf16.msra.mxu0 %v7564_v61 }
0x15bd   : > { %7569 = vmatprep.subr.bf16.mxu0 %v7568_v21 }
0x15c0   : > { %7571 = vmatpush3.bf16.msra.mxu0 %v7568_v21 }
0x168e   : > { %v7273_v15 = vpop.f32.mrb[30].mxu0 }
0x168f   : > { %v3775_v63 = vadd.f32 %v7273_v15, %v6877_v62  ;;  %v3769_v0 = vpop.f32.mrb[31].mxu0 }
0x1690   : > { %v3770_v3 = vadd.f32 %v6877_v62, %v3769_v0 }
0x1691   : > { %v3781_v5 = vmul.f32 0.70710677, %v3775_v63  ;;  %v3779_v11 = vmul.f32 0.5, %v3775_v63 }
0x1692   : > { %v3780_v6 = vmul.f32 0.70710677, %v3770_v3  ;;  %v3778_v4 = vmul.f32 0.5, %v3770_v3 }
0x1693   : > { %7738 = verf.f32 %v3781_v5 }
0x1694   : > { %7740 = verf.f32 %v3780_v6 }
0x169d   : > { %v7739_v7 = vpop.eup %7738 }
0x169e   : > { %v7741_v8 = vpop.eup %7740  ;;  %v3785_v9 = vadd.f32 1.0, %v7739_v7 }
0x169f   : > { %v3784_v10 = vadd.f32 1.0, %v7741_v8 }
0x16a0   : > { %v3787_v49 = vmul.f32 %v3785_v9, %v3779_v11  ;;  %v4071_v11 = vld [vmem:[%s8129_s20 + $0x8] sm:$0xff] }
0x16a1   : > { %v3786_v18 = vmul.f32 %v3784_v10, %v3778_v4  ;;  %v4070_v10 = vld [vmem:[%s8129_s20] sm:$0xff] }
0x16a3   : > { %7306 = vmatprep.mubr.f32.mxu1 %v3786_v18  ;;  %v7572_v18 = vpack.c.bf16 %v4071_v11, %v4070_v10 }
0x16a4   : > { %7307 = vmatmul.mubr.f32.vlgmr.msra.gmra.mrb[22].mxu1 %v3787_v49  ;;  %v4072_v49 = vld [vmem:[%s8129_s20 + $0x10] sm:$0xff]  ;;  %s7885_s20 = smov 56  }
0x16a5   : > { %7348 = vmatprep.mubr.msk.f32.mxu1 %vm7873_vm2, %v7872_v12  ;;  %7573 = vmatprep.subr.bf16.mxu0 %v7572_v18  ;;  %v7576_v20 = vpack.c.bf16 %v4073_v19, %v4072_v49 }
0x1777   : > { %v7308_v23 = vpop.f32.mrb[22].mxu1 }
0x1778   : > { %v3883_v24 = vadd.f32 %v7308_v23, %v6880_v22  ;;  %v3877_v25 = vpop.f32.mrb[23].mxu1 }
0x1779   : > { %v3878_v26 = vadd.f32 %v6880_v22, %v3877_v25 }
0x177a   : > { %v3887_v14 = vadd.f32 %v3883_v24, %v8414_v1 }
0x177b   : > { %v3886_v27 = vadd.f32 %v3878_v26, %v8402_v36 }
0x177d   : > { %7317 = vmatprep.mubr.msk.f32.mxu0 %vm1464_vm1, %v3886_v27 }
0x177e   : > { %7318 = vmatmul.mubr.msk.f32.vlgmr.msra.gmra.mrb[32].mxu0 %vm1464_vm1, %v3887_v14 }
0x177f   : > { %7575 = vmatpush3.bf16.msra.mxu0 %v7572_v18 }
0x1780   : > { %7577 = vmatprep.subr.bf16.mxu0 %v7576_v20 }
0x1783   : > { %7579 = vmatpush3.bf16.msra.mxu0 %v7576_v20 }
0x1784   : > { %7331 = vmatprep.subr.mxu0 %v7872_v12 }
0x1851   : > { %v7319_v17 = vpop.f32.mrb[32].mxu0 }
0x1852   : > { %v3977_v29 = vadd.f32 %v7319_v17, %v6881_v28  ;;  %v3971_v30 = vpop.f32.mrb[33].mxu0  ;;  %v6885_v17 = vld [vmem:[%s1411_s14] ss:$0 sm:$0xff]  ;;  %s7884_s14 = smov 64  }
0x1853   : > { %v3972_v31 = vadd.f32 %v6881_v28, %v3971_v30 }
0x1854   : > { %v3981_v32 = vsub.f32 0.0, %v3977_v29 }
0x1855   : > { %v3980_v13 = vsub.f32 0.0, %v3972_v31 }
0x1856   : > { %v3984_v33 = vmul.f32 1.442695, %v3981_v32 }
0x1857   : > { %v3982_v34 = vmul.f32 1.442695, %v3980_v13 }
0x1858   : > { %7742 = vpow2.f32 %v3984_v33 }
0x1859   : > { %7744 = vpow2.f32 %v3982_v34 }
0x1862   : > { %v7743_v35 = vpop.eup %7742 }
0x1863   : > { %v7745_v36 = vpop.eup %7744  ;;  %v3987_v16 = vadd.f32 1.0, %v7743_v35 }
0x1864   : > { %v3986_v1 = vadd.f32 1.0, %v7745_v36 }
0x1865   : > { %7746 = vrcp.f32 %v3987_v16 }
0x1866   : > { %7748 = vrcp.f32 %v3986_v1 }
0x186f   : > { %v7747_v37 = vpop.eup %7746 }
0x1870   : > { %v7749_v38 = vpop.eup %7748  ;;  %3994 = vrot.lane.b32.xlu0 %v7747_v37, %s7881_s16 }
0x1871   : > { %3992 = vrot.lane.b32.xlu1 %v7749_v38, %s7881_s16 }
0x1874   : > { %4000 = vrot.lane.b32.xlu0 %v7747_v37, %s7882_s6 }
0x1875   : > { %4006 = vrot.lane.b32.xlu1 %v7747_v37, %s7883_s26 }
0x1878   : > { %3998 = vrot.lane.b32.xlu0 %v7749_v38, %s7882_s6 }
0x187c   : > { %4004 = vrot.lane.b32.xlu0 %v7749_v38, %s7883_s26 }
0x18e2   : > { %v3995_v40 = vpop.permute.xlu0 %3994 }
0x18e3   : > { %v3993_v41 = vpop.permute.xlu1 %3992  ;;  %v4011_v42 = vsel %vm1726_vm3, %v7747_v37, %v3995_v40 }
0x18e4   : > { %v4010_v39 = vsel %vm1726_vm3, %v7749_v38, %v3993_v41 }
0x18e6   : > { %v4001_v43 = vpop.permute.xlu0 %4000 }
0x18e7   : > { %v4014_v44 = vsel %vm4012_vm4, %v4011_v42, %v4001_v43  ;;  %v4007_v45 = vpop.permute.xlu1 %4006 }
0x18e8   : > { %v4017_v46 = vsel %vm4015_vm5, %v4014_v44, %v4007_v45 }
0x18e9   : > { %v4019_v47 = vsub.f32 1.0, %v4017_v46  ;;  %v4023_v2 = vmul.f32 %v4017_v46, %v3887_v14  ;;  %v6884_v14 = vld [vmem:[%s1408_s18] ss:$0 sm:$0xff]  ;;  %s7886_s18 = smov 48  }
0x18ea   : > { %v3999_v48 = vpop.permute.xlu0 %3998 }
0x18eb   : > { %v4021_v51 = vmul.f32 %v7794_v50, %v4019_v47  ;;  %v4013_v53 = vsel %vm4012_vm4, %v4010_v39, %v3999_v48 }
0x18ed   : > { %v8473_v52 = vadd.f32 %v4023_v2, %v4021_v51 }
0x18ee   : > { %v4005_v54 = vpop.permute.xlu0 %4004 }
0x18ef   : > { %v4016_v55 = vsel %vm4015_vm5, %v4013_v53, %v4005_v54  ;;  %v4031_v56 = vsel %vm1464_vm1, %v8473_v52, 0.0 }
0x18f0   : > { %v4018_v57 = vsub.f32 1.0, %v4016_v55  ;;  %4032 = vadd.xlane.f32.xlu1 %v4031_v56  ;;  %v4022_v60 = vmul.f32 %v4016_v55, %v3886_v27 }
0x18f2   : > { %v4020_v59 = vmul.f32 %v7795_v58, %v4018_v57 }
0x18f4   : > { %v8477_v61 = vadd.f32 %v4022_v60, %v4020_v59 }
0x18f6   : > { %v4028_v62 = vsel %vm1464_vm1, %v8477_v61, 0.0 }
0x18f7   : > { %4029 = vadd.xlane.f32.xlu0 %v4028_v62  ;;  %v8539_v62 = vld [vmem:[%s8132_s19 + $0x8] sm:$0xff] }
0x197d   : > { %v4033_v15 = vpop.xlane.xlu1 %4032 }
0x197e   : > { %v4035_v63 = vmul.f32 0.03125, %v4033_v15 }
0x1980   : > { %v4037_v5 = vsub.f32 %v8473_v52, %v4035_v63 }
0x1982   : > { %v4039_v9 = vmul.f32 %v4037_v5, %v4037_v5 }
0x1984   : > { %v4030_v0 = vpop.xlane.xlu0 %4029  ;;  %v4043_v4 = vsel %vm1464_vm1, %v4039_v9, 0.0 }
0x1985   : > { %v4034_v3 = vmul.f32 0.03125, %v4030_v0 }
0x1987   : > { %v4036_v6 = vsub.f32 %v8477_v61, %v4034_v3  ;;  %v8544_v3 = vld [vmem:[%s8132_s19] sm:$0xff] }
0x1989   : > { %v4038_v7 = vmul.f32 %v4036_v6, %v4036_v6 }
0x198b   : > { %v4040_v8 = vsel %vm1464_vm1, %v4038_v7, 0.0 }
0x198c   : > { %4041 = vadd.xlane.f32.xlu0 %v4040_v8 }
0x1990   : > { %4044 = vadd.xlane.f32.xlu0 %v4043_v4 }
0x1a19   : > { %v4042_v21 = vpop.xlane.xlu0 %4041 }
0x1a1a   : > { %v4046_v22 = vmul.f32 0.03125, %v4042_v21 }
0x1a1c   : > { %v4048_v23 = vadd.f32 1e-05, %v4046_v22 }
0x1a1d   : > { %v4045_v24 = vpop.xlane.xlu0 %4044 }
0x1a1e   : > { %7750 = vrsqrt.f32 %v4048_v23  ;;  %v4047_v25 = vmul.f32 0.03125, %v4045_v24 }
0x1a20   : > { %v4049_v26 = vadd.f32 1e-05, %v4047_v25 }
0x1a22   : > { %7752 = vrsqrt.f32 %v4049_v26 }
0x1a28   : > { %v7751_v27 = vpop.eup %7750 }
0x1a29   : > { %v4052_v28 = vmul.f32 %v7751_v27, %v4036_v6 }
0x1a2b   : > { %v4060_v29 = vmul.f32 %v6884_v14, %v4052_v28 }
0x1a2c   : > { %v7753_v30 = vpop.eup %7752 }
0x1a2d   : > { %v4053_v31 = vmul.f32 %v7753_v30, %v4037_v5  ;;  %v4068_v32 = vadd.f32 %v6885_v17, %v4060_v29  ;;  %v8582_v30 = vld [vmem:[%s8132_s19 + $0x10] sm:$0xff] }
0x1a2f   : > { %v4061_v13 = vmul.f32 %v6884_v14, %v4053_v31  ;;  %7328 = vmatprep.mubr.msk.f32.mxu0 %vm1464_vm1, %v4068_v32 }
0x1a31   : > { %v4069_v33 = vadd.f32 %v6885_v17, %v4061_v13 }
0x1a33   : > { %7329 = vmatmul.mubr.msk.f32.vlgmr.msra.gmra.mrb[34].mxu0 %vm1464_vm1, %v4069_v33 }
0x1a34   : > { %7333 = vmatprep.mubr.msk.f32.mxu0 %vm7873_vm2, %v7872_v12 }
0x1b06   : > { %v8500_v34 = vpop.f32.mrb[34].mxu0 }
0x1b07   : > { %v8502_v35 = vpop.f32.mrb[35].mxu0 }
0x1b08   : > { %4160 = vrot.lane.b32.xlu0 %v8502_v35, %s7875_s11 }
0x1b0c   : > { %4325 = vrot.lane.b32.xlu0 %v8502_v35, %s7877_s3 }
0x1b7a   : > { %v4161_v36 = vpop.permute.xlu0 %4160 }
0x1b7b   : > { %7332 = vmatpush3.xpose.msk.msra.mxu0 %vm1726_vm3, %v4161_v36 }
0x1b7c   : > { %7336 = vmatprep.subr.mxu0 %v7872_v12 }
0x1b7e   : > { %7334 = vmatmul.mubr.msk.f32.vlgmr.msra.gmra.mrb[36].mxu0 %vm1726_vm3, %v8502_v35  ;;  %v4326_v48 = vpop.permute.xlu0 %4325 }
0x1b7f   : > { %7338 = vmatprep.mubr.msk.f32.mxu0 %vm7873_vm2, %v7872_v12 }
0x1c51   : > { %v4232_v16 = vpop.f32.mrb[36].mxu0 }
0x1c52   : > { %v7335_v1 = vpop.f32.mrb[37].mxu0  ;;  %v4236_v37 = vsel %vm1726_vm3, %v4232_v16, -inf }
0x1c53   : > { %4237 = vmax.xlane.f32.xlu1 %v4236_v37 }
0x1c64   : > { %4247 = vrot.lane.b32.xlu1 %v8502_v35, %s7884_s14 }
0x1ce0   : > { %v4238_v38 = vpop.xlane.xlu1 %4237 }
0x1ce1   : > { %v4239_v40 = vsub.f32 %v4232_v16, %v4238_v38 }
0x1ce3   : > { %v4240_v41 = vmul.f32 1.442695, %v4239_v40 }
0x1ce4   : > { %v4248_v42 = vpop.permute.xlu1 %4247 }
0x1ce5   : > { %7754 = vpow2.f32 %v4240_v41  ;;  %7337 = vmatpush3.msra.mxu0 %v4248_v42 }
0x1ce6   : > { %7341 = vmatprep.subr.mxu0 %v7872_v12 }
0x1cef   : > { %v7755_v43 = vpop.eup %7754 }
0x1cf0   : > { %v4242_v44 = vsel %vm1726_vm3, %v7755_v43, 0.0 }
0x1cf1   : > { %4243 = vadd.xlane.f32.xlu1 %v4242_v44 }
0x1d02   : > { %4323 = vrot.lane.b32.xlu1 %v8502_v35, %s7874_s10 }
0x1d7e   : > { %v4244_v45 = vpop.xlane.xlu1 %4243 }
0x1d7f   : > { %7756 = vrcp.f32 %v4244_v45 }
0x1d82   : > { %v4324_v50 = vpop.permute.xlu1 %4323 }
0x1d89   : > { %v7757_v46 = vpop.eup %7756 }
0x1d8a   : > { %v4246_v47 = vmul.f32 %v7757_v46, %v7755_v43 }
0x1d8c   : > { %7339 = vmatmul.mubr.msk.f32.vlgmr.msra.gmra.mrb[38].mxu0 %vm1726_vm3, %v4246_v47 }
0x1d8d   : > { %7342 = vmatpush3.xpose.msk.msra.mxu0 %vm1726_vm3, %v4326_v48  ;;  %7343 = vmatprep.mubr.msk.f32.mxu0 %vm7873_vm2, %v7872_v12 }
0x1d8e   : > { %7351 = vmatprep.subr.mxu0 %v7872_v12 }
0x1d90   : > { %7344 = vmatmul.mubr.msk.f32.vlgmr.msra.gmra.mrb[40].mxu0 %vm1726_vm3, %v4324_v50 }
0x1d91   : > { %7353 = vmatprep.mubr.msk.f32.mxu0 %vm7873_vm2, %v7872_v12  ;;  %7352 = vmatpush3.msra.mxu0 %v8539_v62 }
0x1d92   : > { %7361 = vmatprep.subr.mxu0 %v7872_v12 }
0x1e5f   : > { %v4319_v51 = vpop.f32.mrb[38].mxu0 }
0x1e60   : > { %v7340_v2 = vpop.f32.mrb[39].mxu0 }
0x1e63   : > { %v4397_v39 = vpop.f32.mrb[40].mxu0 }
0x1e64   : > { %v7345_v53 = vpop.f32.mrb[41].mxu0  ;;  %v4401_v54 = vsel %vm1726_vm3, %v4397_v39, -inf }
0x1e65   : > { %4402 = vmax.xlane.f32.xlu0 %v4401_v54 }
0x1e7b   : > { %4412 = vrot.lane.b32.xlu0 %v8502_v35, %s7885_s20 }
0x1e7f   : > { %4634 = vrot.lane.b32.xlu0 %v8502_v35, %s7876_s25 }
0x1ef2   : > { %v4403_v55 = vpop.xlane.xlu0 %4402 }
0x1ef3   : > { %v4404_v56 = vsub.f32 %v4397_v39, %v4403_v55 }
0x1ef5   : > { %v4405_v57 = vmul.f32 1.442695, %v4404_v56 }
0x1ef6   : > { %v4413_v58 = vpop.permute.xlu0 %4412 }
0x1ef7   : > { %7758 = vpow2.f32 %v4405_v57  ;;  %7347 = vmatpush3.msra.mxu1 %v4413_v58 }
0x1ef8   : > { %7356 = vmatprep.subr.mxu1 %v7872_v12 }
0x1efa   : > { %v4635_v8 = vpop.permute.xlu0 %4634 }
0x1f01   : > { %v7759_v59 = vpop.eup %7758 }
0x1f02   : > { %v4407_v60 = vsel %vm1726_vm3, %v7759_v59, 0.0 }
0x1f03   : > { %4408 = vadd.xlane.f32.xlu1 %v4407_v60 }
0x1f14   : > { %4636 = vrot.lane.b32.xlu1 %v8502_v35, %s7878_s12 }
0x1f90   : > { %v4409_v15 = vpop.xlane.xlu1 %4408 }
0x1f91   : > { %7760 = vrcp.f32 %v4409_v15 }
0x1f94   : > { %v4637_v6 = vpop.permute.xlu1 %4636 }
0x1f9b   : > { %v7761_v63 = vpop.eup %7760 }
0x1f9c   : > { %v4411_v0 = vmul.f32 %v7761_v63, %v7759_v59 }
0x1f9e   : > { %7349 = vmatmul.mubr.msk.f32.vlgmr.msra.gmra.mrb[24].mxu1 %vm1726_vm3, %v4411_v0 }
0x1f9f   : > { %7357 = vmatpush3.msra.mxu1 %v8544_v3  ;;  %7358 = vmatprep.mubr.msk.f32.mxu1 %vm7873_vm2, %v7872_v12 }
0x1fa0   : > { %7366 = vmatprep.subr.mxu1 %v7872_v12 }
0x1fa2   : > { %7359 = vmatmul.mubr.msk.f32.vlgmr.msra.gmra.mrb[26].mxu1 %vm1726_vm3, %v4319_v51  ;;  %v8615_v51 = vld [vmem:[%s8132_s19 + $0x18] sm:$0xff] }
0x1fa3   : > { %7368 = vmatprep.mubr.msk.f32.mxu1 %vm7873_vm2, %v7872_v12 }
0x2071   : > { %v4484_v5 = vpop.f32.mrb[24].mxu1 }
0x2072   : > { %v7350_v7 = vpop.f32.mrb[25].mxu1  ;;  %7354 = vmatmul.mubr.msk.f32.vlgmr.msra.gmra.mrb[42].mxu0 %vm1726_vm3, %v4484_v5 }
0x2073   : > { %7362 = vmatpush3.xpose.msk.msra.mxu0 %vm1726_vm3, %v4637_v6  ;;  %7363 = vmatprep.mubr.msk.f32.mxu0 %vm7873_vm2, %v7872_v12 }
0x2074   : > { %7371 = vmatprep.subr.mxu0 %v7872_v12 }
0x2075   : > { %v4630_v9 = vpop.f32.mrb[26].mxu1 }
0x2076   : > { %v7360_v4 = vpop.f32.mrb[27].mxu1  ;;  %7364 = vmatmul.mubr.msk.f32.vlgmr.msra.gmra.mrb[44].mxu0 %vm1726_vm3, %v4635_v8 }
0x2077   : > { %7373 = vmatprep.mubr.msk.f32.mxu0 %vm7873_vm2, %v7872_v12  ;;  %7372 = vmatpush3.msra.mxu0 %v8582_v30 }
0x2078   : > { %7381 = vmatprep.subr.mxu0 %v7872_v12 }
0x2145   : > { %v4557_v10 = vpop.f32.mrb[42].mxu0 }
0x2146   : > { %v4631_v11 = vadd.f32 %v4630_v9, %v4557_v10  ;;  %v7355_v18 = vpop.f32.mrb[43].mxu0 }
0x2149   : > { %v4708_v49 = vpop.f32.mrb[44].mxu0 }
0x214a   : > { %v7365_v19 = vpop.f32.mrb[45].mxu0  ;;  %v4712_v20 = vsel %vm1726_vm3, %v4708_v49, -inf }
0x214b   : > { %4713 = vmax.xlane.f32.xlu1 %v4712_v20 }
0x215c   : > { %4875 = vrot.lane.b32.xlu1 %v8502_v35, %s7880_s23 }
0x2160   : > { %4873 = vrot.lane.b32.xlu1 %v8502_v35, %s7879_s15 }
0x2164   : > { %5113 = vrot.lane.b32.xlu1 %v8500_v34, %s7875_s11  ;;  %s7887_s11 = smov 40  }
0x21d8   : > { %v4714_v21 = vpop.xlane.xlu1 %4713 }
0x21d9   : > { %v4715_v22 = vsub.f32 %v4708_v49, %v4714_v21 }
0x21db   : > { %v4716_v23 = vmul.f32 1.442695, %v4715_v22 }
0x21dc   : > { %v4876_v28 = vpop.permute.xlu1 %4875 }
0x21dd   : > { %7762 = vpow2.f32 %v4716_v23 }
0x21e0   : > { %v4874_v29 = vpop.permute.xlu1 %4873 }
0x21e4   : > { %v5114_v44 = vpop.permute.xlu1 %5113 }
0x21e7   : > { %v7763_v24 = vpop.eup %7762 }
0x21e8   : > { %v4718_v25 = vsel %vm1726_vm3, %v7763_v24, 0.0 }
0x21e9   : > { %4719 = vadd.xlane.f32.xlu0 %v4718_v25 }
0x21ff   : > { %4723 = vrot.lane.b32.xlu0 %v8502_v35, %s7886_s18 }
0x2276   : > { %v4720_v26 = vpop.xlane.xlu0 %4719 }
0x2277   : > { %7764 = vrcp.f32 %v4720_v26 }
0x227a   : > { %v4724_v27 = vpop.permute.xlu0 %4723 }
0x227b   : > { %7367 = vmatpush3.msra.mxu1 %v4724_v27 }
0x227c   : > { %7376 = vmatprep.subr.mxu1 %v7872_v12 }
0x2281   : > { %v7765_v14 = vpop.eup %7764 }
0x2282   : > { %v4722_v17 = vmul.f32 %v7765_v14, %v7763_v24 }
0x2284   : > { %7369 = vmatmul.mubr.msk.f32.vlgmr.msra.gmra.mrb[28].mxu1 %vm1726_vm3, %v4722_v17 }
0x2285   : > { %7377 = vmatpush3.xpose.msk.msra.mxu1 %vm1726_vm3, %v4876_v28  ;;  %7378 = vmatprep.mubr.msk.f32.mxu1 %vm7873_vm2, %v7872_v12 }
0x2286   : > { %7386 = vmatprep.subr.mxu1 %v7872_v12 }
0x2288   : > { %7379 = vmatmul.mubr.msk.f32.vlgmr.msra.gmra.mrb[30].mxu1 %vm1726_vm3, %v4874_v29 }
0x2289   : > { %7388 = vmatprep.mubr.msk.f32.mxu1 %vm7873_vm2, %v7872_v12  ;;  %7387 = vmatpush3.msra.mxu1 %v8615_v51 }
0x228a   : > { %7396 = vmatprep.subr.mxu1 %v7872_v12 }
0x2357   : > { %v4795_v31 = vpop.f32.mrb[28].mxu1 }
0x2358   : > { %v7370_v32 = vpop.f32.mrb[29].mxu1  ;;  %7374 = vmatmul.mubr.msk.f32.vlgmr.msra.gmra.mrb[46].mxu0 %vm1726_vm3, %v4795_v31 }
0x2359   : > { %7383 = vmatprep.mubr.msk.f32.mxu0 %vm7873_vm2, %v7872_v12 }
0x235b   : > { %v4947_v13 = vpop.f32.mrb[30].mxu1 }
0x235c   : > { %v7380_v33 = vpop.f32.mrb[31].mxu1  ;;  %v4951_v36 = vsel %vm1726_vm3, %v4947_v13, -inf }
0x235d   : > { %4952 = vmax.xlane.f32.xlu0 %v4951_v36 }
0x2373   : > { %4962 = vrot.lane.b32.xlu0 %v8502_v35, %s7887_s11 }
0x2377   : > { %5278 = vrot.lane.b32.xlu0 %v8500_v34, %s7877_s3 }
0x23ea   : > { %v4953_v16 = vpop.xlane.xlu0 %4952 }
0x23eb   : > { %v4954_v1 = vsub.f32 %v4947_v13, %v4953_v16 }
0x23ed   : > { %v4955_v37 = vmul.f32 1.442695, %v4954_v1 }
0x23ee   : > { %v4963_v38 = vpop.permute.xlu0 %4962 }
0x23ef   : > { %7766 = vpow2.f32 %v4955_v37  ;;  %7382 = vmatpush3.msra.mxu0 %v4963_v38 }
0x23f0   : > { %7391 = vmatprep.subr.mxu0 %v7872_v12 }
0x23f2   : > { %v5279_v48 = vpop.permute.xlu0 %5278 }
0x23f9   : > { %v7767_v40 = vpop.eup %7766 }
0x23fa   : > { %v4957_v41 = vsel %vm1726_vm3, %v7767_v40, 0.0 }
0x23fb   : > { %4958 = vadd.xlane.f32.xlu1 %v4957_v41 }
0x240c   : > { %5276 = vrot.lane.b32.xlu1 %v8500_v34, %s7874_s10 }
0x242b   : > { %v4868_v42 = vpop.f32.mrb[46].mxu0 }
0x242c   : > { %v4872_v35 = vadd.f32 %v4868_v42, %v4631_v11  ;;  %v7375_v43 = vpop.f32.mrb[47].mxu0 }
0x2488   : > { %v4959_v45 = vpop.xlane.xlu1 %4958 }
0x2489   : > { %7768 = vrcp.f32 %v4959_v45  ;;  %v6920_v45 = vld [vmem:[%s1424_s27] ss:$0 sm:$0xff] }
0x248c   : > { %v5277_v50 = vpop.permute.xlu1 %5276 }
0x2493   : > { %v7769_v46 = vpop.eup %7768 }
0x2494   : > { %v4961_v47 = vmul.f32 %v7769_v46, %v7767_v40 }
0x2496   : > { %7384 = vmatmul.mubr.msk.f32.vlgmr.msra.gmra.mrb[48].mxu0 %vm1726_vm3, %v4961_v47 }
0x2497   : > { %7392 = vmatpush3.xpose.msk.msra.mxu0 %vm1726_vm3, %v5114_v44  ;;  %7393 = vmatprep.mubr.msk.f32.mxu0 %vm7873_vm2, %v7872_v12 }
0x2498   : > { %7401 = vmatprep.subr.mxu0 %v7872_v12 }
0x249a   : > { %7394 = vmatmul.mubr.msk.f32.vlgmr.msra.gmra.mrb[50].mxu0 %vm1726_vm3, %v8500_v34 }
0x249b   : > { %7402 = vmatpush3.xpose.msk.msra.mxu0 %vm1726_vm3, %v5279_v48  ;;  %7403 = vmatprep.mubr.msk.f32.mxu0 %vm7873_vm2, %v7872_v12 }
0x249c   : > { %7411 = vmatprep.subr.mxu0 %v7872_v12 }
0x249e   : > { %7404 = vmatmul.mubr.msk.f32.vlgmr.msra.gmra.mrb[52].mxu0 %vm1726_vm3, %v5277_v50 }
0x249f   : > { %7412 = vmatpush3.msra.mxu0 %v8539_v62  ;;  %7413 = vmatprep.mubr.msk.f32.mxu0 %vm7873_vm2, %v7872_v12 }
0x24a0   : > { %7421 = vmatprep.subr.mxu0 %v7872_v12 }
0x2569   : > { %v5034_v2 = vpop.f32.mrb[48].mxu0 }
0x256a   : > { %v7385_v39 = vpop.f32.mrb[49].mxu0  ;;  %7389 = vmatmul.mubr.msk.f32.vlgmr.msra.gmra.mrb[32].mxu1 %vm1726_vm3, %v5034_v2 }
0x256b   : > { %7398 = vmatprep.mubr.msk.f32.mxu1 %vm7873_vm2, %v7872_v12 }
0x256d   : > { %v5185_v53 = vpop.f32.mrb[50].mxu0 }
0x256e   : > { %v7395_v54 = vpop.f32.mrb[51].mxu0  ;;  %v5189_v55 = vsel %vm1726_vm3, %v5185_v53, -inf }
0x256f   : > { %5190 = vmax.xlane.f32.xlu0 %v5189_v55 }
0x2571   : > { %v5350_v56 = vpop.f32.mrb[52].mxu0 }
0x2572   : > { %v7405_v57 = vpop.f32.mrb[53].mxu0  ;;  %v5354_v58 = vsel %vm1726_vm3, %v5350_v56, -inf }
0x2573   : > { %5355 = vmax.xlane.f32.xlu1 %v5354_v58 }
0x2584   : > { %5365 = vrot.lane.b32.xlu1 %v8500_v34, %s7885_s20 }
0x2588   : > { %5589 = vrot.lane.b32.xlu1 %v8500_v34, %s7878_s12 }
0x258c   : > { %5587 = vrot.lane.b32.xlu1 %v8500_v34, %s7876_s25 }
0x25fc   : > { %v5191_v59 = vpop.xlane.xlu0 %5190 }
0x25fd   : > { %v5192_v60 = vsub.f32 %v5185_v53, %v5191_v59 }
0x25ff   : > { %v5193_v62 = vmul.f32 1.442695, %v5192_v60 }
0x2600   : > { %v5356_v15 = vpop.xlane.xlu1 %5355 }
0x2601   : > { %7770 = vpow2.f32 %v5193_v62  ;;  %v5357_v63 = vsub.f32 %v5350_v56, %v5356_v15 }
0x2603   : > { %v5358_v0 = vmul.f32 1.442695, %v5357_v63 }
0x2604   : > { %v5366_v21 = vpop.permute.xlu1 %5365 }
0x2605   : > { %7772 = vpow2.f32 %v5358_v0 }
0x2608   : > { %v5590_v26 = vpop.permute.xlu1 %5589 }
0x260b   : > { %v7771_v5 = vpop.eup %7770 }
0x260c   : > { %v5195_v6 = vsel %vm1726_vm3, %v7771_v5, 0.0 }
0x260d   : > { %5196 = vadd.xlane.f32.xlu0 %v5195_v6 }
0x260f   : > { %v7773_v7 = vpop.eup %7772 }
0x2610   : > { %v5360_v8 = vsel %vm1726_vm3, %v7773_v7, 0.0 }
0x2611   : > { %5361 = vadd.xlane.f32.xlu0 %v5360_v8 }
0x2627   : > { %5200 = vrot.lane.b32.xlu0 %v8500_v34, %s7884_s14 }
0x263d   : > { %v5107_v9 = vpop.f32.mrb[32].mxu1 }
0x263e   : > { %v8634_v4 = vadd.f32 %v5107_v9, %v4872_v35  ;;  %v7390_v10 = vpop.f32.mrb[33].mxu1 }
0x2640   : > { %v6072_v47 = vadd.f32 %v6920_v45, %v8634_v4 }
0x2642   : > { %v8685_v2 = vadd.f32 %v6072_v47, %v8477_v61 }
0x2644   : > { %v6078_v53 = vsel %vm1464_vm1, %v8685_v2, 0.0 }
0x269a   : > { %v5197_v11 = vpop.xlane.xlu0 %5196 }
0x269b   : > { %7774 = vrcp.f32 %v5197_v11 }
0x269e   : > { %v5362_v18 = vpop.xlane.xlu0 %5361 }
0x269f   : > { %7776 = vrcp.f32 %v5362_v18 }
0x26a2   : > { %v5201_v49 = vpop.permute.xlu0 %5200 }
0x26a3   : > { %7397 = vmatpush3.msra.mxu1 %v5201_v49 }
0x26a4   : > { %7406 = vmatprep.subr.mxu1 %v7872_v12 }
0x26a5   : > { %v7775_v19 = vpop.eup %7774 }
0x26a6   : > { %v5199_v20 = vmul.f32 %v7775_v19, %v7771_v5 }
0x26a8   : > { %7399 = vmatmul.mubr.msk.f32.vlgmr.msra.gmra.mrb[34].mxu1 %vm1726_vm3, %v5199_v20 }
0x26a9   : > { %v7777_v22 = vpop.eup %7776  ;;  %7407 = vmatpush3.msra.mxu1 %v5366_v21  ;;  %7408 = vmatprep.mubr.msk.f32.mxu1 %vm7873_vm2, %v7872_v12 }
0x26aa   : > { %v5364_v23 = vmul.f32 %v7777_v22, %v7773_v7  ;;  %7416 = vmatprep.subr.mxu1 %v7872_v12 }
0x26ac   : > { %7409 = vmatmul.mubr.msk.f32.vlgmr.msra.gmra.mrb[36].mxu1 %vm1726_vm3, %v5364_v23 }
0x26ad   : > { %7417 = vmatpush3.msra.mxu1 %v8544_v3  ;;  %7418 = vmatprep.mubr.msk.f32.mxu1 %vm7873_vm2, %v7872_v12  ;;  %v5588_v3 = vpop.permute.xlu1 %5587 }
0x26ae   : > { %7426 = vmatprep.subr.mxu1 %v7872_v12 }
0x277b   : > { %v5272_v24 = vpop.f32.mrb[34].mxu1 }
0x277c   : > { %v7400_v25 = vpop.f32.mrb[35].mxu1  ;;  %7419 = vmatmul.mubr.msk.f32.vlgmr.msra.gmra.mrb[38].mxu1 %vm1726_vm3, %v5272_v24 }
0x277d   : > { %7428 = vmatprep.mubr.msk.f32.mxu1 %vm7873_vm2, %v7872_v12 }
0x277f   : > { %v5437_v27 = vpop.f32.mrb[36].mxu1 }
0x2780   : > { %v7410_v14 = vpop.f32.mrb[37].mxu1  ;;  %7414 = vmatmul.mubr.msk.f32.vlgmr.msra.gmra.mrb[54].mxu0 %vm1726_vm3, %v5437_v27 }
0x2781   : > { %7422 = vmatpush3.xpose.msk.msra.mxu0 %vm1726_vm3, %v5590_v26  ;;  %7423 = vmatprep.mubr.msk.f32.mxu0 %vm7873_vm2, %v7872_v12  ;;  %v6921_v14 = vld [vmem:[%s1427_s4] ss:$0 sm:$0xff] }
0x2782   : > { %7431 = vmatprep.subr.mxu0 %v7872_v12 }
0x2784   : > { %7424 = vmatmul.mubr.msk.f32.vlgmr.msra.gmra.mrb[56].mxu0 %vm1726_vm3, %v5588_v3 }
0x2785   : > { %7432 = vmatpush3.msra.mxu0 %v8582_v30  ;;  %7433 = vmatprep.mubr.msk.f32.mxu0 %vm7873_vm2, %v7872_v12 }
0x2786   : > { %7441 = vmatprep.subr.mxu0 %v7872_v12 }
0x284f   : > { %v5583_v28 = vpop.f32.mrb[38].mxu1 }
0x2850   : > { %v7420_v17 = vpop.f32.mrb[39].mxu1 }
0x2853   : > { %v5510_v29 = vpop.f32.mrb[54].mxu0 }
0x2854   : > { %v5584_v31 = vadd.f32 %v5583_v28, %v5510_v29  ;;  %v7415_v32 = vpop.f32.mrb[55].mxu0  ;;  %v6922_v28 = vld [vmem:[%s1430_s8] ss:$0 sm:$0xff]  ;;  %s8888_s8 = sld [smem:[#allocation37_spill]] }
0x2855   : > { %v6121_v32 = vld [vmem:[%s8141_s24 + $0x8] sm:$0xff] }
0x2857   : > { %v5661_v13 = vpop.f32.mrb[56].mxu0 }
0x2858   : > { %v7425_v33 = vpop.f32.mrb[57].mxu0  ;;  %v5665_v36 = vsel %vm1726_vm3, %v5661_v13, -inf }
0x2859   : > { %5666 = vmax.xlane.f32.xlu0 %v5665_v36  ;;  %v6122_v33 = vld [vmem:[%s8141_s24 + $0x10] sm:$0xff]  ;;  %v6123_v36 = vld [vmem:[%s8141_s24 + $0x18] sm:$0xff] }
0x286f   : > { %5676 = vrot.lane.b32.xlu0 %v8500_v34, %s7886_s18 }
0x2873   : > { %5826 = vrot.lane.b32.xlu0 %v8500_v34, %s7879_s15 }
0x28e6   : > { %v5667_v30 = vpop.xlane.xlu0 %5666 }
0x28e7   : > { %v5668_v16 = vsub.f32 %v5661_v13, %v5667_v30  ;;  %v7584_v30 = vpack.c.bf16 %v6123_v36, %v6122_v33 }
0x28e9   : > { %v5669_v1 = vmul.f32 1.442695, %v5668_v16  ;;  %v6222_v16 = vld [vmem:[%s8146_s21] sm:$0xff] }
0x28ea   : > { %v5677_v37 = vpop.permute.xlu0 %5676 }
0x28eb   : > { %7778 = vpow2.f32 %v5669_v1  ;;  %7427 = vmatpush3.msra.mxu1 %v5677_v37  ;;  %v6223_v1 = vld [vmem:[%s8146_s21 + $0x8] sm:$0xff]  ;;  %v6224_v37 = vld [vmem:[%s8146_s21 + $0x10] sm:$0xff] }
0x28ec   : > { %7436 = vmatprep.subr.mxu1 %v7872_v12 }
0x28ee   : > { %v5827_v44 = vpop.permute.xlu0 %5826 }
0x28f5   : > { %v7779_v38 = vpop.eup %7778 }
0x28f6   : > { %v5671_v40 = vsel %vm1726_vm3, %v7779_v38, 0.0 }
0x28f7   : > { %5672 = vadd.xlane.f32.xlu1 %v5671_v40  ;;  %v6225_v40 = vld [vmem:[%s8146_s21 + $0x18] sm:$0xff] }
0x2908   : > { %5828 = vrot.lane.b32.xlu1 %v8500_v34, %s7880_s23 }
0x2984   : > { %v5673_v41 = vpop.xlane.xlu1 %5672 }
0x2985   : > { %7780 = vrcp.f32 %v5673_v41  ;;  %v7592_v41 = vpack.c.bf16 %v6225_v40, %v6224_v37 }
0x2988   : > { %v5829_v43 = vpop.permute.xlu1 %5828 }
0x298f   : > { %v7781_v42 = vpop.eup %7780 }
0x2990   : > { %v5675_v35 = vmul.f32 %v7781_v42, %v7779_v38  ;;  %v7588_v38 = vpack.c.bf16 %v6223_v1, %v6222_v16  ;;  %v6226_v42 = vld [vmem:[%s8146_s21 + $0x20] sm:$0xff] }
0x2992   : > { %7429 = vmatmul.mubr.msk.f32.vlgmr.msra.gmra.mrb[40].mxu1 %vm1726_vm3, %v5675_v35  ;;  %v6227_v35 = vld [vmem:[%s8146_s21 + $0x28] sm:$0xff] }
0x2993   : > { %7437 = vmatpush3.xpose.msk.msra.mxu1 %vm1726_vm3, %v5829_v43  ;;  %7438 = vmatprep.mubr.msk.f32.mxu1 %vm7873_vm2, %v7872_v12  ;;  %v7596_v43 = vpack.c.bf16 %v6227_v35, %v6226_v42 }
0x2994   : > { %7446 = vmatprep.subr.mxu1 %v7872_v12 }
0x2996   : > { %7439 = vmatmul.mubr.msk.f32.vlgmr.msra.gmra.mrb[42].mxu1 %vm1726_vm3, %v5827_v44 }
0x2997   : > { %7447 = vmatpush3.msra.mxu1 %v8615_v51  ;;  %7448 = vmatprep.mubr.msk.f32.mxu1 %vm7873_vm2, %v7872_v12 }
0x2998   : > { %7589 = vmatprep.subr.bf16.mxu1 %v7588_v38 }
0x2a65   : > { %v5748_v46 = vpop.f32.mrb[40].mxu1 }
0x2a66   : > { %v7430_v48 = vpop.f32.mrb[41].mxu1  ;;  %7434 = vmatmul.mubr.msk.f32.vlgmr.msra.gmra.mrb[58].mxu0 %vm1726_vm3, %v5748_v46 }
0x2a67   : > { %7443 = vmatprep.mubr.msk.f32.mxu0 %vm7873_vm2, %v7872_v12 }
0x2a69   : > { %v5900_v50 = vpop.f32.mrb[42].mxu1 }
0x2a6a   : > { %v7440_v39 = vpop.f32.mrb[43].mxu1  ;;  %v5904_v51 = vsel %vm1726_vm3, %v5900_v50, -inf }
0x2a6b   : > { %5905 = vmax.xlane.f32.xlu1 %v5904_v51  ;;  %v6228_v51 = vld [vmem:[%s8146_s21 + $0x30] sm:$0xff] }
0x2a6f   : > { %6079 = vadd.xlane.f32.xlu1 %v6078_v53  ;;  %v6229_v53 = vld [vmem:[%s8146_s21 + $0x38] sm:$0xff] }
0x2af8   : > { %v5906_v54 = vpop.xlane.xlu1 %5905 }
0x2af9   : > { %v5907_v55 = vsub.f32 %v5900_v50, %v5906_v54  ;;  %v7600_v54 = vpack.c.bf16 %v6229_v53, %v6228_v51 }
0x2afb   : > { %v5908_v56 = vmul.f32 1.442695, %v5907_v55  ;;  %v6230_v55 = vld [vmem:[%s8146_s21 + $0x40] sm:$0xff] }
0x2afc   : > { %v6080_v6 = vpop.xlane.xlu1 %6079 }
0x2afd   : > { %7782 = vpow2.f32 %v5908_v56  ;;  %v6084_v7 = vmul.f32 0.03125, %v6080_v6  ;;  %v6231_v56 = vld [vmem:[%s8146_s21 + $0x48] sm:$0xff] }
0x2aff   : > { %v6086_v4 = vsub.f32 %v8685_v2, %v6084_v7 }
0x2b01   : > { %v6088_v49 = vmul.f32 %v6086_v4, %v6086_v4 }
0x2b03   : > { %v6090_v19 = vsel %vm1464_vm1, %v6088_v49, 0.0 }
0x2b07   : > { %v7783_v57 = vpop.eup %7782 }
0x2b08   : > { %v5910_v58 = vsel %vm1726_vm3, %v7783_v57, 0.0 }
0x2b09   : > { %5911 = vadd.xlane.f32.xlu0 %v5910_v58  ;;  %v6232_v58 = vld [vmem:[%s8146_s21 + $0x50] sm:$0xff] }
0x2b1f   : > { %5915 = vrot.lane.b32.xlu0 %v8500_v34, %s7887_s11 }
0x2b39   : > { %v5821_v12 = vpop.f32.mrb[58].mxu0 }
0x2b3a   : > { %v5825_v61 = vadd.f32 %v5821_v12, %v5584_v31  ;;  %v7435_v59 = vpop.f32.mrb[59].mxu0  ;;  %v6120_v31 = vld [vmem:[%s8141_s24] sm:$0xff]  ;;  %v6233_v12 = vld [vmem:[%s8146_s21 + $0x58] sm:$0xff] }
0x2b3b   : > { %v7580_v13 = vpack.c.bf16 %v6121_v32, %v6120_v31  ;;  %v6234_v59 = vld [vmem:[%s8146_s21 + $0x60] sm:$0xff] }
0x2b96   : > { %v5912_v60 = vpop.xlane.xlu0 %5911 }
0x2b97   : > { %7784 = vrcp.f32 %v5912_v60  ;;  %v6235_v60 = vld [vmem:[%s8146_s21 + $0x68] sm:$0xff] }
0x2b9a   : > { %v5916_v62 = vpop.permute.xlu0 %5915 }
0x2b9b   : > { %7442 = vmatpush3.msra.mxu0 %v5916_v62  ;;  %v7612_v62 = vpack.c.bf16 %v6235_v60, %v6234_v59 }
0x2b9c   : > { %7581 = vmatprep.subr.bf16.mxu0 %v7580_v13 }
0x2ba1   : > { %v7785_v15 = vpop.eup %7784 }
0x2ba2   : > { %v5914_v63 = vmul.f32 %v7785_v15, %v7783_v57  ;;  %v7604_v57 = vpack.c.bf16 %v6231_v56, %v6230_v55  ;;  %v6236_v15 = vld [vmem:[%s8146_s21 + $0x70] sm:$0xff] }
0x2ba4   : > { %7444 = vmatmul.mubr.msk.f32.vlgmr.msra.gmra.mrb[60].mxu0 %vm1726_vm3, %v5914_v63  ;;  %v6237_v63 = vld [vmem:[%s8146_s21 + $0x78] sm:$0xff]  ;;  %s8889_s21 = scalar_lea.vmem %s8888_s8, %s8082_s0 }
0x2ba5   : > { %7583 = vmatpush3.bf16.msra.mxu0 %v7580_v13 }
0x2ba6   : > { %7585 = vmatprep.subr.bf16.mxu0 %v7584_v30 }
0x2ba9   : > { %7587 = vmatpush3.bf16.msra.mxu0 %v7584_v30 }
0x2c77   : > { %v5987_v0 = vpop.f32.mrb[60].mxu0 }
0x2c78   : > { %v7445_v5 = vpop.f32.mrb[61].mxu0  ;;  %7449 = vmatmul.mubr.msk.f32.vlgmr.msra.gmra.mrb[44].mxu1 %vm1726_vm3, %v5987_v0  ;;  %v7616_v0 = vpack.c.bf16 %v6237_v63, %v6236_v15 }
0x2c79   : > { %7591 = vmatpush3.bf16.msra.mxu1 %v7588_v38  ;;  %v6923_v5 = vld [vmem:[%s1438_s29] ss:$0 sm:$0xff]  ;;  %s8890_s29 = sld [smem:[#allocation40_spill]] }
0x2c7a   : > { %7593 = vmatprep.subr.bf16.mxu1 %v7592_v41 }
0x2c7d   : > { %7595 = vmatpush3.bf16.msra.mxu1 %v7592_v41 }
0x2c7e   : > { %7597 = vmatprep.subr.bf16.mxu1 %v7596_v43 }
0x2c7f   : > { %p6927_p5 = scmp.ne.s32.totalorder %s8890_s29, 1 }
0x2c80   : > { %s8891_s24 = sld [smem:[#allocation11_spill]] (!%p6927_p5)  ;;  %s8892_s4 = sld [smem:[#allocation9_spill]] (!%p6927_p5) }
0x2c81   : > { %7599 = vmatpush3.bf16.msra.mxu1 %v7596_v43  ;;  %s8893_s0 = sld [smem:[#allocation10_spill]] (!%p6927_p5)  ;;  %s8894_s25 = sld [smem:[#allocation12_spill]] (!%p6927_p5) }
0x2c82   : > { %7601 = vmatprep.subr.bf16.mxu1 %v7600_v54 }
0x2c85   : > { %7603 = vmatpush3.bf16.msra.mxu1 %v7600_v54 }
0x2c86   : > { %7605 = vmatprep.subr.bf16.mxu1 %v7604_v57  ;;  %v6372_v1 = vld [vmem:[%s8891_s24] sm:$0xff] (!%p6927_p5)  ;;  %v6373_v37 = vld [vmem:[%s8891_s24 + $0x8] sm:$0xff] (!%p6927_p5)  ;;  %v6374_v38 = vld [vmem:[%s8891_s24 + $0x10] sm:$0xff] (!%p6927_p5) }
0x2c87   : > { %v7620_v40 = vpack.c.bf16 (!%p6927_p5), %v6373_v37, %v6372_v1  ;;  %v6375_v41 = vld [vmem:[%s8891_s24 + $0x18] sm:$0xff] (!%p6927_p5)  ;;  %v6929_v51 = vld [vmem:[%s8893_s0] ss:$0 sm:$0xff] (!%p6927_p5) }
0x2c88   : > { %v7624_v42 = vpack.c.bf16 (!%p6927_p5), %v6375_v41, %v6374_v38 }
0x2c89   : > { %7607 = vmatpush3.bf16.msra.mxu1 %v7604_v57  ;;  %7621 = vmatprep.subr.bf16.mxu0 (!%p6927_p5), %v7620_v40 }
0x2d4b   : > { %v6060_v8 = vpop.f32.mrb[44].mxu1 }
0x2d4c   : > { %v6064_v9 = vadd.f32 %v6060_v8, %v5825_v61  ;;  %v7450_v34 = vpop.f32.mrb[45].mxu1  ;;  %v7608_v61 = vpack.c.bf16 %v6233_v12, %v6232_v58  ;;  %v6930_v12 = vld [vmem:[%s8894_s25] ss:$0 sm:$0xff] (!%p6927_p5) }
0x2d4e   : > { %v6073_v10 = vadd.f32 %v6920_v45, %v6064_v9  ;;  %7609 = vmatprep.subr.bf16.mxu1 %v7608_v61 }
0x2d4f   : > { %7611 = vmatpush3.bf16.msra.mxu1 %v7608_v61 }
0x2d50   : > { %v8697_v11 = vadd.f32 %v6073_v10, %v8473_v52  ;;  %7613 = vmatprep.subr.bf16.mxu1 %v7612_v62 }
0x2d52   : > { %v6081_v18 = vsel %vm1464_vm1, %v8697_v11, 0.0 }
0x2d53   : > { %6082 = vadd.xlane.f32.xlu1 %v6081_v18  ;;  %7615 = vmatpush3.bf16.msra.mxu1 %v7612_v62 }
0x2d54   : > { %7617 = vmatprep.subr.bf16.mxu1 %v7616_v0 }
0x2d57   : > { %6091 = vadd.xlane.f32.xlu1 %v6090_v19  ;;  %7619 = vmatpush3.bf16.msra.mxu1 %v7616_v0 }
0x2de0   : > { %v6083_v20 = vpop.xlane.xlu1 %6082 }
0x2de1   : > { %v6085_v21 = vmul.f32 0.03125, %v6083_v20 }
0x2de3   : > { %v6087_v22 = vsub.f32 %v8697_v11, %v6085_v21 }
0x2de4   : > { %v6092_v52 = vpop.xlane.xlu1 %6091 }
0x2de5   : > { %v6096_v23 = vmul.f32 0.03125, %v6092_v52  ;;  %v6089_v24 = vmul.f32 %v6087_v22, %v6087_v22 }
0x2de7   : > { %v6098_v25 = vadd.f32 1e-05, %v6096_v23  ;;  %v6093_v26 = vsel %vm1464_vm1, %v6089_v24, 0.0  ;;  %v6926_v23 = vld [vmem:[%s8889_s21] ss:$0 sm:$0xff] }
0x2de8   : > { %6094 = vadd.xlane.f32.xlu1 %v6093_v26 }
0x2de9   : > { %7786 = vrsqrt.f32 %v6098_v25 }
0x2df3   : > { %v7787_v27 = vpop.eup %7786 }
0x2df4   : > { %v6102_v3 = vmul.f32 %v7787_v27, %v6086_v4 }
0x2df6   : > { %v6110_v17 = vmul.f32 %v6921_v14, %v6102_v3 }
0x2df8   : > { %v6118_v29 = vadd.f32 %v6922_v28, %v6110_v17 }
0x2dfa   : > { %7459 = vmatprep.mubr.msk.f32.mxu0 %vm1464_vm1, %v6118_v29 }
0x2e75   : > { %v6095_v44 = vpop.xlane.xlu1 %6094 }
0x2e76   : > { %v6097_v45 = vmul.f32 0.03125, %v6095_v44 }
0x2e78   : > { %v6099_v46 = vadd.f32 1e-05, %v6097_v45 }
0x2e7a   : > { %7788 = vrsqrt.f32 %v6099_v46 }
0x2e84   : > { %v7789_v47 = vpop.eup %7788 }
0x2e85   : > { %v6103_v48 = vmul.f32 %v7789_v47, %v6087_v22 }
0x2e87   : > { %v6111_v50 = vmul.f32 %v6921_v14, %v6103_v48 }
0x2e89   : > { %v6119_v39 = vadd.f32 %v6922_v28, %v6111_v50  ;;  %v6928_v50 = vld [vmem:[%s8892_s4] ss:$0 sm:$0xff] (!%p6927_p5) }
0x2e8b   : > { %7460 = vmatmul.mubr.msk.f32.vlgmr.msra.gmra.mrb[62].mxu0 %vm1464_vm1, %v6119_v39 }
0x2e8c   : > { %7623 = vmatpush3.bf16.msra.mxu0 (!%p6927_p5), %v7620_v40 }
0x2e8d   : > { %7625 = vmatprep.subr.bf16.mxu0 (!%p6927_p5), %v7624_v42 }
0x2e90   : > { %7627 = vmatpush3.bf16.msra.mxu0 (!%p6927_p5), %v7624_v42 }
0x2f5e   : > { %v7461_v6 = vpop.f32.mrb[62].mxu0 }
0x2f5f   : > { %v6209_v7 = vadd.f32 %v7461_v6, %v6923_v5  ;;  %v6203_v8 = vpop.f32.mrb[63].mxu0 }
0x2f60   : > { %v6204_v9 = vadd.f32 %v6923_v5, %v6203_v8 }
0x2f61   : > { %v6215_v34 = vmul.f32 0.70710677, %v6209_v7  ;;  %v6213_v21 = vmul.f32 0.5, %v6209_v7 }
0x2f62   : > { %v6214_v4 = vmul.f32 0.70710677, %v6204_v9  ;;  %v6212_v19 = vmul.f32 0.5, %v6204_v9 }
0x2f63   : > { %7790 = verf.f32 %v6215_v34 }
0x2f64   : > { %7792 = verf.f32 %v6214_v4 }
0x2f6d   : > { %v7791_v10 = vpop.eup %7790 }
0x2f6e   : > { %v7793_v18 = vpop.eup %7792  ;;  %v6219_v49 = vadd.f32 1.0, %v7791_v10 }
0x2f6f   : > { %v6218_v20 = vadd.f32 1.0, %v7793_v18 }
0x2f70   : > { %v6221_v52 = vmul.f32 %v6219_v49, %v6213_v21 }
0x2f71   : > { %v6220_v22 = vmul.f32 %v6218_v20, %v6212_v19 }
0x2f73   : > { %7494 = vmatprep.mubr.f32.mxu1 %v6220_v22 }
0x2f74   : > { %7495 = vmatmul.mubr.f32.vlgmr.msra.gmra.mrb[46].mxu1 %v6221_v52 }
0x3047   : > { %v7496_v24 = vpop.f32.mrb[46].mxu1  ;;  %6327 = sbr.rel (%p6927_p5) target bundleno = 12898 (0x3262), region = 164 }
0x3048   : > { %v6317_v25 = vadd.f32 %v7496_v24, %v6926_v23  ;;  %v6311_v26 = vpop.f32.mrb[47].mxu1 }
0x3049   : > { %v6312_v27 = vadd.f32 %v6926_v23, %v6311_v26 }
0x304a   : > { %v6321_v14 = vadd.f32 %v6317_v25, %v8697_v11 }
0x304b   : > { %v6320_v3 = vadd.f32 %v6312_v27, %v8685_v2 }
0x304c   : > { %6323 = vst.msk [vmem:[#allocation2 + $0x8] sm:$0xff] %vm1464_vm1, %v6321_v14  ;;  %v6333_v17 = vsel (!%p6927_p5), %vm1464_vm1, %v6321_v14, 0.0 }
0x304d   : > { %6322 = vst.msk [vmem:[#allocation2] sm:$0xff] %vm1464_vm1, %v6320_v3  ;;  %v6330_v28 = vsel (!%p6927_p5), %vm1464_vm1, %v6320_v3, 0.0 }
0x304e   : > { %6331 = vadd.xlane.f32.xlu0 %v6330_v28 }
0x3052   : > { %6334 = vadd.xlane.f32.xlu0 %v6333_v17 }
0x30db   : > { %v6332_v29 = vpop.xlane.xlu0 %6331 }
0x30dc   : > { %v6336_v11 = vmul.f32 0.03125, %v6332_v29 }
0x30de   : > { %v6338_v2 = vsub.f32 %v6320_v3, %v6336_v11 }
0x30df   : > { %v6335_v31 = vpop.xlane.xlu0 %6334 }
0x30e0   : > { %v6337_v32 = vmul.f32 0.03125, %v6335_v31  ;;  %v6340_v13 = vmul.f32 %v6338_v2, %v6338_v2 }
0x30e2   : > { %v6339_v33 = vsub.f32 %v6321_v14, %v6337_v32  ;;  %v6342_v36 = vsel %vm1464_vm1, %v6340_v13, 0.0 }
0x30e3   : > { %6343 = vadd.xlane.f32.xlu1 %v6342_v36 }
0x30e4   : > { %v6341_v30 = vmul.f32 %v6339_v33, %v6339_v33 }
0x30e6   : > { %v6345_v16 = vsel %vm1464_vm1, %v6341_v30, 0.0 }
0x30e7   : > { %6346 = vadd.xlane.f32.xlu1 %v6345_v16 }
0x3170   : > { %v6344_v35 = vpop.xlane.xlu1 %6343 }
0x3171   : > { %v6348_v43 = vmul.f32 0.03125, %v6344_v35 }
0x3173   : > { %v6350_v44 = vadd.f32 1e-05, %v6348_v43 }
0x3174   : > { %v6347_v45 = vpop.xlane.xlu1 %6346 }
0x3175   : > { %7796 = vrsqrt.f32 %v6350_v44  ;;  %v6349_v46 = vmul.f32 0.03125, %v6347_v45 }
0x3177   : > { %v6351_v47 = vadd.f32 1e-05, %v6349_v46 }
0x3179   : > { %7798 = vrsqrt.f32 %v6351_v47 }
0x317f   : > { %v7797_v48 = vpop.eup %7796 }
0x3180   : > { %v6354_v39 = vmul.f32 %v7797_v48, %v6338_v2 }
0x3182   : > { %v6362_v53 = vmul.f32 %v6928_v50, %v6354_v39 }
0x3183   : > { %v7799_v54 = vpop.eup %7798 }
0x3184   : > { %v6355_v55 = vmul.f32 %v7799_v54, %v6339_v33  ;;  %v6370_v56 = vadd.f32 %v6929_v51, %v6362_v53 }
0x3186   : > { %v6363_v57 = vmul.f32 %v6928_v50, %v6355_v55  ;;  %7505 = vmatprep.mubr.msk.f32.mxu0 %vm1464_vm1, %v6370_v56 }
0x3188   : > { %v6371_v58 = vadd.f32 %v6929_v51, %v6363_v57 }
0x318a   : > { %7506 = vmatmul.mubr.msk.f32.vlgmr.msra.gmra.mrb[0].mxu0 %vm1464_vm1, %v6371_v58 }
0x325d   : > { %v7507_v61 = vpop.f32.mrb[0].mxu0 }
0x325e   : > { %v6461_v59 = vadd.f32 %v7507_v61, %v6930_v12  ;;  %v6455_v60 = vpop.f32.mrb[1].mxu0 }
0x325f   : > { %v6456_v62 = vadd.f32 %v6930_v12, %v6455_v60 }
0x3260   : > { %6465 = vst.msk [vmem:[#allocation3 + $0x8] sm:$0xff] %vm1464_vm1, %v6461_v59 }
0x3261   : > { %6464 = vst.msk [vmem:[#allocation3] sm:$0xff] %vm1464_vm1, %v6456_v62 }
0x3262 PF: > { %s8895_s3 = sld [smem:[#allocation40_spill]]  ;;  %s7888_s12 = smov [#allocation3]  }
0x3263   : > { %s6472_s15 = sshll.u32 %s7888_s12, 4  ;;  %s6473_s15 = int_to_ptr.vmem [resolvable:$true] %s6472_s15 }
0x3264   : > { %s7800_s23 = scalar_lea.vmem %s6473_s15, 256  ;;  %p7807_p10 = scmp.lt.s32.totalorder %s6473_s15, %s6473_s15 }
0x3265   : > { %p7801_p7 = scmp.ne.s32.totalorder %s6473_s15, %s7800_s23  ;;  %p7808_p11 = scmp.lt.s32.totalorder %s7800_s23, %s7800_s23 }
0x3267   : > { %p7809_p12 = por %p7808_p11, %p7807_p10 }
0x3268   : > { %p7632_p6 = scmp.eq.s32.totalorder %s8895_s3, 1 }
0x326a   : > { %p7802_p8 = pnand %p7801_p7, %p7632_p6 }
0x326c   : > { %p7803_p9 = pneg %p7802_p8 }
0x326e   : > { %p7810_p13 = pnand %p7809_p12, %p7803_p9 }
0x3270   : > { %7813 = shalt.err (!%p7810_p13)
}
0x3271   : > { %s8896_s1 = sld [smem:[#allocation38_spill]] }
0x3277   : > { %s7814_s2 = scalar_lea.hbm %s8896_s1, 256 }
0x3278   : > { %p7815_p0 = scmp.ne.s32.totalorder %s8896_s1, %s7814_s2  ;;  %p7820_p3 = scmp.lt.u32.totalorder %s7814_s2, %s8896_s1 }
0x327a   : > { %p7816_p1 = pnand %p7815_p0, %p7632_p6 }
0x327c   : > { %p7817_p2 = pneg %p7816_p1 }
0x327e   : > { %p7822_p4 = pnand %p7820_p3, %p7817_p2 }
0x3280   : > { %7825 = shalt.err (!%p7822_p4)
}
0x3281   : > { %s7889_s5 = smov 128  }
0x3282   : > { %7629 = dma.vmem_to_hbm [thread:$0]  (%p7632_p6), %s6473_s15, 256, %s8896_s1, [#allocation4], %s7889_s5, %s7889_s5, %s7881_s16  }
0x3283   : > { %7831 = dma.done.wait (%p7632_p6), [#allocation4], 256  }
0x3284   : > { %7833 = vsyncadd (%p7632_p6), [#allocation4], 4294967040 }
0x3285 PF: > { %s8897_s6 = sld [smem:[#allocation39_spill]] }
0x328b   : > { %s80_s15 = sadd.s32 1, %s8897_s6  }
0x328c   : > { %p77_p5 = scmp.ge.s32.totalorder %s80_s15, 4  }
0x328e   :  { %79 = sbr.rel (!%p77_p5) target bundleno = 75 (0x4b), region = 303 }
0x3295   :  { %6488 = vsyncpa [#allocation4], 1 }
0x3296   :  { %6490 = vsyncpa [#allocation4 + $0x1], 1 }

</bundles_post_ra>
